<compile_context>
chip_gen: v7x
topology: tpu7x:2x2x1
jax: 0.10.0
libtpu: 0.0.40
codegen_flags: <defaults>
</compile_context>

<pallas_src>
import numpy as np

import jax
import jax.numpy as jnp
from jax import lax
from jax.experimental import pallas as pl
from jax.experimental.pallas import tpu as pltpu


# ---------------------------------------------------------------------------
# Fused kernel: conv1 -> pool -> conv2 -> pool -> fc1 -> fc2 -> fc3 (8 images)
# ---------------------------------------------------------------------------

def _shift_rows_up(x, i):
    """out[r, :] = x[r + i, :] (circular over the sublane axis)."""
    if i == 0:
        return x
    return pltpu.roll(x, shift=x.shape[0] - i, axis=0)


def _pairwise_sum(terms):
    """Tree-reduce a list of arrays (breaks the serial vpop->vadd chain)."""
    while len(terms) > 1:
        nxt = [a + b for a, b in zip(terms[0::2], terms[1::2])]
        if len(terms) % 2:
            nxt.append(terms[-1])
        terms = nxt
    return terms[0]


def _lenet_kernel(x_ref, g1_ref, b1_ref, sr1_ref, sc1_ref,
                  g2_ref, b2_ref, sr2_ref, sc2_ref,
                  sf0_ref, wf1_ref, bf1_ref, wf2_ref, bf2_ref,
                  wf3_ref, bf3_ref, out_ref):
    f32 = jnp.float32
    x = x_ref[...]                                             # (B*32, 96)

    # ---- conv1 (+ bias + ReLU): channel-folded banded matmuls -------------
    # y1[b*32+ho, co*28+wo] = conv1(x_b)[co, ho, wo]   (rows ho>=28 garbage)
    y1 = _pairwise_sum([
        jnp.dot(_shift_rows_up(x, i), g1_ref[i], preferred_element_type=f32)
        for i in range(5)])                                    # (B*32, 168)
    y1 = jnp.maximum(y1 + b1_ref[...], 0.0)

    # ---- pool1: even/odd selection matmuls + elementwise max --------------
    rp1 = jnp.maximum(jnp.dot(sr1_ref[0], y1, preferred_element_type=f32),
                      jnp.dot(sr1_ref[1], y1, preferred_element_type=f32))   # (B*16,168)
    p1 = jnp.maximum(jnp.dot(rp1, sc1_ref[0], preferred_element_type=f32),
                     jnp.dot(rp1, sc1_ref[1], preferred_element_type=f32))   # (B*16, 96)
    # p1[b*16+h, c*16+w] = pool1[b, c, h, w] (h,w < 14; other rows/cols are 0)

    # ---- conv2 (+ bias + ReLU) ---------------------------------------------
    y2 = _pairwise_sum([
        jnp.dot(_shift_rows_up(p1, i), g2_ref[i], preferred_element_type=f32)
        for i in range(5)])                                    # (B*16, 160)
    y2 = jnp.maximum(y2 + b2_ref[...], 0.0)
    # y2[b*16+ho, co*10+wo] = conv2(...)[co, ho, wo]  (rows ho>=10 garbage)

    # ---- pool2 --------------------------------------------------------------
    rp2 = jnp.maximum(jnp.dot(sr2_ref[0], y2, preferred_element_type=f32),
                      jnp.dot(sr2_ref[1], y2, preferred_element_type=f32))   # (B*8,160)
    p2 = jnp.maximum(jnp.dot(rp2, sc2_ref[0], preferred_element_type=f32),
                     jnp.dot(rp2, sc2_ref[1], preferred_element_type=f32))   # (B*8, 80)
    # p2[b*8+h, co*5+w] = pool2[b, co, h, w]  (h,w < 5; other rows are 0)

    # ---- fc1 (flatten order folded into permuted weight), fc2, fc3 ---------
    acc = _pairwise_sum([
        jnp.dot(_shift_rows_up(p2, h), wf1_ref[h], preferred_element_type=f32)
        for h in range(5)])                                    # (B*8, 128)
    pre1 = jnp.dot(sf0_ref[...], acc, preferred_element_type=f32)   # (B, 128): row b*8 of acc
    h1 = jnp.maximum(pre1 + bf1_ref[...], 0.0)                 # cols 120.. = 0
    h2 = jnp.maximum(jnp.dot(h1, wf2_ref[...], preferred_element_type=f32)
                     + bf2_ref[...], 0.0)                      # cols 84.. = 0
    out_ref[...] = (jnp.dot(h2, wf3_ref[...], preferred_element_type=f32)
                    + bf3_ref[...])                            # (B, 128), cols 10.. = 0


# ---------------------------------------------------------------------------
# Forward wrapper: one pallas_call for the whole network
# ---------------------------------------------------------------------------

def net_forward(prep, x_nchw):
    B = int(prep["sf0"].shape[0])          # images per grid step (multiple of 8)
    N, C, H, W = x_nchw.shape
    assert (C, H, W) == (3, 32, 32)
    G = -(-N // B)
    n_pad = G * B

    # Repack to (n_pad*32, 96): row n*32+h, col c*32+w (channels folded into K).
    x_rep = jnp.transpose(x_nchw, (0, 2, 1, 3)).reshape(N, H, C * W)
    if n_pad != N:
        pad = jnp.zeros((n_pad - N, H, C * W), x_rep.dtype)
        x_rep = jnp.concatenate([x_rep, pad], axis=0)
    x_rep = x_rep.reshape(n_pad * H, C * W)

    out = pl.pallas_call(
        _lenet_kernel,
        out_shape=jax.ShapeDtypeStruct((n_pad, 128), jnp.float32),
        grid=(G,),
        in_specs=[
            pl.BlockSpec((B * 32, 96), lambda n: (n, 0)),            # x (B images)
            pl.BlockSpec((5, 96, 168), lambda n: (0, 0, 0)),         # g1 (banded)
            pl.BlockSpec((1, 168), lambda n: (0, 0)),                # b1 (tiled)
            pl.BlockSpec((2, B * 16, B * 32), lambda n: (0, 0, 0)),  # pool1 row sel e/o
            pl.BlockSpec((2, 168, 96), lambda n: (0, 0, 0)),         # pool1 col sel e/o
            pl.BlockSpec((5, 96, 160), lambda n: (0, 0, 0)),         # g2 (banded)
            pl.BlockSpec((1, 160), lambda n: (0, 0)),                # b2 (tiled)
            pl.BlockSpec((2, B * 8, B * 16), lambda n: (0, 0, 0)),   # pool2 row sel e/o
            pl.BlockSpec((2, 160, 80), lambda n: (0, 0, 0)),         # pool2 col sel e/o
            pl.BlockSpec((B, B * 8), lambda n: (0, 0)),              # fc1 row-b*8 select
            pl.BlockSpec((5, 80, 128), lambda n: (0, 0, 0)),         # fc1 (permuted, padded)
            pl.BlockSpec((1, 128), lambda n: (0, 0)),                # fc1 bias
            pl.BlockSpec((128, 128), lambda n: (0, 0)),              # fc2 (padded)
            pl.BlockSpec((1, 128), lambda n: (0, 0)),                # fc2 bias
            pl.BlockSpec((128, 128), lambda n: (0, 0)),              # fc3 (padded)
            pl.BlockSpec((1, 128), lambda n: (0, 0)),                # fc3 bias
        ],
        out_specs=pl.BlockSpec((B, 128), lambda n: (n, 0)),          # 1 image per row
        compiler_params=pltpu.CompilerParams(
            dimension_semantics=("parallel",)),
    )(x_rep, prep["g1"], prep["b1"], prep["sr1"], prep["sc1"],
      prep["g2"], prep["b2"], prep["sr2"], prep["sc2"], prep["sf0"],
      prep["wf1"], prep["bf1"], prep["wf2"], prep["bf2"],
      prep["wf3"], prep["bf3"])
    return out[:N, :10]


# ---------------------------------------------------------------------------
# Parameters (PyTorch-default-like uniform init, torch layouts)
# ---------------------------------------------------------------------------

def init_params(key):
    ks = jax.random.split(key, 10)

    def u(k, shape, fan_in):
        bound = 1.0 / jnp.sqrt(float(fan_in))
        return jax.random.uniform(k, shape, jnp.float32, -bound, bound)

    return {
        "conv1_w": u(ks[0], (6, 3, 5, 5), 3 * 5 * 5),
        "conv1_b": u(ks[1], (6,), 3 * 5 * 5),
        "conv2_w": u(ks[2], (16, 6, 5, 5), 6 * 5 * 5),
        "conv2_b": u(ks[3], (16,), 6 * 5 * 5),
        "fc1_w":   u(ks[4], (120, 16 * 5 * 5), 16 * 5 * 5),
        "fc1_b":   u(ks[5], (120,), 16 * 5 * 5),
        "fc2_w":   u(ks[6], (84, 120), 120),
        "fc2_b":   u(ks[7], (84,), 120),
        "fc3_w":   u(ks[8], (10, 84), 84),
        "fc3_b":   u(ks[9], (10,), 84),
    }


def prepare_params(params, block_images=8):
    """One-time host-side repack of torch-layout weights into kernel operands."""
    B = int(block_images)
    assert B >= 8 and B % 8 == 0, "block_images must be a multiple of 8"

    w1 = np.asarray(params["conv1_w"], np.float32)
    b1 = np.asarray(params["conv1_b"], np.float32)
    w2 = np.asarray(params["conv2_w"], np.float32)
    b2 = np.asarray(params["conv2_b"], np.float32)
    fw1 = np.asarray(params["fc1_w"], np.float32)
    fb1 = np.asarray(params["fc1_b"], np.float32)
    fw2 = np.asarray(params["fc2_w"], np.float32)
    fb2 = np.asarray(params["fc2_b"], np.float32)
    fw3 = np.asarray(params["fc3_w"], np.float32)
    fb3 = np.asarray(params["fc3_b"], np.float32)

    # conv1 banded weights (channels folded into K):
    #   g1[i, c*32 + w, co*28 + wo] = w1[co, c, i, w - wo]  for 0 <= w-wo < 5
    g1 = np.zeros((5, 96, 168), np.float32)
    for i in range(5):
        for c in range(3):
            for co in range(6):
                for wo in range(28):
                    for j in range(5):
                        g1[i, c * 32 + wo + j, co * 28 + wo] = w1[co, c, i, j]
    b1big = np.zeros((1, 168), np.float32)
    for co in range(6):
        b1big[0, co * 28:(co + 1) * 28] = b1[co]

    # pool1 even/odd selection: rows (B*16,B*32) select rows 2h / 2h+1 per image;
    # cols (168,96) select cols 2w / 2w+1 per channel and repack to 16-stride.
    sr1 = np.zeros((2, B * 16, B * 32), np.float32)
    for b in range(B):
        for h in range(14):
            sr1[0, b * 16 + h, b * 32 + 2 * h] = 1.0
            sr1[1, b * 16 + h, b * 32 + 2 * h + 1] = 1.0
    sc1 = np.zeros((2, 168, 96), np.float32)
    for co in range(6):
        for w in range(14):
            sc1[0, co * 28 + 2 * w, co * 16 + w] = 1.0
            sc1[1, co * 28 + 2 * w + 1, co * 16 + w] = 1.0

    # conv2 banded weights: g2[i, c*16 + w, co*10 + wo] = w2[co, c, i, w - wo]
    g2 = np.zeros((5, 96, 160), np.float32)
    for i in range(5):
        for c in range(6):
            for co in range(16):
                for wo in range(10):
                    for j in range(5):
                        g2[i, c * 16 + wo + j, co * 10 + wo] = w2[co, c, i, j]
    b2big = np.zeros((1, 160), np.float32)
    for co in range(16):
        b2big[0, co * 10:(co + 1) * 10] = b2[co]

    # pool2 even/odd selection
    sr2 = np.zeros((2, B * 8, B * 16), np.float32)
    for b in range(B):
        for h in range(5):
            sr2[0, b * 8 + h, b * 16 + 2 * h] = 1.0
            sr2[1, b * 8 + h, b * 16 + 2 * h + 1] = 1.0
    sc2 = np.zeros((2, 160, 80), np.float32)
    for co in range(16):
        for w in range(5):
            sc2[0, co * 10 + 2 * w, co * 5 + w] = 1.0
            sc2[1, co * 10 + 2 * w + 1, co * 5 + w] = 1.0

    # fc1-result row selector: picks row b*8 (image b) out of the (B*8,128) acc.
    sf0 = np.zeros((B, B * 8), np.float32)
    for b in range(B):
        sf0[b, b * 8] = 1.0

    # fc1: fold torch.flatten's (C,H,W) ordering into a row-permuted weight,
    # split by pooled row h; pad output lanes to 128.
    wf1 = np.zeros((5, 80, 128), np.float32)
    for h in range(5):
        for co in range(16):
            for w in range(5):
                wf1[h, co * 5 + w, :120] = fw1[:, co * 25 + h * 5 + w]
    bf1 = np.zeros((1, 128), np.float32)
    bf1[0, :120] = fb1

    wf2 = np.zeros((128, 128), np.float32)
    wf2[:120, :84] = fw2.T
    bf2 = np.zeros((1, 128), np.float32)
    bf2[0, :84] = fb2

    wf3 = np.zeros((128, 128), np.float32)
    wf3[:84, :10] = fw3.T
    bf3 = np.zeros((1, 128), np.float32)
    bf3[0, :10] = fb3

    return {k: jnp.asarray(v) for k, v in dict(
        g1=g1, b1=b1big, sr1=sr1, sc1=sc1,
        g2=g2, b2=b2big, sr2=sr2, sc2=sc2, sf0=sf0,
        wf1=wf1, bf1=bf1, wf2=wf2, bf2=bf2, wf3=wf3, bf3=bf3).items()}


# ---------------------------------------------------------------------------
# Pure-JAX reference (for a numerical self-check)
# ---------------------------------------------------------------------------

def net_reference(params, x):
    hp = lax.Precision.HIGHEST
    dn1 = lax.conv_dimension_numbers(x.shape, params["conv1_w"].shape,
                                     ("NCHW", "OIHW", "NCHW"))
    y = lax.conv_general_dilated(x, params["conv1_w"], (1, 1), "VALID",
                                 dimension_numbers=dn1, precision=hp)
    y = jax.nn.relu(y + params["conv1_b"][None, :, None, None])
    y = lax.reduce_window(y, -jnp.inf, lax.max, (1, 1, 2, 2), (1, 1, 2, 2), "VALID")
    dn2 = lax.conv_dimension_numbers(y.shape, params["conv2_w"].shape,
                                     ("NCHW", "OIHW", "NCHW"))
    y = lax.conv_general_dilated(y, params["conv2_w"], (1, 1), "VALID",
                                 dimension_numbers=dn2, precision=hp)
    y = jax.nn.relu(y + params["conv2_b"][None, :, None, None])
    y = lax.reduce_window(y, -jnp.inf, lax.max, (1, 1, 2, 2), (1, 1, 2, 2), "VALID")
    y = y.reshape(y.shape[0], -1)
    y = jax.nn.relu(jnp.dot(y, params["fc1_w"].T, precision=hp) + params["fc1_b"])
    y = jax.nn.relu(jnp.dot(y, params["fc2_w"].T, precision=hp) + params["fc2_b"])
    return jnp.dot(y, params["fc3_w"].T, precision=hp) + params["fc3_b"]


if __name__ == "__main__":
    key = jax.random.PRNGKey(0)
    k_x, k_p = jax.random.split(key)
    # Input implied by the module: 3x32x32 images (16*5*5 after two conv+pool).
    x = jax.random.normal(k_x, (2, 3, 32, 32), dtype=jnp.float32)
    params = init_params(k_p)
    prep = prepare_params(params, block_images=8)   # one-time weight repack

    fwd = jax.jit(net_forward)
    out = jax.block_until_ready(fwd(prep, x))
    assert out.shape == (2, 10) and out.dtype == jnp.float32

    ref = jax.block_until_ready(jax.jit(net_reference)(params, x))
    err = float(jnp.max(jnp.abs(out - ref)))
    # Tolerance covers possible reduced-precision MXU passes for f32 matmuls.
    assert err < 2e-2, f"max abs error vs reference: {err}"

    print("KERNEL_OK")
</pallas_src>

<mosaic_0001>
module attributes {stable_mosaic.version = 11 : i64} {
  func.func @_lenet_kernel(%arg0: i32, %arg1: memref<256x96xf32, #tpu.memory_space<vmem>>, %arg2: memref<5x96x168xf32, #tpu.memory_space<vmem>>, %arg3: memref<1x168xf32, #tpu.memory_space<vmem>>, %arg4: memref<2x128x256xf32, #tpu.memory_space<vmem>>, %arg5: memref<2x168x96xf32, #tpu.memory_space<vmem>>, %arg6: memref<5x96x160xf32, #tpu.memory_space<vmem>>, %arg7: memref<1x160xf32, #tpu.memory_space<vmem>>, %arg8: memref<2x64x128xf32, #tpu.memory_space<vmem>>, %arg9: memref<2x160x80xf32, #tpu.memory_space<vmem>>, %arg10: memref<8x64xf32, #tpu.memory_space<vmem>>, %arg11: memref<5x80x128xf32, #tpu.memory_space<vmem>>, %arg12: memref<1x128xf32, #tpu.memory_space<vmem>>, %arg13: memref<128x128xf32, #tpu.memory_space<vmem>>, %arg14: memref<1x128xf32, #tpu.memory_space<vmem>>, %arg15: memref<128x128xf32, #tpu.memory_space<vmem>>, %arg16: memref<1x128xf32, #tpu.memory_space<vmem>>, %arg17: memref<8x128xf32, #tpu.memory_space<vmem>>) attributes {dimension_semantics = [#tpu.dimension_semantics<parallel>], iteration_bounds = array<i64: 1>, scalar_prefetch = 0 : i64, scratch_operands = 0 : i64, tpu.core_type = #tpu.core_type<tc>, window_params = [{transform_indices = @transform_0, window_bounds = array<i64: 256, 96>}, {pipeline_mode = #tpu.pipeline_mode<synchronous>, transform_indices = @transform_1, window_bounds = array<i64: 5, 96, 168>}, {pipeline_mode = #tpu.pipeline_mode<synchronous>, transform_indices = @transform_2, window_bounds = array<i64: 1, 168>}, {pipeline_mode = #tpu.pipeline_mode<synchronous>, transform_indices = @transform_3, window_bounds = array<i64: 2, 128, 256>}, {pipeline_mode = #tpu.pipeline_mode<synchronous>, transform_indices = @transform_4, window_bounds = array<i64: 2, 168, 96>}, {pipeline_mode = #tpu.pipeline_mode<synchronous>, transform_indices = @transform_5, window_bounds = array<i64: 5, 96, 160>}, {pipeline_mode = #tpu.pipeline_mode<synchronous>, transform_indices = @transform_6, window_bounds = array<i64: 1, 160>}, {pipeline_mode = #tpu.pipeline_mode<synchronous>, transform_indices = @transform_7, window_bounds = array<i64: 2, 64, 128>}, {pipeline_mode = #tpu.pipeline_mode<synchronous>, transform_indices = @transform_8, window_bounds = array<i64: 2, 160, 80>}, {pipeline_mode = #tpu.pipeline_mode<synchronous>, transform_indices = @transform_9, window_bounds = array<i64: 8, 64>}, {pipeline_mode = #tpu.pipeline_mode<synchronous>, transform_indices = @transform_10, window_bounds = array<i64: 5, 80, 128>}, {pipeline_mode = #tpu.pipeline_mode<synchronous>, transform_indices = @transform_11, window_bounds = array<i64: 1, 128>}, {pipeline_mode = #tpu.pipeline_mode<synchronous>, transform_indices = @transform_12, window_bounds = array<i64: 128, 128>}, {pipeline_mode = #tpu.pipeline_mode<synchronous>, transform_indices = @transform_13, window_bounds = array<i64: 1, 128>}, {pipeline_mode = #tpu.pipeline_mode<synchronous>, transform_indices = @transform_14, window_bounds = array<i64: 128, 128>}, {pipeline_mode = #tpu.pipeline_mode<synchronous>, transform_indices = @transform_15, window_bounds = array<i64: 1, 128>}, {transform_indices = @transform_16, window_bounds = array<i64: 8, 128>}]} {
    %c0 = arith.constant 0 : index
    %c0_0 = arith.constant 0 : index
    %0 = vector.load %arg1[%c0, %c0_0] : memref<256x96xf32, #tpu.memory_space<vmem>>, vector<256x96xf32>
    %c0_1 = arith.constant 0 : index
    %c0_2 = arith.constant 0 : index
    %c0_3 = arith.constant 0 : index
    %1 = vector.load %arg2[%c0_1, %c0_2, %c0_3] : memref<5x96x168xf32, #tpu.memory_space<vmem>>, vector<1x96x168xf32>
    %2 = vector.shape_cast %1 : vector<1x96x168xf32> to vector<96x168xf32>
    %cst = arith.constant dense<0.000000e+00> : vector<256x168xf32>
    %3 = tpu.matmul %0, %2, %cst {dimension_numbers = #tpu.dot_dimension_numbers<[1], [0], [0], [1], [0, 0, 1, 1], [], []>} : vector<256x96xf32>, vector<96x168xf32>, vector<256x168xf32> -> vector<256x168xf32>
    %c255_i32 = arith.constant 255 : i32
    %4 = tpu.dynamic_rotate %0 by %c255_i32 dim 0 : vector<256x96xf32>, i32 -> vector<256x96xf32>
    %c1 = arith.constant 1 : index
    %c0_4 = arith.constant 0 : index
    %c0_5 = arith.constant 0 : index
    %5 = vector.load %arg2[%c1, %c0_4, %c0_5] : memref<5x96x168xf32, #tpu.memory_space<vmem>>, vector<1x96x168xf32>
    %6 = vector.shape_cast %5 : vector<1x96x168xf32> to vector<96x168xf32>
    %cst_6 = arith.constant dense<0.000000e+00> : vector<256x168xf32>
    %7 = tpu.matmul %4, %6, %cst_6 {dimension_numbers = #tpu.dot_dimension_numbers<[1], [0], [0], [1], [0, 0, 1, 1], [], []>} : vector<256x96xf32>, vector<96x168xf32>, vector<256x168xf32> -> vector<256x168xf32>
    %c254_i32 = arith.constant 254 : i32
    %8 = tpu.dynamic_rotate %0 by %c254_i32 dim 0 : vector<256x96xf32>, i32 -> vector<256x96xf32>
    %c2 = arith.constant 2 : index
    %c0_7 = arith.constant 0 : index
    %c0_8 = arith.constant 0 : index
    %9 = vector.load %arg2[%c2, %c0_7, %c0_8] : memref<5x96x168xf32, #tpu.memory_space<vmem>>, vector<1x96x168xf32>
    %10 = vector.shape_cast %9 : vector<1x96x168xf32> to vector<96x168xf32>
    %cst_9 = arith.constant dense<0.000000e+00> : vector<256x168xf32>
    %11 = tpu.matmul %8, %10, %cst_9 {dimension_numbers = #tpu.dot_dimension_numbers<[1], [0], [0], [1], [0, 0, 1, 1], [], []>} : vector<256x96xf32>, vector<96x168xf32>, vector<256x168xf32> -> vector<256x168xf32>
    %c253_i32 = arith.constant 253 : i32
    %12 = tpu.dynamic_rotate %0 by %c253_i32 dim 0 : vector<256x96xf32>, i32 -> vector<256x96xf32>
    %c3 = arith.constant 3 : index
    %c0_10 = arith.constant 0 : index
    %c0_11 = arith.constant 0 : index
    %13 = vector.load %arg2[%c3, %c0_10, %c0_11] : memref<5x96x168xf32, #tpu.memory_space<vmem>>, vector<1x96x168xf32>
    %14 = vector.shape_cast %13 : vector<1x96x168xf32> to vector<96x168xf32>
    %cst_12 = arith.constant dense<0.000000e+00> : vector<256x168xf32>
    %15 = tpu.matmul %12, %14, %cst_12 {dimension_numbers = #tpu.dot_dimension_numbers<[1], [0], [0], [1], [0, 0, 1, 1], [], []>} : vector<256x96xf32>, vector<96x168xf32>, vector<256x168xf32> -> vector<256x168xf32>
    %c252_i32 = arith.constant 252 : i32
    %16 = tpu.dynamic_rotate %0 by %c252_i32 dim 0 : vector<256x96xf32>, i32 -> vector<256x96xf32>
    %c4 = arith.constant 4 : index
    %c0_13 = arith.constant 0 : index
    %c0_14 = arith.constant 0 : index
    %17 = vector.load %arg2[%c4, %c0_13, %c0_14] : memref<5x96x168xf32, #tpu.memory_space<vmem>>, vector<1x96x168xf32>
    %18 = vector.shape_cast %17 : vector<1x96x168xf32> to vector<96x168xf32>
    %cst_15 = arith.constant dense<0.000000e+00> : vector<256x168xf32>
    %19 = tpu.matmul %16, %18, %cst_15 {dimension_numbers = #tpu.dot_dimension_numbers<[1], [0], [0], [1], [0, 0, 1, 1], [], []>} : vector<256x96xf32>, vector<96x168xf32>, vector<256x168xf32> -> vector<256x168xf32>
    %20 = arith.addf %3, %7 : vector<256x168xf32>
    %21 = arith.addf %11, %15 : vector<256x168xf32>
    %22 = arith.addf %20, %21 : vector<256x168xf32>
    %23 = arith.addf %22, %19 : vector<256x168xf32>
    %c0_16 = arith.constant 0 : index
    %c0_17 = arith.constant 0 : index
    %24 = vector.load %arg3[%c0_16, %c0_17] : memref<1x168xf32, #tpu.memory_space<vmem>>, vector<1x168xf32>
    %25 = vector.broadcast %24 : vector<1x168xf32> to vector<256x168xf32>
    %26 = arith.addf %23, %25 : vector<256x168xf32>
    %cst_18 = arith.constant 0.000000e+00 : f32
    %27 = vector.broadcast %cst_18 : f32 to vector<256x168xf32>
    %28 = arith.maximumf %26, %27 : vector<256x168xf32>
    %c0_19 = arith.constant 0 : index
    %c0_20 = arith.constant 0 : index
    %c0_21 = arith.constant 0 : index
    %29 = vector.load %arg4[%c0_19, %c0_20, %c0_21] : memref<2x128x256xf32, #tpu.memory_space<vmem>>, vector<1x128x256xf32>
    %30 = vector.shape_cast %29 : vector<1x128x256xf32> to vector<128x256xf32>
    %cst_22 = arith.constant dense<0.000000e+00> : vector<128x168xf32>
    %31 = tpu.matmul %30, %28, %cst_22 {dimension_numbers = #tpu.dot_dimension_numbers<[1], [0], [0], [1], [0, 0, 1, 1], [], []>} : vector<128x256xf32>, vector<256x168xf32>, vector<128x168xf32> -> vector<128x168xf32>
    %c1_23 = arith.constant 1 : index
    %c0_24 = arith.constant 0 : index
    %c0_25 = arith.constant 0 : index
    %32 = vector.load %arg4[%c1_23, %c0_24, %c0_25] : memref<2x128x256xf32, #tpu.memory_space<vmem>>, vector<1x128x256xf32>
    %33 = vector.shape_cast %32 : vector<1x128x256xf32> to vector<128x256xf32>
    %cst_26 = arith.constant dense<0.000000e+00> : vector<128x168xf32>
    %34 = tpu.matmul %33, %28, %cst_26 {dimension_numbers = #tpu.dot_dimension_numbers<[1], [0], [0], [1], [0, 0, 1, 1], [], []>} : vector<128x256xf32>, vector<256x168xf32>, vector<128x168xf32> -> vector<128x168xf32>
    %35 = arith.maximumf %31, %34 : vector<128x168xf32>
    %c0_27 = arith.constant 0 : index
    %c0_28 = arith.constant 0 : index
    %c0_29 = arith.constant 0 : index
    %36 = vector.load %arg5[%c0_27, %c0_28, %c0_29] : memref<2x168x96xf32, #tpu.memory_space<vmem>>, vector<1x168x96xf32>
    %37 = vector.shape_cast %36 : vector<1x168x96xf32> to vector<168x96xf32>
    %cst_30 = arith.constant dense<0.000000e+00> : vector<128x96xf32>
    %38 = tpu.matmul %35, %37, %cst_30 {dimension_numbers = #tpu.dot_dimension_numbers<[1], [0], [0], [1], [0, 0, 1, 1], [], []>} : vector<128x168xf32>, vector<168x96xf32>, vector<128x96xf32> -> vector<128x96xf32>
    %c1_31 = arith.constant 1 : index
    %c0_32 = arith.constant 0 : index
    %c0_33 = arith.constant 0 : index
    %39 = vector.load %arg5[%c1_31, %c0_32, %c0_33] : memref<2x168x96xf32, #tpu.memory_space<vmem>>, vector<1x168x96xf32>
    %40 = vector.shape_cast %39 : vector<1x168x96xf32> to vector<168x96xf32>
    %cst_34 = arith.constant dense<0.000000e+00> : vector<128x96xf32>
    %41 = tpu.matmul %35, %40, %cst_34 {dimension_numbers = #tpu.dot_dimension_numbers<[1], [0], [0], [1], [0, 0, 1, 1], [], []>} : vector<128x168xf32>, vector<168x96xf32>, vector<128x96xf32> -> vector<128x96xf32>
    %42 = arith.maximumf %38, %41 : vector<128x96xf32>
    %c0_35 = arith.constant 0 : index
    %c0_36 = arith.constant 0 : index
    %c0_37 = arith.constant 0 : index
    %43 = vector.load %arg6[%c0_35, %c0_36, %c0_37] : memref<5x96x160xf32, #tpu.memory_space<vmem>>, vector<1x96x160xf32>
    %44 = vector.shape_cast %43 : vector<1x96x160xf32> to vector<96x160xf32>
    %cst_38 = arith.constant dense<0.000000e+00> : vector<128x160xf32>
    %45 = tpu.matmul %42, %44, %cst_38 {dimension_numbers = #tpu.dot_dimension_numbers<[1], [0], [0], [1], [0, 0, 1, 1], [], []>} : vector<128x96xf32>, vector<96x160xf32>, vector<128x160xf32> -> vector<128x160xf32>
    %c127_i32 = arith.constant 127 : i32
    %46 = tpu.dynamic_rotate %42 by %c127_i32 dim 0 : vector<128x96xf32>, i32 -> vector<128x96xf32>
    %c1_39 = arith.constant 1 : index
    %c0_40 = arith.constant 0 : index
    %c0_41 = arith.constant 0 : index
    %47 = vector.load %arg6[%c1_39, %c0_40, %c0_41] : memref<5x96x160xf32, #tpu.memory_space<vmem>>, vector<1x96x160xf32>
    %48 = vector.shape_cast %47 : vector<1x96x160xf32> to vector<96x160xf32>
    %cst_42 = arith.constant dense<0.000000e+00> : vector<128x160xf32>
    %49 = tpu.matmul %46, %48, %cst_42 {dimension_numbers = #tpu.dot_dimension_numbers<[1], [0], [0], [1], [0, 0, 1, 1], [], []>} : vector<128x96xf32>, vector<96x160xf32>, vector<128x160xf32> -> vector<128x160xf32>
    %c126_i32 = arith.constant 126 : i32
    %50 = tpu.dynamic_rotate %42 by %c126_i32 dim 0 : vector<128x96xf32>, i32 -> vector<128x96xf32>
    %c2_43 = arith.constant 2 : index
    %c0_44 = arith.constant 0 : index
    %c0_45 = arith.constant 0 : index
    %51 = vector.load %arg6[%c2_43, %c0_44, %c0_45] : memref<5x96x160xf32, #tpu.memory_space<vmem>>, vector<1x96x160xf32>
    %52 = vector.shape_cast %51 : vector<1x96x160xf32> to vector<96x160xf32>
    %cst_46 = arith.constant dense<0.000000e+00> : vector<128x160xf32>
    %53 = tpu.matmul %50, %52, %cst_46 {dimension_numbers = #tpu.dot_dimension_numbers<[1], [0], [0], [1], [0, 0, 1, 1], [], []>} : vector<128x96xf32>, vector<96x160xf32>, vector<128x160xf32> -> vector<128x160xf32>
    %c125_i32 = arith.constant 125 : i32
    %54 = tpu.dynamic_rotate %42 by %c125_i32 dim 0 : vector<128x96xf32>, i32 -> vector<128x96xf32>
    %c3_47 = arith.constant 3 : index
    %c0_48 = arith.constant 0 : index
    %c0_49 = arith.constant 0 : index
    %55 = vector.load %arg6[%c3_47, %c0_48, %c0_49] : memref<5x96x160xf32, #tpu.memory_space<vmem>>, vector<1x96x160xf32>
    %56 = vector.shape_cast %55 : vector<1x96x160xf32> to vector<96x160xf32>
    %cst_50 = arith.constant dense<0.000000e+00> : vector<128x160xf32>
    %57 = tpu.matmul %54, %56, %cst_50 {dimension_numbers = #tpu.dot_dimension_numbers<[1], [0], [0], [1], [0, 0, 1, 1], [], []>} : vector<128x96xf32>, vector<96x160xf32>, vector<128x160xf32> -> vector<128x160xf32>
    %c124_i32 = arith.constant 124 : i32
    %58 = tpu.dynamic_rotate %42 by %c124_i32 dim 0 : vector<128x96xf32>, i32 -> vector<128x96xf32>
    %c4_51 = arith.constant 4 : index
    %c0_52 = arith.constant 0 : index
    %c0_53 = arith.constant 0 : index
    %59 = vector.load %arg6[%c4_51, %c0_52, %c0_53] : memref<5x96x160xf32, #tpu.memory_space<vmem>>, vector<1x96x160xf32>
    %60 = vector.shape_cast %59 : vector<1x96x160xf32> to vector<96x160xf32>
    %cst_54 = arith.constant dense<0.000000e+00> : vector<128x160xf32>
    %61 = tpu.matmul %58, %60, %cst_54 {dimension_numbers = #tpu.dot_dimension_numbers<[1], [0], [0], [1], [0, 0, 1, 1], [], []>} : vector<128x96xf32>, vector<96x160xf32>, vector<128x160xf32> -> vector<128x160xf32>
    %62 = arith.addf %45, %49 : vector<128x160xf32>
    %63 = arith.addf %53, %57 : vector<128x160xf32>
    %64 = arith.addf %62, %63 : vector<128x160xf32>
    %65 = arith.addf %64, %61 : vector<128x160xf32>
    %c0_55 = arith.constant 0 : index
    %c0_56 = arith.constant 0 : index
    %66 = vector.load %arg7[%c0_55, %c0_56] : memref<1x160xf32, #tpu.memory_space<vmem>>, vector<1x160xf32>
    %67 = vector.broadcast %66 : vector<1x160xf32> to vector<128x160xf32>
    %68 = arith.addf %65, %67 : vector<128x160xf32>
    %cst_57 = arith.constant 0.000000e+00 : f32
    %69 = vector.broadcast %cst_57 : f32 to vector<128x160xf32>
    %70 = arith.maximumf %68, %69 : vector<128x160xf32>
    %c0_58 = arith.constant 0 : index
    %c0_59 = arith.constant 0 : index
    %c0_60 = arith.constant 0 : index
    %71 = vector.load %arg8[%c0_58, %c0_59, %c0_60] : memref<2x64x128xf32, #tpu.memory_space<vmem>>, vector<1x64x128xf32>
    %72 = vector.shape_cast %71 : vector<1x64x128xf32> to vector<64x128xf32>
    %cst_61 = arith.constant dense<0.000000e+00> : vector<64x160xf32>
    %73 = tpu.matmul %72, %70, %cst_61 {dimension_numbers = #tpu.dot_dimension_numbers<[1], [0], [0], [1], [0, 0, 1, 1], [], []>} : vector<64x128xf32>, vector<128x160xf32>, vector<64x160xf32> -> vector<64x160xf32>
    %c1_62 = arith.constant 1 : index
    %c0_63 = arith.constant 0 : index
    %c0_64 = arith.constant 0 : index
    %74 = vector.load %arg8[%c1_62, %c0_63, %c0_64] : memref<2x64x128xf32, #tpu.memory_space<vmem>>, vector<1x64x128xf32>
    %75 = vector.shape_cast %74 : vector<1x64x128xf32> to vector<64x128xf32>
    %cst_65 = arith.constant dense<0.000000e+00> : vector<64x160xf32>
    %76 = tpu.matmul %75, %70, %cst_65 {dimension_numbers = #tpu.dot_dimension_numbers<[1], [0], [0], [1], [0, 0, 1, 1], [], []>} : vector<64x128xf32>, vector<128x160xf32>, vector<64x160xf32> -> vector<64x160xf32>
    %77 = arith.maximumf %73, %76 : vector<64x160xf32>
    %c0_66 = arith.constant 0 : index
    %c0_67 = arith.constant 0 : index
    %c0_68 = arith.constant 0 : index
    %78 = vector.load %arg9[%c0_66, %c0_67, %c0_68] : memref<2x160x80xf32, #tpu.memory_space<vmem>>, vector<1x160x80xf32>
    %79 = vector.shape_cast %78 : vector<1x160x80xf32> to vector<160x80xf32>
    %cst_69 = arith.constant dense<0.000000e+00> : vector<64x80xf32>
    %80 = tpu.matmul %77, %79, %cst_69 {dimension_numbers = #tpu.dot_dimension_numbers<[1], [0], [0], [1], [0, 0, 1, 1], [], []>} : vector<64x160xf32>, vector<160x80xf32>, vector<64x80xf32> -> vector<64x80xf32>
    %c1_70 = arith.constant 1 : index
    %c0_71 = arith.constant 0 : index
    %c0_72 = arith.constant 0 : index
    %81 = vector.load %arg9[%c1_70, %c0_71, %c0_72] : memref<2x160x80xf32, #tpu.memory_space<vmem>>, vector<1x160x80xf32>
    %82 = vector.shape_cast %81 : vector<1x160x80xf32> to vector<160x80xf32>
    %cst_73 = arith.constant dense<0.000000e+00> : vector<64x80xf32>
    %83 = tpu.matmul %77, %82, %cst_73 {dimension_numbers = #tpu.dot_dimension_numbers<[1], [0], [0], [1], [0, 0, 1, 1], [], []>} : vector<64x160xf32>, vector<160x80xf32>, vector<64x80xf32> -> vector<64x80xf32>
    %84 = arith.maximumf %80, %83 : vector<64x80xf32>
    %c0_74 = arith.constant 0 : index
    %c0_75 = arith.constant 0 : index
    %c0_76 = arith.constant 0 : index
    %85 = vector.load %arg11[%c0_74, %c0_75, %c0_76] : memref<5x80x128xf32, #tpu.memory_space<vmem>>, vector<1x80x128xf32>
    %86 = vector.shape_cast %85 : vector<1x80x128xf32> to vector<80x128xf32>
    %cst_77 = arith.constant dense<0.000000e+00> : vector<64x128xf32>
    %87 = tpu.matmul %84, %86, %cst_77 {dimension_numbers = #tpu.dot_dimension_numbers<[1], [0], [0], [1], [0, 0, 1, 1], [], []>} : vector<64x80xf32>, vector<80x128xf32>, vector<64x128xf32> -> vector<64x128xf32>
    %c63_i32 = arith.constant 63 : i32
    %88 = tpu.dynamic_rotate %84 by %c63_i32 dim 0 : vector<64x80xf32>, i32 -> vector<64x80xf32>
    %c1_78 = arith.constant 1 : index
    %c0_79 = arith.constant 0 : index
    %c0_80 = arith.constant 0 : index
    %89 = vector.load %arg11[%c1_78, %c0_79, %c0_80] : memref<5x80x128xf32, #tpu.memory_space<vmem>>, vector<1x80x128xf32>
    %90 = vector.shape_cast %89 : vector<1x80x128xf32> to vector<80x128xf32>
    %cst_81 = arith.constant dense<0.000000e+00> : vector<64x128xf32>
    %91 = tpu.matmul %88, %90, %cst_81 {dimension_numbers = #tpu.dot_dimension_numbers<[1], [0], [0], [1], [0, 0, 1, 1], [], []>} : vector<64x80xf32>, vector<80x128xf32>, vector<64x128xf32> -> vector<64x128xf32>
    %c62_i32 = arith.constant 62 : i32
    %92 = tpu.dynamic_rotate %84 by %c62_i32 dim 0 : vector<64x80xf32>, i32 -> vector<64x80xf32>
    %c2_82 = arith.constant 2 : index
    %c0_83 = arith.constant 0 : index
    %c0_84 = arith.constant 0 : index
    %93 = vector.load %arg11[%c2_82, %c0_83, %c0_84] : memref<5x80x128xf32, #tpu.memory_space<vmem>>, vector<1x80x128xf32>
    %94 = vector.shape_cast %93 : vector<1x80x128xf32> to vector<80x128xf32>
    %cst_85 = arith.constant dense<0.000000e+00> : vector<64x128xf32>
    %95 = tpu.matmul %92, %94, %cst_85 {dimension_numbers = #tpu.dot_dimension_numbers<[1], [0], [0], [1], [0, 0, 1, 1], [], []>} : vector<64x80xf32>, vector<80x128xf32>, vector<64x128xf32> -> vector<64x128xf32>
    %c61_i32 = arith.constant 61 : i32
    %96 = tpu.dynamic_rotate %84 by %c61_i32 dim 0 : vector<64x80xf32>, i32 -> vector<64x80xf32>
    %c3_86 = arith.constant 3 : index
    %c0_87 = arith.constant 0 : index
    %c0_88 = arith.constant 0 : index
    %97 = vector.load %arg11[%c3_86, %c0_87, %c0_88] : memref<5x80x128xf32, #tpu.memory_space<vmem>>, vector<1x80x128xf32>
    %98 = vector.shape_cast %97 : vector<1x80x128xf32> to vector<80x128xf32>
    %cst_89 = arith.constant dense<0.000000e+00> : vector<64x128xf32>
    %99 = tpu.matmul %96, %98, %cst_89 {dimension_numbers = #tpu.dot_dimension_numbers<[1], [0], [0], [1], [0, 0, 1, 1], [], []>} : vector<64x80xf32>, vector<80x128xf32>, vector<64x128xf32> -> vector<64x128xf32>
    %c60_i32 = arith.constant 60 : i32
    %100 = tpu.dynamic_rotate %84 by %c60_i32 dim 0 : vector<64x80xf32>, i32 -> vector<64x80xf32>
    %c4_90 = arith.constant 4 : index
    %c0_91 = arith.constant 0 : index
    %c0_92 = arith.constant 0 : index
    %101 = vector.load %arg11[%c4_90, %c0_91, %c0_92] : memref<5x80x128xf32, #tpu.memory_space<vmem>>, vector<1x80x128xf32>
    %102 = vector.shape_cast %101 : vector<1x80x128xf32> to vector<80x128xf32>
    %cst_93 = arith.constant dense<0.000000e+00> : vector<64x128xf32>
    %103 = tpu.matmul %100, %102, %cst_93 {dimension_numbers = #tpu.dot_dimension_numbers<[1], [0], [0], [1], [0, 0, 1, 1], [], []>} : vector<64x80xf32>, vector<80x128xf32>, vector<64x128xf32> -> vector<64x128xf32>
    %104 = arith.addf %87, %91 : vector<64x128xf32>
    %105 = arith.addf %95, %99 : vector<64x128xf32>
    %106 = arith.addf %104, %105 : vector<64x128xf32>
    %107 = arith.addf %106, %103 : vector<64x128xf32>
    %c0_94 = arith.constant 0 : index
    %c0_95 = arith.constant 0 : index
    %108 = vector.load %arg10[%c0_94, %c0_95] : memref<8x64xf32, #tpu.memory_space<vmem>>, vector<8x64xf32>
    %cst_96 = arith.constant dense<0.000000e+00> : vector<8x128xf32>
    %109 = tpu.matmul %108, %107, %cst_96 {dimension_numbers = #tpu.dot_dimension_numbers<[1], [0], [0], [1], [0, 0, 1, 1], [], []>} : vector<8x64xf32>, vector<64x128xf32>, vector<8x128xf32> -> vector<8x128xf32>
    %c0_97 = arith.constant 0 : index
    %c0_98 = arith.constant 0 : index
    %110 = vector.load %arg12[%c0_97, %c0_98] : memref<1x128xf32, #tpu.memory_space<vmem>>, vector<1x128xf32>
    %111 = vector.broadcast %110 : vector<1x128xf32> to vector<8x128xf32>
    %112 = arith.addf %109, %111 : vector<8x128xf32>
    %cst_99 = arith.constant 0.000000e+00 : f32
    %113 = vector.broadcast %cst_99 : f32 to vector<8x128xf32>
    %114 = arith.maximumf %112, %113 : vector<8x128xf32>
    %c0_100 = arith.constant 0 : index
    %c0_101 = arith.constant 0 : index
    %115 = vector.load %arg13[%c0_100, %c0_101] : memref<128x128xf32, #tpu.memory_space<vmem>>, vector<128x128xf32>
    %cst_102 = arith.constant dense<0.000000e+00> : vector<8x128xf32>
    %116 = tpu.matmul %114, %115, %cst_102 {dimension_numbers = #tpu.dot_dimension_numbers<[1], [0], [0], [1], [0, 0, 1, 1], [], []>} : vector<8x128xf32>, vector<128x128xf32>, vector<8x128xf32> -> vector<8x128xf32>
    %c0_103 = arith.constant 0 : index
    %c0_104 = arith.constant 0 : index
    %117 = vector.load %arg14[%c0_103, %c0_104] : memref<1x128xf32, #tpu.memory_space<vmem>>, vector<1x128xf32>
    %118 = vector.broadcast %117 : vector<1x128xf32> to vector<8x128xf32>
    %119 = arith.addf %116, %118 : vector<8x128xf32>
    %cst_105 = arith.constant 0.000000e+00 : f32
    %120 = vector.broadcast %cst_105 : f32 to vector<8x128xf32>
    %121 = arith.maximumf %119, %120 : vector<8x128xf32>
    %c0_106 = arith.constant 0 : index
    %c0_107 = arith.constant 0 : index
    %122 = vector.load %arg15[%c0_106, %c0_107] : memref<128x128xf32, #tpu.memory_space<vmem>>, vector<128x128xf32>
    %cst_108 = arith.constant dense<0.000000e+00> : vector<8x128xf32>
    %123 = tpu.matmul %121, %122, %cst_108 {dimension_numbers = #tpu.dot_dimension_numbers<[1], [0], [0], [1], [0, 0, 1, 1], [], []>} : vector<8x128xf32>, vector<128x128xf32>, vector<8x128xf32> -> vector<8x128xf32>
    %c0_109 = arith.constant 0 : index
    %c0_110 = arith.constant 0 : index
    %124 = vector.load %arg16[%c0_109, %c0_110] : memref<1x128xf32, #tpu.memory_space<vmem>>, vector<1x128xf32>
    %125 = vector.broadcast %124 : vector<1x128xf32> to vector<8x128xf32>
    %126 = arith.addf %123, %125 : vector<8x128xf32>
    %c0_111 = arith.constant 0 : index
    %c0_112 = arith.constant 0 : index
    %127 = vector.load %arg17[%c0_111, %c0_112] : memref<8x128xf32, #tpu.memory_space<vmem>>, vector<8x128xf32>
    tpu.vector_store %arg17[%c0_111, %c0_112], %126 {strides = array<i32>} : memref<8x128xf32, #tpu.memory_space<vmem>>, vector<8x128xf32>,
    return
  }
  func.func @transform_0(%arg0: i32) -> (i32, i32) {
    %c0_i32 = arith.constant 0 : i32
    %c0_i32_0 = arith.constant 0 : i32
    return %arg0, %c0_i32 : i32, i32
  }
  func.func @transform_1(%arg0: i32) -> (i32, i32, i32) {
    %c0_i32 = arith.constant 0 : i32
    %c0_i32_0 = arith.constant 0 : i32
    %c0_i32_1 = arith.constant 0 : i32
    %c0_i32_2 = arith.constant 0 : i32
    return %c0_i32, %c0_i32_0, %c0_i32_1 : i32, i32, i32
  }
  func.func @transform_2(%arg0: i32) -> (i32, i32) {
    %c0_i32 = arith.constant 0 : i32
    %c0_i32_0 = arith.constant 0 : i32
    %c0_i32_1 = arith.constant 0 : i32
    return %c0_i32, %c0_i32_0 : i32, i32
  }
  func.func @transform_3(%arg0: i32) -> (i32, i32, i32) {
    %c0_i32 = arith.constant 0 : i32
    %c0_i32_0 = arith.constant 0 : i32
    %c0_i32_1 = arith.constant 0 : i32
    %c0_i32_2 = arith.constant 0 : i32
    return %c0_i32, %c0_i32_0, %c0_i32_1 : i32, i32, i32
  }
  func.func @transform_4(%arg0: i32) -> (i32, i32, i32) {
    %c0_i32 = arith.constant 0 : i32
    %c0_i32_0 = arith.constant 0 : i32
    %c0_i32_1 = arith.constant 0 : i32
    %c0_i32_2 = arith.constant 0 : i32
    return %c0_i32, %c0_i32_0, %c0_i32_1 : i32, i32, i32
  }
  func.func @transform_5(%arg0: i32) -> (i32, i32, i32) {
    %c0_i32 = arith.constant 0 : i32
    %c0_i32_0 = arith.constant 0 : i32
    %c0_i32_1 = arith.constant 0 : i32
    %c0_i32_2 = arith.constant 0 : i32
    return %c0_i32, %c0_i32_0, %c0_i32_1 : i32, i32, i32
  }
  func.func @transform_6(%arg0: i32) -> (i32, i32) {
    %c0_i32 = arith.constant 0 : i32
    %c0_i32_0 = arith.constant 0 : i32
    %c0_i32_1 = arith.constant 0 : i32
    return %c0_i32, %c0_i32_0 : i32, i32
  }
  func.func @transform_7(%arg0: i32) -> (i32, i32, i32) {
    %c0_i32 = arith.constant 0 : i32
    %c0_i32_0 = arith.constant 0 : i32
    %c0_i32_1 = arith.constant 0 : i32
    %c0_i32_2 = arith.constant 0 : i32
    return %c0_i32, %c0_i32_0, %c0_i32_1 : i32, i32, i32
  }
  func.func @transform_8(%arg0: i32) -> (i32, i32, i32) {
    %c0_i32 = arith.constant 0 : i32
    %c0_i32_0 = arith.constant 0 : i32
    %c0_i32_1 = arith.constant 0 : i32
    %c0_i32_2 = arith.constant 0 : i32
    return %c0_i32, %c0_i32_0, %c0_i32_1 : i32, i32, i32
  }
  func.func @transform_9(%arg0: i32) -> (i32, i32) {
    %c0_i32 = arith.constant 0 : i32
    %c0_i32_0 = arith.constant 0 : i32
    %c0_i32_1 = arith.constant 0 : i32
    return %c0_i32, %c0_i32_0 : i32, i32
  }
  func.func @transform_10(%arg0: i32) -> (i32, i32, i32) {
    %c0_i32 = arith.constant 0 : i32
    %c0_i32_0 = arith.constant 0 : i32
    %c0_i32_1 = arith.constant 0 : i32
    %c0_i32_2 = arith.constant 0 : i32
    return %c0_i32, %c0_i32_0, %c0_i32_1 : i32, i32, i32
  }
  func.func @transform_11(%arg0: i32) -> (i32, i32) {
    %c0_i32 = arith.constant 0 : i32
    %c0_i32_0 = arith.constant 0 : i32
    %c0_i32_1 = arith.constant 0 : i32
    return %c0_i32, %c0_i32_0 : i32, i32
  }
  func.func @transform_12(%arg0: i32) -> (i32, i32) {
    %c0_i32 = arith.constant 0 : i32
    %c0_i32_0 = arith.constant 0 : i32
    %c0_i32_1 = arith.constant 0 : i32
    return %c0_i32, %c0_i32_0 : i32, i32
  }
  func.func @transform_13(%arg0: i32) -> (i32, i32) {
    %c0_i32 = arith.constant 0 : i32
    %c0_i32_0 = arith.constant 0 : i32
    %c0_i32_1 = arith.constant 0 : i32
    return %c0_i32, %c0_i32_0 : i32, i32
  }
  func.func @transform_14(%arg0: i32) -> (i32, i32) {
    %c0_i32 = arith.constant 0 : i32
    %c0_i32_0 = arith.constant 0 : i32
    %c0_i32_1 = arith.constant 0 : i32
    return %c0_i32, %c0_i32_0 : i32, i32
  }
  func.func @transform_15(%arg0: i32) -> (i32, i32) {
    %c0_i32 = arith.constant 0 : i32
    %c0_i32_0 = arith.constant 0 : i32
    %c0_i32_1 = arith.constant 0 : i32
    return %c0_i32, %c0_i32_0 : i32, i32
  }
  func.func @transform_16(%arg0: i32) -> (i32, i32) {
    %c0_i32 = arith.constant 0 : i32
    %c0_i32_0 = arith.constant 0 : i32
    return %arg0, %c0_i32 : i32, i32
  }
}

</mosaic_0001>

<bundles_post_ra>
// kernel: net_forward.1
= control target key start
LH: loop header
LB: loop body
LE: loop exit
PB: predicated region body
PF: predicated region fallthrough
CT: control target
= control target key end

     0   :  { %v8547_v3 = vmov 0.0   ;;  %v141_v30 = vlaneseq  ;;  %vm201_vm1 = vcmask 785408   ;;  %vm2945_vm5 = vcmask 326656   ;;  %s12316_s1 = inlined_call_operand.vmem [shape: f32[5,96,168], index: 1, kind: input, shape index: {}]   ;;  %s12317_s0 = inlined_call_operand.vmem [shape: f32[256,96], index: 0, kind: input, shape index: {}]   ;;  %s12318_s2 = inlined_call_operand.vmem [shape: f32[1,168], index: 2, kind: input, shape index: {}]   ;;  %s12319_s3 = inlined_call_operand.vmem [shape: f32[2,128,256], index: 3, kind: input, shape index: {}]   ;;  %s12320_s4 = inlined_call_operand.vmem [shape: f32[2,168,96], index: 4, kind: input, shape index: {}]   ;;  %s12321_s5 = inlined_call_operand.vmem [shape: f32[5,96,160], index: 5, kind: input, shape index: {}]   ;;  %s12322_s6 = inlined_call_operand.vmem [shape: f32[1,160], index: 6, kind: input, shape index: {}]   ;;  %s12323_s8 = inlined_call_operand.vmem [shape: f32[2,160,80], index: 8, kind: input, shape index: {}]   ;;  %s12324_s7 = inlined_call_operand.vmem [shape: f32[2,64,128], index: 7, kind: input, shape index: {}]   ;;  %s12325_s10 = inlined_call_operand.vmem [shape: f32[5,80,128], index: 10, kind: input, shape index: {}]   ;;  %s12326_s12 = inlined_call_operand.vmem [shape: f32[128,128], index: 12, kind: input, shape index: {}]   ;;  %s12327_s9 = inlined_call_operand.vmem [shape: f32[8,64], index: 9, kind: input, shape index: {}]   ;;  %s12328_s11 = inlined_call_operand.vmem [shape: f32[1,128], index: 11, kind: input, shape index: {}]   ;;  %s12329_s14 = inlined_call_operand.vmem [shape: f32[128,128], index: 14, kind: input, shape index: {}]   ;;  %s12330_s13 = inlined_call_operand.vmem [shape: f32[1,128], index: 13, kind: input, shape index: {}]   ;;  %s12331_s15 = inlined_call_operand.vmem [shape: f32[1,128], index: 15, kind: input, shape index: {}]   ;;  %s12332_s16 = inlined_call_operand.vmem [shape: f32[8,128], index: 16, kind: output, shape index: {}]  }
   0x1   :  { %12334 = sst [smem:[#allocation2_spill]] %s12316_s1  ;;  %362 = vmatprep.mubr.f32.mxu0 %v8547_v3  ;;  %v8711_v37 = vld [vmem:[%s12317_s0] sm:$0xff]  ;;  %v8716_v38 = vld [vmem:[%s12317_s0 + $0x8] sm:$0xff]  ;;  %v8732_v45 = vld [vmem:[%s12317_s0 + $0x10] sm:$0xff]  ;;  %vm5038_vm6 = vcmask 261120   ;;  %vm5339_vm7 = vcmask 654336  }
   0x2   :  { %s12335_s23 = sld [smem:[#allocation2_spill]]  ;;  %v8718_v39 = vshrl.u32 %v141_v30, 7  ;;  %v109_v43 = vrot.slane %v8711_v37, 1  ;;  %v110_v44 = vrot.slane %v8716_v38, 1  ;;  %v111_v52 = vrot.slane %v8732_v45, 1  ;;  %v8754_v54 = vld [vmem:[%s12317_s0 + $0x18] sm:$0xff] }
   0x3   :  { %v112_v61 = vrot.slane %v8754_v54, 1  ;;  %v8776_v63 = vld [vmem:[%s12317_s0 + $0x20] sm:$0xff]  ;;  %vm8549_vm8 = vmmov 0   ;;  %vm6090_vm9 = vcmask 523264  }
   0x4   :  { %vm143_vm0 = vcmp.lt.s32.totalorder %v8718_v39, 7  ;;  %vm677_vm2 = vcmp.lt.s32.totalorder %v8718_v39, 5  ;;  %vm1120_vm3 = vcmp.lt.s32.totalorder %v8718_v39, 4  ;;  %vm587_vm4 = vcmp.lt.s32.totalorder %v8718_v39, 6 }
   0x5   :  { %v174_v51 = vsel %vm143_vm0, %v109_v43, %v110_v44  ;;  %v173_v60 = vsel %vm143_vm0, %v110_v44, %v111_v52  ;;  %v8878_v44 = vld [vmem:[%s12317_s0 + $0x50] sm:$0xff] }
   0x8   :  { %v6358_v0 = vld [vmem:[%s12335_s23 + $0xc8] sm:$0xff]  ;;  %v6360_v1 = vld [vmem:[%s12335_s23 + $0xd8] sm:$0xff]  ;;  %v6357_v2 = vld [vmem:[%s12335_s23 + $0xc0] sm:$0xff] }
   0x9   :  { %v7384_v4 = vpack.c.bf16 %v6360_v1, %v6358_v0  ;;  %v6359_v5 = vld [vmem:[%s12335_s23 + $0xd0] sm:$0xff]  ;;  %v6362_v6 = vld [vmem:[%s12335_s23 + $0xe8] sm:$0xff]  ;;  %v6364_v7 = vld [vmem:[%s12335_s23 + $0xf8] sm:$0xff] }
   0xa   :  { %v7386_v8 = vpack.c.bf16 %v6359_v5, %v6357_v2  ;;  %v7388_v9 = vpack.c.bf16 %v6364_v7, %v6362_v6  ;;  %v6361_v10 = vld [vmem:[%s12335_s23 + $0xe0] sm:$0xff]  ;;  %v6363_v11 = vld [vmem:[%s12335_s23 + $0xf0] sm:$0xff]  ;;  %v6366_v12 = vld [vmem:[%s12335_s23 + $0x108] sm:$0xff]  ;;  %v172_v6 = vsel %vm143_vm0, %v111_v52, %v112_v61  ;;  %v113_v7 = vrot.slane %v8776_v63, 1 }
   0xb   :  { %7385 = vmatprep.subr.bf16.mxu0 %v7384_v4  ;;  %v6368_v13 = vld [vmem:[%s12335_s23 + $0x118] sm:$0xff]  ;;  %v7390_v14 = vpack.c.bf16 %v6363_v11, %v6361_v10  ;;  %v6365_v16 = vld [vmem:[%s12335_s23 + $0x100] sm:$0xff]  ;;  %v6367_v17 = vld [vmem:[%s12335_s23 + $0x110] sm:$0xff] }
   0xc   :  { %7387 = vmatpush1.bf16.msra.mxu0 %v7386_v8  ;;  %v7392_v15 = vpack.c.bf16 %v6368_v13, %v6366_v12  ;;  %v6370_v18 = vld [vmem:[%s12335_s23 + $0x128] sm:$0xff]  ;;  %v6372_v19 = vld [vmem:[%s12335_s23 + $0x138] sm:$0xff]  ;;  %v7394_v20 = vpack.c.bf16 %v6367_v17, %v6365_v16  ;;  %v6369_v22 = vld [vmem:[%s12335_s23 + $0x120] sm:$0xff] }
   0xd   :  { %7389 = vmatprep.subr.bf16.mxu0 %v7388_v9  ;;  %v7396_v21 = vpack.c.bf16 %v6372_v19, %v6370_v18  ;;  %v6371_v23 = vld [vmem:[%s12335_s23 + $0x130] sm:$0xff]  ;;  %v6374_v24 = vld [vmem:[%s12335_s23 + $0x148] sm:$0xff]  ;;  %v6376_v25 = vld [vmem:[%s12335_s23 + $0x158] sm:$0xff] }
   0xe   :  { %v7398_v26 = vpack.c.bf16 %v6371_v23, %v6369_v22  ;;  %v7400_v27 = vpack.c.bf16 %v6376_v25, %v6374_v24  ;;  %v6373_v28 = vld [vmem:[%s12335_s23 + $0x140] sm:$0xff]  ;;  %v6375_v29 = vld [vmem:[%s12335_s23 + $0x150] sm:$0xff]  ;;  %v6378_v31 = vld [vmem:[%s12335_s23 + $0x168] sm:$0xff] }
   0xf   :  { %v6380_v32 = vld [vmem:[%s12335_s23 + $0x178] sm:$0xff]  ;;  %v7402_v33 = vpack.c.bf16 %v6375_v29, %v6373_v28  ;;  %v6377_v34 = vld [vmem:[%s12335_s23 + $0x160] sm:$0xff]  ;;  %v6379_v36 = vld [vmem:[%s12335_s23 + $0x170] sm:$0xff] }
  0x10   :  { %7391 = vmatpush1.bf16.msra.mxu0 %v7390_v14  ;;  %v7404_v35 = vpack.c.bf16 %v6380_v32, %v6378_v31  ;;  %v6438_v40 = vld [vmem:[%s12335_s23 + $0x248] sm:$0xff]  ;;  %v6440_v41 = vld [vmem:[%s12335_s23 + $0x258] sm:$0xff]  ;;  %v7406_v42 = vpack.c.bf16 %v6379_v36, %v6377_v34  ;;  %v6437_v47 = vld [vmem:[%s12335_s23 + $0x240] sm:$0xff] }
  0x11   :  { %7393 = vmatprep.subr.bf16.mxu0 %v7392_v15  ;;  %v7408_v46 = vpack.c.bf16 %v6440_v41, %v6438_v40  ;;  %v6439_v48 = vld [vmem:[%s12335_s23 + $0x250] sm:$0xff]  ;;  %v6442_v49 = vld [vmem:[%s12335_s23 + $0x268] sm:$0xff]  ;;  %v6444_v50 = vld [vmem:[%s12335_s23 + $0x278] sm:$0xff]  ;;  %v171_v15 = vsel %vm143_vm0, %v112_v61, %v113_v7 }
  0x12   :  { %v7410_v53 = vpack.c.bf16 %v6439_v48, %v6437_v47  ;;  %v7412_v55 = vpack.c.bf16 %v6444_v50, %v6442_v49  ;;  %v6441_v56 = vld [vmem:[%s12335_s23 + $0x260] sm:$0xff]  ;;  %v6443_v57 = vld [vmem:[%s12335_s23 + $0x270] sm:$0xff]  ;;  %v6446_v58 = vld [vmem:[%s12335_s23 + $0x288] sm:$0xff]  ;;  %v119_v47 = vrot.slane %v8878_v44, 1 }
  0x13   :  { %v6448_v59 = vld [vmem:[%s12335_s23 + $0x298] sm:$0xff]  ;;  %v7414_v62 = vpack.c.bf16 %v6443_v57, %v6441_v56  ;;  %v6445_v1 = vld [vmem:[%s12335_s23 + $0x280] sm:$0xff]  ;;  %v6447_v2 = vld [vmem:[%s12335_s23 + $0x290] sm:$0xff] }
  0x14   :  { %7395 = vmatpush1.bf16.msra.mxu0 %v7394_v20  ;;  %v7416_v0 = vpack.c.bf16 %v6448_v59, %v6446_v58  ;;  %v6450_v4 = vld [vmem:[%s12335_s23 + $0x2a8] sm:$0xff]  ;;  %v6452_v5 = vld [vmem:[%s12335_s23 + $0x2b8] sm:$0xff]  ;;  %v7418_v8 = vpack.c.bf16 %v6447_v2, %v6445_v1  ;;  %v6449_v11 = vld [vmem:[%s12335_s23 + $0x2a0] sm:$0xff] }
  0x15   :  { %7397 = vmatprep.subr.bf16.mxu0 %v7396_v21  ;;  %v8798_v9 = vld [vmem:[%s12317_s0 + $0x28] sm:$0xff]  ;;  %v7420_v10 = vpack.c.bf16 %v6452_v5, %v6450_v4  ;;  %v6451_v12 = vld [vmem:[%s12335_s23 + $0x2b0] sm:$0xff]  ;;  %v6456_v14 = vld [vmem:[%s12335_s23 + $0x2d8] sm:$0xff] }
  0x16   :  { %v6454_v13 = vld [vmem:[%s12335_s23 + $0x2c8] sm:$0xff]  ;;  %v114_v16 = vrot.slane %v8798_v9, 1  ;;  %v7422_v17 = vpack.c.bf16 %v6451_v12, %v6449_v11  ;;  %v8820_v18 = vld [vmem:[%s12317_s0 + $0x30] sm:$0xff]  ;;  %v6453_v20 = vld [vmem:[%s12335_s23 + $0x2c0] sm:$0xff] }
  0x17   :  { %v7424_v19 = vpack.c.bf16 %v6456_v14, %v6454_v13  ;;  %v6455_v21 = vld [vmem:[%s12335_s23 + $0x2d0] sm:$0xff]  ;;  %v6458_v22 = vld [vmem:[%s12335_s23 + $0x2e8] sm:$0xff]  ;;  %v6460_v23 = vld [vmem:[%s12335_s23 + $0x2f8] sm:$0xff]  ;;  %v115_v25 = vrot.slane %v8820_v18, 1 }
  0x18   :  { %7399 = vmatpush1.bf16.msra.mxu0 %v7398_v26  ;;  %v170_v24 = vsel %vm143_vm0, %v113_v7, %v114_v16  ;;  %v7426_v26 = vpack.c.bf16 %v6455_v21, %v6453_v20  ;;  %v7428_v28 = vpack.c.bf16 %v6460_v23, %v6458_v22  ;;  %v6457_v29 = vld [vmem:[%s12335_s23 + $0x2e0] sm:$0xff]  ;;  %v6459_v30 = vld [vmem:[%s12335_s23 + $0x2f0] sm:$0xff]  ;;  %v8868_v40 = vld [vmem:[%s12317_s0 + $0x48] sm:$0xff] }
  0x19   :  { %7401 = vmatprep.subr.bf16.mxu0 %v7400_v27  ;;  %v8842_v27 = vld [vmem:[%s12317_s0 + $0x38] sm:$0xff]  ;;  %v169_v31 = vsel %vm143_vm0, %v114_v16, %v115_v25  ;;  %v8858_v34 = vld [vmem:[%s12317_s0 + $0x40] sm:$0xff]  ;;  %v8918_v58 = vld [vmem:[%s12317_s0 + $0x70] sm:$0xff] }
  0x1a   :  { %v116_v32 = vrot.slane %v8842_v27, 1  ;;  %v117_v36 = vrot.slane %v8858_v34, 1  ;;  %v8888_v48 = vld [vmem:[%s12317_s0 + $0x58] sm:$0xff]  ;;  %v8938_v1 = vld [vmem:[%s12317_s0 + $0x80] sm:$0xff]  ;;  %v8948_v5 = vld [vmem:[%s12317_s0 + $0x88] sm:$0xff] }
  0x1b   :  { %v120_v50 = vrot.slane %v8888_v48, 1  ;;  %v8928_v61 = vld [vmem:[%s12317_s0 + $0x78] sm:$0xff]  ;;  %v125_v4 = vrot.slane %v8938_v1, 1  ;;  %v126_v7 = vrot.slane %v8948_v5, 1  ;;  %v6494_v16 = vld [vmem:[%s12335_s23 + $0x308] sm:$0xff] }
  0x1c   :  { %7403 = vmatpush1.bf16.msra.mxu0 %v7402_v33  ;;  %v7430_v33 = vpack.c.bf16 %v6459_v30, %v6457_v29  ;;  %v167_v41 = vsel %vm143_vm0, %v116_v32, %v117_v36  ;;  %v8968_v12 = vld [vmem:[%s12317_s0 + $0x98] sm:$0xff]  ;;  %v8994_v22 = vld [vmem:[%s12317_s0 + $0xa8] sm:$0xff] }
  0x1d   :  { %7405 = vmatprep.subr.bf16.mxu0 %v7404_v35  ;;  %v168_v35 = vsel %vm143_vm0, %v115_v25, %v116_v32  ;;  %v164_v52 = vsel %vm143_vm0, %v119_v47, %v120_v50  ;;  %v128_v14 = vrot.slane %v8968_v12, 1  ;;  %v9004_v25 = vld [vmem:[%s12317_s0 + $0xb0] sm:$0xff]  ;;  %v9014_v29 = vld [vmem:[%s12317_s0 + $0xb8] sm:$0xff]  ;;  %v9024_v32 = vld [vmem:[%s12317_s0 + $0xc0] sm:$0xff] }
  0x20   :  { %7407 = vmatpush1.bf16.msra.mxu0 %v7406_v42  ;;  %v118_v42 = vrot.slane %v8868_v40, 1 }
  0x21   :  { %7409 = vmatprep.subr.bf16.mxu0 %v7408_v46 }
  0x22   :  { %v166_v46 = vsel %vm143_vm0, %v117_v36, %v118_v42  ;;  %v165_v49 = vsel %vm143_vm0, %v118_v42, %v119_v47  ;;  %v9034_v36 = vld [vmem:[%s12317_s0 + $0xc8] sm:$0xff] }
  0x23   :  { %6381 = vmatmul.mubr.msk.f32.vlgmr.msra.gmra.mrb[0].mxu0 %vm201_vm1, %v174_v51  ;;  %v8898_v51 = vld [vmem:[%s12317_s0 + $0x60] sm:$0xff]  ;;  %v134_v42 = vrot.slane %v9034_v36, 1 }
  0x24   :  { %368 = vmatprep.mubr.f32.mxu0 %v8547_v3  ;;  %7411 = vmatpush1.bf16.msra.mxu0 %v7410_v53  ;;  %v121_v53 = vrot.slane %v8898_v51, 1 }
  0x25   :  { %7413 = vmatprep.subr.bf16.mxu0 %v7412_v55  ;;  %v8908_v55 = vld [vmem:[%s12317_s0 + $0x68] sm:$0xff] }
  0x26   :  { %v163_v56 = vsel %vm143_vm0, %v120_v50, %v121_v53  ;;  %v122_v57 = vrot.slane %v8908_v55, 1  ;;  %v9054_v50 = vld [vmem:[%s12317_s0 + $0xd8] sm:$0xff] }
  0x27   :  { %6382 = vmatmul.mubr.msk.f32.gmra.mrb[2].mxu0 %vm201_vm1, %v173_v60  ;;  %v123_v60 = vrot.slane %v8918_v58, 1 }
  0x28   :  { %374 = vmatprep.mubr.f32.mxu0 %v8547_v3  ;;  %7415 = vmatpush1.bf16.msra.mxu0 %v7414_v62  ;;  %v162_v59 = vsel %vm143_vm0, %v121_v53, %v122_v57  ;;  %v136_v53 = vrot.slane %v9054_v50, 1 }
  0x29   :  { %7417 = vmatprep.subr.bf16.mxu0 %v7416_v0  ;;  %v161_v62 = vsel %vm143_vm0, %v122_v57, %v123_v60  ;;  %v124_v0 = vrot.slane %v8928_v61, 1 }
  0x2b   :  { %6383 = vmatmul.mubr.msk.f32.gmra.mrb[4].mxu0 %vm201_vm1, %v172_v6  ;;  %v160_v2 = vsel %vm143_vm0, %v123_v60, %v124_v0  ;;  %v159_v6 = vsel %vm143_vm0, %v124_v0, %v125_v4  ;;  %v9074_v60 = vld [vmem:[%s12317_s0 + $0xe8] sm:$0xff] }
  0x2c   :  { %380 = vmatprep.mubr.f32.mxu0 %v8547_v3  ;;  %7419 = vmatpush1.bf16.msra.mxu0 %v7418_v8  ;;  %v8958_v8 = vld [vmem:[%s12317_s0 + $0x90] sm:$0xff]  ;;  %v138_v0 = vrot.slane %v9074_v60, 1 }
  0x2d   :  { %7421 = vmatprep.subr.bf16.mxu0 %v7420_v10  ;;  %v158_v10 = vsel %vm143_vm0, %v125_v4, %v126_v7  ;;  %v127_v11 = vrot.slane %v8958_v8, 1 }
  0x2f   :  { %6384 = vmatmul.mubr.msk.f32.gmra.mrb[6].mxu0 %vm201_vm1, %v171_v15  ;;  %v157_v13 = vsel %vm143_vm0, %v126_v7, %v127_v11  ;;  %v8978_v15 = vld [vmem:[%s12317_s0 + $0xa0] sm:$0xff]  ;;  %v9094_v7 = vld [vmem:[%s12317_s0 + $0xf8] sm:$0xff] }
  0x30   :  { %386 = vmatprep.mubr.f32.mxu0 %v8547_v3  ;;  %7423 = vmatpush1.bf16.msra.mxu0 %v7422_v17  ;;  %v6496_v17 = vld [vmem:[%s12335_s23 + $0x318] sm:$0xff]  ;;  %v129_v20 = vrot.slane %v8978_v15, 1 }
  0x31   :  { %7425 = vmatprep.subr.bf16.mxu0 %v7424_v19  ;;  %v156_v19 = vsel %vm143_vm0, %v127_v11, %v128_v14  ;;  %v7432_v21 = vpack.c.bf16 %v6496_v17, %v6494_v16  ;;  %v140_v11 = vrot.slane %v9094_v7, 1  ;;  %v645_v16 = vrot.slane %v8711_v37, 3 }
  0x32   :  { %v155_v23 = vsel %vm143_vm0, %v128_v14, %v129_v20  ;;  %v646_v17 = vrot.slane %v8716_v38, 3 }
  0x33   :  { %6385 = vmatmul.mubr.msk.f32.gmra.mrb[8].mxu0 %vm201_vm1, %v170_v24  ;;  %v130_v24 = vrot.slane %v8994_v22, 1  ;;  %v175_v14 = vsel %vm143_vm0, %v140_v11, %v109_v43  ;;  %v6500_v43 = vld [vmem:[%s12335_s23 + $0x338] sm:$0xff] }
  0x34   :  { %392 = vmatprep.mubr.f32.mxu0 %v8547_v3  ;;  %7427 = vmatpush1.bf16.msra.mxu0 %v7426_v26 }
  0x35   :  { %7429 = vmatprep.subr.bf16.mxu0 %v7428_v28  ;;  %v154_v26 = vsel %vm143_vm0, %v129_v20, %v130_v24  ;;  %v131_v28 = vrot.slane %v9004_v25, 1  ;;  %v6495_v20 = vld [vmem:[%s12335_s23 + $0x310] sm:$0xff] }
  0x37   :  { %6386 = vmatmul.mubr.msk.f32.gmra.mrb[10].mxu0 %vm201_vm1, %v169_v31  ;;  %v153_v30 = vsel %vm143_vm0, %v130_v24, %v131_v28  ;;  %v132_v31 = vrot.slane %v9014_v29, 1  ;;  %v647_v24 = vrot.slane %v8732_v45, 3 }
  0x38   :  { %398 = vmatprep.mubr.f32.mxu0 %v8547_v3  ;;  %7431 = vmatpush1.bf16.msra.mxu0 %v7430_v33 }
  0x39   :  { %7433 = vmatprep.subr.bf16.mxu0 %v7432_v21  ;;  %v152_v33 = vsel %vm143_vm0, %v131_v28, %v132_v31  ;;  %v6498_v21 = vld [vmem:[%s12335_s23 + $0x328] sm:$0xff] }
  0x3a   :  { %v7436_v28 = vpack.c.bf16 %v6500_v43, %v6498_v21  ;;  %v6509_v43 = vld [vmem:[%s12335_s23 + $0x380] sm:$0xff] }
  0x3b   :  { %6387 = vmatmul.mubr.msk.f32.gmra.mrb[12].mxu0 %vm201_vm1, %v168_v35  ;;  %v133_v35 = vrot.slane %v9024_v32, 1 }
  0x3c   :  { %404 = vmatprep.mubr.f32.mxu0 %v8547_v3 }
  0x3d   :  { %v150_v47 = vsel %vm143_vm0, %v133_v35, %v134_v42 }
  0x3f   :  { %6388 = vmatmul.mubr.msk.f32.gmra.mrb[14].mxu0 %vm201_vm1, %v167_v41  ;;  %v151_v41 = vsel %vm143_vm0, %v132_v31, %v133_v35  ;;  %v6499_v31 = vld [vmem:[%s12335_s23 + $0x330] sm:$0xff]  ;;  %v6504_v35 = vld [vmem:[%s12335_s23 + $0x358] sm:$0xff] }
  0x40   :  { %410 = vmatprep.mubr.f32.mxu0 %v8547_v3 }
  0x43   :  { %6389 = vmatmul.mubr.msk.f32.gmra.mrb[16].mxu0 %vm201_vm1, %v166_v46  ;;  %v9044_v46 = vld [vmem:[%s12317_s0 + $0xd0] sm:$0xff] }
  0x44   :  { %416 = vmatprep.mubr.f32.mxu0 %v8547_v3 }
  0x47   :  { %6390 = vmatmul.mubr.msk.f32.gmra.mrb[18].mxu0 %vm201_vm1, %v165_v49  ;;  %v135_v49 = vrot.slane %v9044_v46, 1 }
  0x48   :  { %422 = vmatprep.mubr.f32.mxu0 %v8547_v3 }
  0x49   :  { %v148_v57 = vsel %vm143_vm0, %v135_v49, %v136_v53 }
  0x4b   :  { %6391 = vmatmul.mubr.msk.f32.gmra.mrb[20].mxu0 %vm201_vm1, %v164_v52  ;;  %v149_v52 = vsel %vm143_vm0, %v134_v42, %v135_v49  ;;  %v648_v42 = vrot.slane %v8754_v54, 3 }
  0x4c   :  { %428 = vmatprep.mubr.f32.mxu0 %v8547_v3 }
  0x4f   :  { %6392 = vmatmul.mubr.msk.f32.gmra.mrb[22].mxu0 %vm201_vm1, %v163_v56  ;;  %v9064_v56 = vld [vmem:[%s12317_s0 + $0xe0] sm:$0xff] }
  0x50   :  { %434 = vmatprep.mubr.f32.mxu0 %v8547_v3 }
  0x53   :  { %6393 = vmatmul.mubr.msk.f32.gmra.mrb[24].mxu0 %vm201_vm1, %v162_v59  ;;  %v137_v59 = vrot.slane %v9064_v56, 1 }
  0x54   :  { %440 = vmatprep.mubr.f32.mxu0 %v8547_v3 }
  0x55   :  { %v146_v4 = vsel %vm143_vm0, %v137_v59, %v138_v0 }
  0x57   :  { %6394 = vmatmul.mubr.msk.f32.gmra.mrb[26].mxu0 %vm201_vm1, %v161_v62  ;;  %v147_v62 = vsel %vm143_vm0, %v136_v53, %v137_v59  ;;  %v6503_v53 = vld [vmem:[%s12335_s23 + $0x350] sm:$0xff]  ;;  %v6508_v59 = vld [vmem:[%s12335_s23 + $0x378] sm:$0xff] }
  0x58   :  { %446 = vmatprep.mubr.f32.mxu0 %v8547_v3 }
  0x5b   :  { %6395 = vmatmul.mubr.msk.f32.gmra.mrb[28].mxu0 %vm201_vm1, %v160_v2  ;;  %v9084_v2 = vld [vmem:[%s12317_s0 + $0xf0] sm:$0xff] }
  0x5c   :  { %452 = vmatprep.mubr.f32.mxu0 %v8547_v3 }
  0x5f   :  { %6396 = vmatmul.mubr.msk.f32.gmra.mrb[30].mxu0 %vm201_vm1, %v159_v6  ;;  %v139_v6 = vrot.slane %v9084_v2, 1 }
  0x60   :  { %458 = vmatprep.mubr.f32.mxu0 %v8547_v3 }
  0x63   :  { %6397 = vmatmul.mubr.msk.f32.gmra.mrb[32].mxu0 %vm201_vm1, %v158_v10  ;;  %v145_v10 = vsel %vm143_vm0, %v138_v0, %v139_v6  ;;  %v649_v0 = vrot.slane %v8776_v63, 3 }
  0x64   :  { %464 = vmatprep.mubr.f32.mxu0 %v8547_v3 }
  0x67   :  { %6398 = vmatmul.mubr.msk.f32.gmra.mrb[34].mxu0 %vm201_vm1, %v157_v13  ;;  %v144_v13 = vsel %vm143_vm0, %v139_v6, %v140_v11  ;;  %v6507_v11 = vld [vmem:[%s12335_s23 + $0x370] sm:$0xff] }
  0x68   :  { %470 = vmatprep.mubr.f32.mxu0 %v8547_v3 }
  0x6b   :  { %6399 = vmatmul.mubr.msk.f32.gmra.mrb[36].mxu0 %vm201_vm1, %v156_v19  ;;  %v6493_v19 = vld [vmem:[%s12335_s23 + $0x300] sm:$0xff] }
  0x6c   :  { %476 = vmatprep.mubr.f32.mxu0 %v8547_v3 }
  0x6f   :  { %6400 = vmatmul.mubr.msk.f32.gmra.mrb[38].mxu0 %vm201_vm1, %v155_v23  ;;  %v708_v23 = vsel %vm677_vm2, %v645_v16, %v646_v17 }
  0x70   :  { %482 = vmatprep.mubr.f32.mxu0 %v8547_v3 }
  0x73   :  { %6401 = vmatmul.mubr.msk.f32.gmra.mrb[40].mxu0 %vm201_vm1, %v154_v26  ;;  %v7434_v26 = vpack.c.bf16 %v6495_v20, %v6493_v19  ;;  %v650_v19 = vrot.slane %v8798_v9, 3 }
  0x74   :  { %488 = vmatprep.mubr.f32.mxu0 %v8547_v3 }
  0x77   :  { %6402 = vmatmul.mubr.msk.f32.gmra.mrb[42].mxu0 %vm201_vm1, %v153_v30  ;;  %v6497_v30 = vld [vmem:[%s12335_s23 + $0x320] sm:$0xff] }
  0x78   :  { %494 = vmatprep.mubr.f32.mxu0 %v8547_v3 }
  0x7b   :  { %6403 = vmatmul.mubr.msk.f32.gmra.mrb[44].mxu0 %vm201_vm1, %v152_v33  ;;  %v6502_v33 = vld [vmem:[%s12335_s23 + $0x348] sm:$0xff] }
  0x7c   :  { %500 = vmatprep.mubr.f32.mxu0 %v8547_v3  ;;  %v7440_v49 = vpack.c.bf16 %v6504_v35, %v6502_v33  ;;  %v6513_v35 = vld [vmem:[%s12335_s23 + $0x3a0] sm:$0xff] }
  0x7f   :  { %6404 = vmatmul.mubr.msk.f32.gmra.mrb[46].mxu0 %vm201_vm1, %v151_v41  ;;  %v707_v41 = vsel %vm677_vm2, %v646_v17, %v647_v24  ;;  %v705_v17 = vsel %vm677_vm2, %v648_v42, %v649_v0 }
  0x80   :  { %506 = vmatprep.mubr.f32.mxu0 %v8547_v3 }
  0x83   :  { %6405 = vmatmul.mubr.msk.f32.gmra.mrb[48].mxu0 %vm201_vm1, %v150_v47  ;;  %v7438_v47 = vpack.c.bf16 %v6499_v31, %v6497_v30  ;;  %v651_v30 = vrot.slane %v8820_v18, 3 }
  0x84   :  { %512 = vmatprep.mubr.f32.mxu0 %v8547_v3 }
  0x87   :  { %6406 = vmatmul.mubr.msk.f32.gmra.mrb[50].mxu0 %vm201_vm1, %v149_v52  ;;  %v6501_v52 = vld [vmem:[%s12335_s23 + $0x340] sm:$0xff] }
  0x88   :  { %518 = vmatprep.mubr.f32.mxu0 %v8547_v3 }
  0x8b   :  { %6407 = vmatmul.mubr.msk.f32.gmra.mrb[52].mxu0 %vm201_vm1, %v148_v57  ;;  %v6506_v57 = vld [vmem:[%s12335_s23 + $0x368] sm:$0xff] }
  0x8c   :  { %524 = vmatprep.mubr.f32.mxu0 %v8547_v3  ;;  %v7444_v6 = vpack.c.bf16 %v6508_v59, %v6506_v57  ;;  %v654_v59 = vrot.slane %v8868_v40, 3 }
  0x8f   :  { %6408 = vmatmul.mubr.msk.f32.gmra.mrb[54].mxu0 %vm201_vm1, %v147_v62  ;;  %v706_v62 = vsel %vm677_vm2, %v647_v24, %v648_v42  ;;  %v6514_v24 = vld [vmem:[%s12335_s23 + $0x3a8] sm:$0xff]  ;;  %v703_v42 = vsel %vm677_vm2, %v650_v19, %v651_v30 }
  0x90   :  { %530 = vmatprep.mubr.f32.mxu0 %v8547_v3 }
  0x93   :  { %6409 = vmatmul.mubr.msk.f32.gmra.mrb[56].mxu0 %vm201_vm1, %v146_v4  ;;  %v7442_v4 = vpack.c.bf16 %v6503_v53, %v6501_v52  ;;  %v653_v53 = vrot.slane %v8858_v34, 3 }
  0x94   :  { %536 = vmatprep.mubr.f32.mxu0 %v8547_v3 }
  0x97   :  { %6410 = vmatmul.mubr.msk.f32.gmra.mrb[58].mxu0 %vm201_vm1, %v145_v10  ;;  %v6505_v10 = vld [vmem:[%s12335_s23 + $0x360] sm:$0xff] }
  0x98   :  { %542 = vmatprep.mubr.f32.mxu0 %v8547_v3  ;;  %v7446_v20 = vpack.c.bf16 %v6507_v11, %v6505_v10  ;;  %v657_v11 = vrot.slane %v8898_v51, 3 }
  0x9b   :  { %6411 = vmatmul.mubr.msk.f32.gmra.mrb[60].mxu0 %vm201_vm1, %v144_v13  ;;  %v6510_v13 = vld [vmem:[%s12335_s23 + $0x388] sm:$0xff] }
  0x9c   :  { %548 = vmatprep.mubr.f32.mxu0 %v8547_v3 }
  0x9f   :  { %6412 = vmatmul.mubr.msk.f32.gmra.mrb[62].mxu0 %vm201_vm1, %v175_v14  ;;  %v6512_v14 = vld [vmem:[%s12335_s23 + $0x398] sm:$0xff] }
  0xa0   :  { %895 = vmatprep.mubr.f32.mxu0 %v8547_v3  ;;  %v7448_v21 = vpack.c.bf16 %v6512_v14, %v6510_v13  ;;  %v658_v14 = vrot.slane %v8908_v55, 3 }
  0xa3   :  { %6461 = vmatmul.mubr.msk.f32.vlgmr.msra.gmra.mrb[0].mxu0 %vm201_vm1, %v708_v23  ;;  %v6511_v23 = vld [vmem:[%s12335_s23 + $0x390] sm:$0xff] }
  0xa4   :  { %901 = vmatprep.mubr.f32.mxu0 %v8547_v3  ;;  %7435 = vmatpush1.bf16.msra.mxu0 %v7434_v26  ;;  %v6516_v26 = vld [vmem:[%s12335_s23 + $0x3b8] sm:$0xff]  ;;  %v7450_v31 = vpack.c.bf16 %v6511_v23, %v6509_v43  ;;  %v661_v23 = vrot.slane %v8938_v1, 3 }
  0xa5   :  { %7437 = vmatprep.subr.bf16.mxu0 %v7436_v28  ;;  %v704_v28 = vsel %vm677_vm2, %v649_v0, %v650_v19  ;;  %v7452_v33 = vpack.c.bf16 %v6516_v26, %v6514_v24  ;;  %v655_v0 = vrot.slane %v8878_v44, 3  ;;  %v659_v19 = vrot.slane %v8918_v58, 3 }
  0xa6   :  { %v662_v26 = vrot.slane %v8948_v5, 3 }
  0xa7   :  { %6462 = vmatmul.mubr.msk.f32.gmra.mrb[2].mxu0 %vm201_vm1, %v707_v41  ;;  %v6515_v41 = vld [vmem:[%s12335_s23 + $0x3b0] sm:$0xff] }
  0xa8   :  { %907 = vmatprep.mubr.f32.mxu0 %v8547_v3  ;;  %7439 = vmatpush1.bf16.msra.mxu0 %v7438_v47  ;;  %v652_v47 = vrot.slane %v8842_v27, 3 }
  0xa9   :  { %7441 = vmatprep.subr.bf16.mxu0 %v7440_v49  ;;  %v7454_v49 = vpack.c.bf16 %v6515_v41, %v6513_v35  ;;  %v86_v35 = vld [vmem:[%s12335_s23 + $0x8] sm:$0xff]  ;;  %v88_v41 = vld [vmem:[%s12335_s23 + $0x18] sm:$0xff] }
  0xaa   :  { %v702_v52 = vsel %vm677_vm2, %v651_v30, %v652_v47  ;;  %v701_v57 = vsel %vm677_vm2, %v652_v47, %v653_v53  ;;  %v663_v30 = vrot.slane %v8958_v8, 3  ;;  %v665_v47 = vrot.slane %v8978_v15, 3 }
  0xab   :  { %6463 = vmatmul.mubr.msk.f32.gmra.mrb[4].mxu0 %vm201_vm1, %v706_v62  ;;  %v700_v62 = vsel %vm677_vm2, %v653_v53, %v654_v59  ;;  %v666_v53 = vrot.slane %v8994_v22, 3 }
  0xac   :  { %913 = vmatprep.mubr.f32.mxu0 %v8547_v3  ;;  %7443 = vmatpush1.bf16.msra.mxu0 %v7442_v4  ;;  %v699_v4 = vsel %vm677_vm2, %v654_v59, %v655_v0  ;;  %v667_v59 = vrot.slane %v9004_v25, 3 }
  0xad   :  { %7445 = vmatprep.subr.bf16.mxu0 %v7444_v6  ;;  %v656_v6 = vrot.slane %v8888_v48, 3 }
  0xaf   :  { %6464 = vmatmul.mubr.msk.f32.gmra.mrb[6].mxu0 %vm201_vm1, %v705_v17  ;;  %v698_v10 = vsel %vm677_vm2, %v655_v0, %v656_v6  ;;  %v697_v13 = vsel %vm677_vm2, %v656_v6, %v657_v11  ;;  %v696_v17 = vsel %vm677_vm2, %v657_v11, %v658_v14  ;;  %v668_v0 = vrot.slane %v9014_v29, 3 }
  0xb0   :  { %919 = vmatprep.mubr.f32.mxu0 %v8547_v3  ;;  %7447 = vmatpush1.bf16.msra.mxu0 %v7446_v20  ;;  %v695_v20 = vsel %vm677_vm2, %v658_v14, %v659_v19  ;;  %v669_v6 = vrot.slane %v9024_v32, 3  ;;  %v670_v11 = vrot.slane %v9034_v36, 3  ;;  %v671_v14 = vrot.slane %v9044_v46, 3 }
  0xb1   :  { %7449 = vmatprep.subr.bf16.mxu0 %v7448_v21  ;;  %v660_v21 = vrot.slane %v8928_v61, 3 }
  0xb3   :  { %6465 = vmatmul.mubr.msk.f32.gmra.mrb[8].mxu0 %vm201_vm1, %v704_v28  ;;  %v694_v43 = vsel %vm677_vm2, %v659_v19, %v660_v21  ;;  %v693_v24 = vsel %vm677_vm2, %v660_v21, %v661_v23  ;;  %v692_v28 = vsel %vm677_vm2, %v661_v23, %v662_v26  ;;  %v672_v19 = vrot.slane %v9054_v50, 3 }
  0xb4   :  { %925 = vmatprep.mubr.f32.mxu0 %v8547_v3  ;;  %7451 = vmatpush1.bf16.msra.mxu0 %v7450_v31  ;;  %v691_v31 = vsel %vm677_vm2, %v662_v26, %v663_v30  ;;  %v673_v21 = vrot.slane %v9064_v56, 3  ;;  %v674_v23 = vrot.slane %v9074_v60, 3  ;;  %v675_v26 = vrot.slane %v9084_v2, 3 }
  0xb5   :  { %7453 = vmatprep.subr.bf16.mxu0 %v7452_v33  ;;  %v664_v33 = vrot.slane %v8968_v12, 3 }
  0xb7   :  { %6466 = vmatmul.mubr.msk.f32.gmra.mrb[10].mxu0 %vm201_vm1, %v703_v42  ;;  %v690_v42 = vsel %vm677_vm2, %v663_v30, %v664_v33  ;;  %v676_v30 = vrot.slane %v9094_v7, 3 }
  0xb8   :  { %931 = vmatprep.mubr.f32.mxu0 %v8547_v3  ;;  %7455 = vmatpush1.bf16.msra.mxu0 %v7454_v49  ;;  %v7456_v49 = vpack.c.bf16 %v88_v41, %v86_v35  ;;  %v1088_v35 = vrot.slane %v8711_v37, 4  ;;  %v1089_v41 = vrot.slane %v8716_v38, 4 }
  0xba   :  { %7457 = vmatprep.subr.bf16.mxu0 %v7456_v49  ;;  %v90_v49 = vld [vmem:[%s12335_s23 + $0x28] sm:$0xff]  ;;  %v1151_v38 = vsel %vm1120_vm3, %v1088_v35, %v1089_v41 }
  0xbb   :  { %6467 = vmatmul.mubr.msk.f32.gmra.mrb[12].mxu0 %vm201_vm1, %v702_v52  ;;  %v689_v52 = vsel %vm677_vm2, %v664_v33, %v665_v47  ;;  %v709_v33 = vsel %vm677_vm2, %v676_v30, %v645_v16  ;;  %v92_v16 = vld [vmem:[%s12335_s23 + $0x38] sm:$0xff] }
  0xbc   :  { %937 = vmatprep.mubr.f32.mxu0 %v8547_v3 }
  0xbf   :  { %6468 = vmatmul.mubr.msk.f32.gmra.mrb[14].mxu0 %vm201_vm1, %v701_v57  ;;  %v688_v57 = vsel %vm677_vm2, %v665_v47, %v666_v53  ;;  %v87_v47 = vld [vmem:[%s12335_s23 + $0x10] sm:$0xff] }
  0xc0   :  { %943 = vmatprep.mubr.f32.mxu0 %v8547_v3 }
  0xc3   :  { %6469 = vmatmul.mubr.msk.f32.gmra.mrb[16].mxu0 %vm201_vm1, %v700_v62  ;;  %v687_v62 = vsel %vm677_vm2, %v666_v53, %v667_v59 }
  0xc4   :  { %949 = vmatprep.mubr.f32.mxu0 %v8547_v3 }
  0xc7   :  { %6470 = vmatmul.mubr.msk.f32.gmra.mrb[18].mxu0 %vm201_vm1, %v699_v4  ;;  %v686_v4 = vsel %vm677_vm2, %v667_v59, %v668_v0  ;;  %v89_v59 = vld [vmem:[%s12335_s23 + $0x20] sm:$0xff] }
  0xc8   :  { %955 = vmatprep.mubr.f32.mxu0 %v8547_v3 }
  0xcb   :  { %6471 = vmatmul.mubr.msk.f32.gmra.mrb[20].mxu0 %vm201_vm1, %v698_v10  ;;  %v685_v10 = vsel %vm677_vm2, %v668_v0, %v669_v6  ;;  %v94_v0 = vld [vmem:[%s12335_s23 + $0x48] sm:$0xff] }
  0xcc   :  { %961 = vmatprep.mubr.f32.mxu0 %v8547_v3 }
  0xcf   :  { %6472 = vmatmul.mubr.msk.f32.gmra.mrb[22].mxu0 %vm201_vm1, %v697_v13  ;;  %v684_v13 = vsel %vm677_vm2, %v669_v6, %v670_v11  ;;  %v1091_v6 = vrot.slane %v8754_v54, 4  ;;  %v100_v54 = vld [vmem:[%s12335_s23 + $0x78] sm:$0xff] }
  0xd0   :  { %967 = vmatprep.mubr.f32.mxu0 %v8547_v3 }
  0xd3   :  { %6473 = vmatmul.mubr.msk.f32.gmra.mrb[24].mxu0 %vm201_vm1, %v696_v17  ;;  %v683_v17 = vsel %vm677_vm2, %v670_v11, %v671_v14 }
  0xd4   :  { %973 = vmatprep.mubr.f32.mxu0 %v8547_v3 }
  0xd7   :  { %6474 = vmatmul.mubr.msk.f32.gmra.mrb[26].mxu0 %vm201_vm1, %v695_v20  ;;  %v682_v20 = vsel %vm677_vm2, %v671_v14, %v672_v19  ;;  %v95_v14 = vld [vmem:[%s12335_s23 + $0x50] sm:$0xff] }
  0xd8   :  { %979 = vmatprep.mubr.f32.mxu0 %v8547_v3 }
  0xdb   :  { %6475 = vmatmul.mubr.msk.f32.gmra.mrb[28].mxu0 %vm201_vm1, %v694_v43  ;;  %v681_v43 = vsel %vm677_vm2, %v672_v19, %v673_v21 }
  0xdc   :  { %985 = vmatprep.mubr.f32.mxu0 %v8547_v3 }
  0xdf   :  { %6476 = vmatmul.mubr.msk.f32.gmra.mrb[30].mxu0 %vm201_vm1, %v693_v24  ;;  %v680_v24 = vsel %vm677_vm2, %v673_v21, %v674_v23 }
  0xe0   :  { %991 = vmatprep.mubr.f32.mxu0 %v8547_v3 }
  0xe3   :  { %6477 = vmatmul.mubr.msk.f32.gmra.mrb[32].mxu0 %vm201_vm1, %v692_v28  ;;  %v679_v28 = vsel %vm677_vm2, %v674_v23, %v675_v26  ;;  %v97_v23 = vld [vmem:[%s12335_s23 + $0x60] sm:$0xff] }
  0xe4   :  { %997 = vmatprep.mubr.f32.mxu0 %v8547_v3 }
  0xe7   :  { %6478 = vmatmul.mubr.msk.f32.gmra.mrb[34].mxu0 %vm201_vm1, %v691_v31  ;;  %v678_v31 = vsel %vm677_vm2, %v675_v26, %v676_v30  ;;  %v102_v26 = vld [vmem:[%s12335_s23 + $0x88] sm:$0xff]  ;;  %v1093_v30 = vrot.slane %v8798_v9, 4  ;;  %v108_v9 = vld [vmem:[%s12335_s23 + $0xb8] sm:$0xff] }
  0xe8   :  { %1003 = vmatprep.mubr.f32.mxu0 %v8547_v3 }
  0xeb   :  { %6479 = vmatmul.mubr.msk.f32.gmra.mrb[36].mxu0 %vm201_vm1, %v690_v42  ;;  %v85_v42 = vld [vmem:[%s12335_s23] sm:$0xff] }
  0xec   :  { %1009 = vmatprep.mubr.f32.mxu0 %v8547_v3  ;;  %v7458_v53 = vpack.c.bf16 %v87_v47, %v85_v42  ;;  %v103_v42 = vld [vmem:[%s12335_s23 + $0x90] sm:$0xff]  ;;  %v106_v47 = vld [vmem:[%s12335_s23 + $0xa8] sm:$0xff] }
  0xef   :  { %6480 = vmatmul.mubr.msk.f32.gmra.mrb[38].mxu0 %vm201_vm1, %v689_v52  ;;  %v1090_v52 = vrot.slane %v8732_v45, 4 }
  0xf0   :  { %1015 = vmatprep.mubr.f32.mxu0 %v8547_v3 }
  0xf1   :  { %v1150_v45 = vsel %vm1120_vm3, %v1089_v41, %v1090_v52  ;;  %v1149_v19 = vsel %vm1120_vm3, %v1090_v52, %v1091_v6  ;;  %v101_v41 = vld [vmem:[%s12335_s23 + $0x80] sm:$0xff]  ;;  %v7476_v52 = vpack.c.bf16 %v108_v9, %v106_v47  ;;  %v1113_v9 = vrot.slane %v9034_v36, 4 }
  0xf3   :  { %6481 = vmatmul.mubr.msk.f32.gmra.mrb[40].mxu0 %vm201_vm1, %v688_v57  ;;  %v7460_v57 = vpack.c.bf16 %v92_v16, %v90_v49  ;;  %v1094_v16 = vrot.slane %v8820_v18, 4  ;;  %v1095_v18 = vrot.slane %v8842_v27, 4 }
  0xf4   :  { %1021 = vmatprep.mubr.f32.mxu0 %v8547_v3 }
  0xf7   :  { %6482 = vmatmul.mubr.msk.f32.gmra.mrb[42].mxu0 %vm201_vm1, %v687_v62  ;;  %v91_v62 = vld [vmem:[%s12335_s23 + $0x30] sm:$0xff] }
  0xf8   :  { %1027 = vmatprep.mubr.f32.mxu0 %v8547_v3 }
  0xfb   :  { %6483 = vmatmul.mubr.msk.f32.gmra.mrb[44].mxu0 %vm201_vm1, %v686_v4  ;;  %v96_v4 = vld [vmem:[%s12335_s23 + $0x58] sm:$0xff] }
  0xfc   :  { %1033 = vmatprep.mubr.f32.mxu0 %v8547_v3  ;;  %v7464_v11 = vpack.c.bf16 %v96_v4, %v94_v0  ;;  %v1145_v0 = vsel %vm1120_vm3, %v1094_v16, %v1095_v18  ;;  %v1096_v4 = vrot.slane %v8858_v34, 4 }
  0xfe   :  { %v1144_v27 = vsel %vm1120_vm3, %v1095_v18, %v1096_v4  ;;  %v1117_v18 = vrot.slane %v9074_v60, 4 }
  0xff   :  { %6484 = vmatmul.mubr.msk.f32.gmra.mrb[46].mxu0 %vm201_vm1, %v685_v10  ;;  %v7462_v10 = vpack.c.bf16 %v91_v62, %v89_v59  ;;  %v1146_v59 = vsel %vm1120_vm3, %v1093_v30, %v1094_v16  ;;  %v1114_v16 = vrot.slane %v9044_v46, 4 }
 0x100   :  { %1039 = vmatprep.mubr.f32.mxu0 %v8547_v3 }
 0x103   :  { %6485 = vmatmul.mubr.msk.f32.gmra.mrb[48].mxu0 %vm201_vm1, %v684_v13  ;;  %v93_v13 = vld [vmem:[%s12335_s23 + $0x40] sm:$0xff] }
 0x104   :  { %1045 = vmatprep.mubr.f32.mxu0 %v8547_v3  ;;  %v7466_v21 = vpack.c.bf16 %v95_v14, %v93_v13  ;;  %v1100_v13 = vrot.slane %v8898_v51, 4  ;;  %v1101_v14 = vrot.slane %v8908_v55, 4 }
 0x107   :  { %6486 = vmatmul.mubr.msk.f32.gmra.mrb[50].mxu0 %vm201_vm1, %v683_v17  ;;  %v98_v17 = vld [vmem:[%s12335_s23 + $0x68] sm:$0xff] }
 0x108   :  { %1051 = vmatprep.mubr.f32.mxu0 %v8547_v3 }
 0x10b   :  { %6487 = vmatmul.mubr.msk.f32.gmra.mrb[52].mxu0 %vm201_vm1, %v682_v20  ;;  %v1092_v20 = vrot.slane %v8776_v63, 4  ;;  %v104_v63 = vld [vmem:[%s12335_s23 + $0x98] sm:$0xff] }
 0x10c   :  { %1057 = vmatprep.mubr.f32.mxu0 %v8547_v3 }
 0x10d   :  { %v1147_v49 = vsel %vm1120_vm3, %v1092_v20, %v1093_v30  ;;  %v1110_v30 = vrot.slane %v9004_v25, 4 }
 0x10f   :  { %6488 = vmatmul.mubr.msk.f32.gmra.mrb[54].mxu0 %vm201_vm1, %v681_v43  ;;  %v7468_v43 = vpack.c.bf16 %v100_v54, %v98_v17  ;;  %v1102_v17 = vrot.slane %v8918_v58, 4  ;;  %v1103_v54 = vrot.slane %v8928_v61, 4 }
 0x110   :  { %1063 = vmatprep.mubr.f32.mxu0 %v8547_v3 }
 0x111   :  { %v1138_v51 = vsel %vm1120_vm3, %v1101_v14, %v1102_v17  ;;  %v1137_v55 = vsel %vm1120_vm3, %v1102_v17, %v1103_v54  ;;  %v9614_v17 = vld [vmem:[%s12317_s0] sm:$0xff] }
 0x113   :  { %6489 = vmatmul.mubr.msk.f32.gmra.mrb[56].mxu0 %vm201_vm1, %v680_v24  ;;  %v99_v24 = vld [vmem:[%s12335_s23 + $0x70] sm:$0xff] }
 0x114   :  { %1069 = vmatprep.mubr.f32.mxu0 %v8547_v3 }
 0x117   :  { %6490 = vmatmul.mubr.msk.f32.gmra.mrb[58].mxu0 %vm201_vm1, %v679_v28  ;;  %v1148_v28 = vsel %vm1120_vm3, %v1091_v6, %v1092_v20  ;;  %v1105_v20 = vrot.slane %v8948_v5, 4  ;;  %v6414_v5 = vld [vmem:[%s12335_s23 + $0x188] sm:$0xff] }
 0x118   :  { %1075 = vmatprep.mubr.f32.mxu0 %v8547_v3 }
 0x11b   :  { %6491 = vmatmul.mubr.msk.f32.gmra.mrb[60].mxu0 %vm201_vm1, %v678_v31  ;;  %v7470_v31 = vpack.c.bf16 %v99_v24, %v97_v23  ;;  %v6416_v23 = vld [vmem:[%s12335_s23 + $0x198] sm:$0xff]  ;;  %v1108_v24 = vrot.slane %v8978_v15, 4 }
 0x11c   :  { %1081 = vmatprep.mubr.f32.mxu0 %v8547_v3 }
 0x11f   :  { %6492 = vmatmul.mubr.msk.f32.gmra.mrb[62].mxu0 %vm201_vm1, %v709_v33  ;;  %v7472_v33 = vpack.c.bf16 %v104_v63, %v102_v26  ;;  %v7480_v26 = vpack.c.bf16 %v6416_v23, %v6414_v5  ;;  %v1109_v63 = vrot.slane %v8994_v22, 4  ;;  %v6427_v5 = vld [vmem:[%s12335_s23 + $0x1f0] sm:$0xff]  ;;  %v6430_v23 = vld [vmem:[%s12335_s23 + $0x208] sm:$0xff] }
 0x120   :  { %1338 = vmatprep.mubr.f32.mxu0 %v8547_v3 }
 0x123   :  { %6517 = vmatmul.mubr.msk.f32.vlgmr.msra.gmra.mrb[0].mxu0 %vm201_vm1, %v1151_v38  ;;  %v7474_v38 = vpack.c.bf16 %v103_v42, %v101_v41  ;;  %v1112_v42 = vrot.slane %v9024_v32, 4 }
 0x124   :  { %1344 = vmatprep.mubr.f32.mxu0 %v8547_v3  ;;  %7459 = vmatpush1.bf16.msra.mxu0 %v7458_v53  ;;  %v105_v53 = vld [vmem:[%s12335_s23 + $0xa0] sm:$0xff] }
 0x125   :  { %7461 = vmatprep.subr.bf16.mxu0 %v7460_v57  ;;  %v107_v57 = vld [vmem:[%s12335_s23 + $0xb0] sm:$0xff] }
 0x126   :  { %v7478_v62 = vpack.c.bf16 %v107_v57, %v105_v53  ;;  %v1116_v57 = vrot.slane %v9064_v56, 4 }
 0x127   :  { %6518 = vmatmul.mubr.msk.f32.gmra.mrb[2].mxu0 %vm201_vm1, %v1150_v45  ;;  %v1097_v45 = vrot.slane %v8868_v40, 4 }
 0x128   :  { %1350 = vmatprep.mubr.f32.mxu0 %v8547_v3  ;;  %7463 = vmatpush1.bf16.msra.mxu0 %v7462_v10  ;;  %v1098_v10 = vrot.slane %v8878_v44, 4 }
 0x129   :  { %7465 = vmatprep.subr.bf16.mxu0 %v7464_v11  ;;  %v1143_v6 = vsel %vm1120_vm3, %v1096_v4, %v1097_v45  ;;  %v1099_v11 = vrot.slane %v8888_v48, 4  ;;  %v1139_v48 = vsel %vm1120_vm3, %v1100_v13, %v1101_v14  ;;  %v6422_v14 = vld [vmem:[%s12335_s23 + $0x1c8] sm:$0xff] }
 0x12a   :  { %v1142_v34 = vsel %vm1120_vm3, %v1097_v45, %v1098_v10 }
 0x12b   :  { %6519 = vmatmul.mubr.msk.f32.gmra.mrb[4].mxu0 %vm201_vm1, %v1149_v19  ;;  %v1141_v40 = vsel %vm1120_vm3, %v1098_v10, %v1099_v11  ;;  %v1140_v44 = vsel %vm1120_vm3, %v1099_v11, %v1100_v13  ;;  %v1104_v19 = vrot.slane %v8938_v1, 4  ;;  %v6413_v10 = vld [vmem:[%s12335_s23 + $0x180] sm:$0xff]  ;;  %v6418_v11 = vld [vmem:[%s12335_s23 + $0x1a8] sm:$0xff] }
 0x12c   :  { %1356 = vmatprep.mubr.f32.mxu0 %v8547_v3  ;;  %7467 = vmatpush1.bf16.msra.mxu0 %v7466_v21  ;;  %v1106_v21 = vrot.slane %v8958_v8, 4  ;;  %v6417_v13 = vld [vmem:[%s12335_s23 + $0x1a0] sm:$0xff] }
 0x12d   :  { %7469 = vmatprep.subr.bf16.mxu0 %v7468_v43  ;;  %v1136_v58 = vsel %vm1120_vm3, %v1103_v54, %v1104_v19  ;;  %v1135_v61 = vsel %vm1120_vm3, %v1104_v19, %v1105_v20  ;;  %v1107_v43 = vrot.slane %v8968_v12, 4  ;;  %v6423_v19 = vld [vmem:[%s12335_s23 + $0x1d0] sm:$0xff] }
 0x12e   :  { %v1134_v1 = vsel %vm1120_vm3, %v1105_v20, %v1106_v21  ;;  %v6428_v20 = vld [vmem:[%s12335_s23 + $0x1f8] sm:$0xff] }
 0x12f   :  { %6520 = vmatmul.mubr.msk.f32.gmra.mrb[6].mxu0 %vm201_vm1, %v1148_v28  ;;  %v1133_v8 = vsel %vm1120_vm3, %v1106_v21, %v1107_v43  ;;  %v1132_v12 = vsel %vm1120_vm3, %v1107_v43, %v1108_v24  ;;  %v1131_v28 = vsel %vm1120_vm3, %v1108_v24, %v1109_v63  ;;  %v6425_v43 = vld [vmem:[%s12335_s23 + $0x1e0] sm:$0xff]  ;;  %v9654_v24 = vld [vmem:[%s12317_s0 + $0x10] sm:$0xff] }
 0x130   :  { %1362 = vmatprep.mubr.f32.mxu0 %v8547_v3  ;;  %7471 = vmatpush1.bf16.msra.mxu0 %v7470_v31  ;;  %v1130_v31 = vsel %vm1120_vm3, %v1109_v63, %v1110_v30  ;;  %v6429_v63 = vld [vmem:[%s12335_s23 + $0x200] sm:$0xff] }
 0x131   :  { %7473 = vmatprep.subr.bf16.mxu0 %v7472_v33  ;;  %v1111_v33 = vrot.slane %v9014_v29, 4 }
 0x133   :  { %6521 = vmatmul.mubr.msk.f32.gmra.mrb[8].mxu0 %vm201_vm1, %v1147_v49  ;;  %v1129_v41 = vsel %vm1120_vm3, %v1110_v30, %v1111_v33  ;;  %v1128_v47 = vsel %vm1120_vm3, %v1111_v33, %v1112_v42  ;;  %v1127_v49 = vsel %vm1120_vm3, %v1112_v42, %v1113_v9  ;;  %v6434_v30 = vld [vmem:[%s12335_s23 + $0x228] sm:$0xff]  ;;  %v9674_v33 = vld [vmem:[%s12317_s0 + $0x18] sm:$0xff] }
 0x134   :  { %1368 = vmatprep.mubr.f32.mxu0 %v8547_v3  ;;  %7475 = vmatpush1.bf16.msra.mxu0 %v7474_v38  ;;  %v1126_v38 = vsel %vm1120_vm3, %v1113_v9, %v1114_v16  ;;  %v6435_v9 = vld [vmem:[%s12335_s23 + $0x230] sm:$0xff] }
 0x135   :  { %7477 = vmatprep.subr.bf16.mxu0 %v7476_v52  ;;  %v1115_v52 = vrot.slane %v9054_v50, 4 }
 0x137   :  { %6522 = vmatmul.mubr.msk.f32.gmra.mrb[10].mxu0 %vm201_vm1, %v1146_v59  ;;  %v1125_v53 = vsel %vm1120_vm3, %v1114_v16, %v1115_v52  ;;  %v1124_v59 = vsel %vm1120_vm3, %v1115_v52, %v1116_v57  ;;  %v9704_v52 = vld [vmem:[%s12317_s0 + $0x30] sm:$0xff] }
 0x138   :  { %1374 = vmatprep.mubr.f32.mxu0 %v8547_v3  ;;  %7479 = vmatpush1.bf16.msra.mxu0 %v7478_v62  ;;  %v1123_v62 = vsel %vm1120_vm3, %v1116_v57, %v1117_v18  ;;  %v9720_v57 = vld [vmem:[%s12317_s0 + $0x40] sm:$0xff] }
 0x139   :  { %7481 = vmatprep.subr.bf16.mxu0 %v7480_v26  ;;  %v7494_v26 = vpack.c.bf16 %v6427_v5, %v6425_v43 }
 0x13b   :  { %6523 = vmatmul.mubr.msk.f32.gmra.mrb[12].mxu0 %vm201_vm1, %v1145_v0  ;;  %v1118_v0 = vrot.slane %v9084_v2, 4 }
 0x13c   :  { %1380 = vmatprep.mubr.f32.mxu0 %v8547_v3 }
 0x13d   :  { %v1122_v4 = vsel %vm1120_vm3, %v1117_v18, %v1118_v0  ;;  %v9736_v18 = vld [vmem:[%s12317_s0 + $0x50] sm:$0xff] }
 0x13f   :  { %6524 = vmatmul.mubr.msk.f32.gmra.mrb[14].mxu0 %vm201_vm1, %v1144_v27  ;;  %v1119_v27 = vrot.slane %v9094_v7, 4 }
 0x140   :  { %1386 = vmatprep.mubr.f32.mxu0 %v8547_v3 }
 0x141   :  { %v1121_v45 = vsel %vm1120_vm3, %v1118_v0, %v1119_v27  ;;  %v9752_v0 = vld [vmem:[%s12317_s0 + $0x60] sm:$0xff] }
 0x143   :  { %6525 = vmatmul.mubr.msk.f32.gmra.mrb[16].mxu0 %vm201_vm1, %v1143_v6  ;;  %v1152_v6 = vsel %vm1120_vm3, %v1119_v27, %v1088_v35  ;;  %v9768_v27 = vld [vmem:[%s12317_s0 + $0x70] sm:$0xff] }
 0x144   :  { %1392 = vmatprep.mubr.f32.mxu0 %v8547_v3 }
 0x147   :  { %6526 = vmatmul.mubr.msk.f32.gmra.mrb[18].mxu0 %vm201_vm1, %v1142_v34  ;;  %v6415_v34 = vld [vmem:[%s12335_s23 + $0x190] sm:$0xff] }
 0x148   :  { %1398 = vmatprep.mubr.f32.mxu0 %v8547_v3  ;;  %v7482_v37 = vpack.c.bf16 %v6415_v34, %v6413_v10  ;;  %v9792_v10 = vld [vmem:[%s12317_s0 + $0x88] sm:$0xff]  ;;  %v9800_v34 = vld [vmem:[%s12317_s0 + $0x90] sm:$0xff] }
 0x14b   :  { %6527 = vmatmul.mubr.msk.f32.gmra.mrb[20].mxu0 %vm201_vm1, %v1141_v40  ;;  %v6420_v40 = vld [vmem:[%s12335_s23 + $0x1b8] sm:$0xff] }
 0x14c   :  { %1404 = vmatprep.mubr.f32.mxu0 %v8547_v3  ;;  %v7484_v35 = vpack.c.bf16 %v6420_v40, %v6418_v11  ;;  %v9808_v11 = vld [vmem:[%s12317_s0 + $0x98] sm:$0xff] }
 0x14f   :  { %6528 = vmatmul.mubr.msk.f32.gmra.mrb[22].mxu0 %vm201_vm1, %v1140_v44  ;;  %v6419_v44 = vld [vmem:[%s12335_s23 + $0x1b0] sm:$0xff] }
 0x150   :  { %1410 = vmatprep.mubr.f32.mxu0 %v8547_v3 }
 0x153   :  { %6529 = vmatmul.mubr.msk.f32.gmra.mrb[24].mxu0 %vm201_vm1, %v1139_v48  ;;  %v6424_v48 = vld [vmem:[%s12335_s23 + $0x1d8] sm:$0xff] }
 0x154   :  { %1416 = vmatprep.mubr.f32.mxu0 %v8547_v3  ;;  %v7488_v54 = vpack.c.bf16 %v6424_v48, %v6422_v14 }
 0x157   :  { %6530 = vmatmul.mubr.msk.f32.gmra.mrb[26].mxu0 %vm201_vm1, %v1138_v51  ;;  %v7486_v51 = vpack.c.bf16 %v6419_v44, %v6417_v13  ;;  %v563_v13 = vrot.slane %v9720_v57, 2 }
 0x158   :  { %1422 = vmatprep.mubr.f32.mxu0 %v8547_v3 }
 0x15b   :  { %6531 = vmatmul.mubr.msk.f32.gmra.mrb[28].mxu0 %vm201_vm1, %v1137_v55  ;;  %v6421_v55 = vld [vmem:[%s12335_s23 + $0x1c0] sm:$0xff] }
 0x15c   :  { %1428 = vmatprep.mubr.f32.mxu0 %v8547_v3  ;;  %v7490_v21 = vpack.c.bf16 %v6423_v19, %v6421_v55 }
 0x15f   :  { %6532 = vmatmul.mubr.msk.f32.gmra.mrb[30].mxu0 %vm201_vm1, %v1136_v58  ;;  %v6426_v58 = vld [vmem:[%s12335_s23 + $0x1e8] sm:$0xff] }
 0x160   :  { %1434 = vmatprep.mubr.f32.mxu0 %v8547_v3 }
 0x163   :  { %6533 = vmatmul.mubr.msk.f32.gmra.mrb[32].mxu0 %vm201_vm1, %v1135_v61  ;;  %v9634_v61 = vld [vmem:[%s12317_s0 + $0x8] sm:$0xff] }
 0x164   :  { %1440 = vmatprep.mubr.f32.mxu0 %v8547_v3 }
 0x167   :  { %6534 = vmatmul.mubr.msk.f32.gmra.mrb[34].mxu0 %vm201_vm1, %v1134_v1  ;;  %v7492_v1 = vpack.c.bf16 %v6428_v20, %v6426_v58  ;;  %v567_v58 = vrot.slane %v9752_v0, 2 }
 0x168   :  { %1446 = vmatprep.mubr.f32.mxu0 %v8547_v3 }
 0x16b   :  { %6535 = vmatmul.mubr.msk.f32.gmra.mrb[36].mxu0 %vm201_vm1, %v1133_v8  ;;  %v6432_v8 = vld [vmem:[%s12335_s23 + $0x218] sm:$0xff] }
 0x16c   :  { %1452 = vmatprep.mubr.f32.mxu0 %v8547_v3 }
 0x16f   :  { %6536 = vmatmul.mubr.msk.f32.gmra.mrb[38].mxu0 %vm201_vm1, %v1132_v12  ;;  %v7496_v12 = vpack.c.bf16 %v6432_v8, %v6430_v23 }
 0x170   :  { %1458 = vmatprep.mubr.f32.mxu0 %v8547_v3 }
 0x173   :  { %6537 = vmatmul.mubr.msk.f32.gmra.mrb[40].mxu0 %vm201_vm1, %v1131_v28  ;;  %v6431_v28 = vld [vmem:[%s12335_s23 + $0x210] sm:$0xff] }
 0x174   :  { %1464 = vmatprep.mubr.f32.mxu0 %v8547_v3 }
 0x177   :  { %6538 = vmatmul.mubr.msk.f32.gmra.mrb[42].mxu0 %vm201_vm1, %v1130_v31  ;;  %v6436_v31 = vld [vmem:[%s12335_s23 + $0x238] sm:$0xff] }
 0x178   :  { %1470 = vmatprep.mubr.f32.mxu0 %v8547_v3  ;;  %v7500_v42 = vpack.c.bf16 %v6436_v31, %v6434_v30  ;;  %v574_v30 = vrot.slane %v9808_v11, 2 }
 0x17b   :  { %6539 = vmatmul.mubr.msk.f32.gmra.mrb[44].mxu0 %vm201_vm1, %v1129_v41  ;;  %v7498_v41 = vpack.c.bf16 %v6431_v28, %v6429_v63  ;;  %v573_v63 = vrot.slane %v9800_v34, 2 }
 0x17c   :  { %1476 = vmatprep.mubr.f32.mxu0 %v8547_v3 }
 0x17d   :  { %v600_v31 = vsel %vm587_vm4, %v573_v63, %v574_v30 }
 0x17f   :  { %6540 = vmatmul.mubr.msk.f32.gmra.mrb[46].mxu0 %vm201_vm1, %v1128_v47  ;;  %v6433_v47 = vld [vmem:[%s12335_s23 + $0x220] sm:$0xff] }
 0x180   :  { %1482 = vmatprep.mubr.f32.mxu0 %v8547_v3  ;;  %v7502_v16 = vpack.c.bf16 %v6435_v9, %v6433_v47  ;;  %v8536_v47 = vld [vmem:[%s12317_s0 + $0xa8] sm:$0xff] }
 0x181   :  { %v576_v9 = vrot.slane %v8536_v47, 2 }
 0x183   :  { %6541 = vmatmul.mubr.msk.f32.gmra.mrb[48].mxu0 %vm201_vm1, %v1127_v49  ;;  %v9688_v49 = vld [vmem:[%s12317_s0 + $0x20] sm:$0xff] }
 0x184   :  { %1488 = vmatprep.mubr.f32.mxu0 %v8547_v3 }
 0x187   :  { %6542 = vmatmul.mubr.msk.f32.gmra.mrb[50].mxu0 %vm201_vm1, %v1126_v38  ;;  %v9696_v38 = vld [vmem:[%s12317_s0 + $0x28] sm:$0xff] }
 0x188   :  { %1494 = vmatprep.mubr.f32.mxu0 %v8547_v3 }
 0x18b   :  { %6543 = vmatmul.mubr.msk.f32.gmra.mrb[52].mxu0 %vm201_vm1, %v1125_v53  ;;  %v9712_v53 = vld [vmem:[%s12317_s0 + $0x38] sm:$0xff] }
 0x18c   :  { %1500 = vmatprep.mubr.f32.mxu0 %v8547_v3 }
 0x18f   :  { %6544 = vmatmul.mubr.msk.f32.gmra.mrb[54].mxu0 %vm201_vm1, %v1124_v59  ;;  %v9728_v59 = vld [vmem:[%s12317_s0 + $0x48] sm:$0xff] }
 0x190   :  { %1506 = vmatprep.mubr.f32.mxu0 %v8547_v3  ;;  %v564_v14 = vrot.slane %v9728_v59, 2 }
 0x192   :  { %v610_v48 = vsel %vm587_vm4, %v563_v13, %v564_v14 }
 0x193   :  { %6545 = vmatmul.mubr.msk.f32.gmra.mrb[56].mxu0 %vm201_vm1, %v1123_v62  ;;  %v9744_v62 = vld [vmem:[%s12317_s0 + $0x58] sm:$0xff] }
 0x194   :  { %1512 = vmatprep.mubr.f32.mxu0 %v8547_v3  ;;  %v566_v55 = vrot.slane %v9744_v62, 2 }
 0x196   :  { %v607_v20 = vsel %vm587_vm4, %v566_v55, %v567_v58 }
 0x197   :  { %6546 = vmatmul.mubr.msk.f32.gmra.mrb[58].mxu0 %vm201_vm1, %v1122_v4  ;;  %v9760_v4 = vld [vmem:[%s12317_s0 + $0x68] sm:$0xff] }
 0x198   :  { %1518 = vmatprep.mubr.f32.mxu0 %v8547_v3 }
 0x19b   :  { %6547 = vmatmul.mubr.msk.f32.gmra.mrb[60].mxu0 %vm201_vm1, %v1121_v45  ;;  %v9776_v45 = vld [vmem:[%s12317_s0 + $0x78] sm:$0xff] }
 0x19c   :  { %1524 = vmatprep.mubr.f32.mxu0 %v8547_v3  ;;  %v570_v5 = vrot.slane %v9776_v45, 2 }
 0x19f   :  { %6548 = vmatmul.mubr.msk.f32.gmra.mrb[62].mxu0 %vm201_vm1, %v1152_v6  ;;  %v9784_v6 = vld [vmem:[%s12317_s0 + $0x80] sm:$0xff] }
 0x1a0   :  { %1691 = vmatprep.mubr.f32.mxu0 %v8547_v3  ;;  %v571_v8 = vrot.slane %v9784_v6, 2 }
 0x1a3   :  { %6549 = vmatmul.mubr.msk.f32.vlgmr.msra.gmra.mrb[0].mxu0 %vm201_vm1, %v9614_v17 }
 0x1a4   :  { %1697 = vmatprep.mubr.f32.mxu0 %v8547_v3  ;;  %7483 = vmatpush1.bf16.msra.mxu0 %v7482_v37  ;;  %v562_v37 = vrot.slane %v9712_v53, 2 }
 0x1a5   :  { %7485 = vmatprep.subr.bf16.mxu0 %v7484_v35 }
 0x1a6   :  { %v611_v44 = vsel %vm587_vm4, %v562_v37, %v563_v13 }
 0x1a7   :  { %6550 = vmatmul.mubr.msk.f32.gmra.mrb[2].mxu0 %vm201_vm1, %v9634_v61 }
 0x1a8   :  { %1703 = vmatprep.mubr.f32.mxu0 %v8547_v3  ;;  %7487 = vmatpush1.bf16.msra.mxu0 %v7486_v51  ;;  %v565_v51 = vrot.slane %v9736_v18, 2 }
 0x1a9   :  { %7489 = vmatprep.subr.bf16.mxu0 %v7488_v54 }
 0x1aa   :  { %v609_v54 = vsel %vm587_vm4, %v564_v14, %v565_v51  ;;  %v608_v19 = vsel %vm587_vm4, %v565_v51, %v566_v55  ;;  %v2365_v14 = vld [vmem:[%s12318_s2] sm:$0x3] }
 0x1ab   :  { %6551 = vmatmul.mubr.msk.f32.gmra.mrb[4].mxu0 %vm201_vm1, %v9654_v24 }
 0x1ac   :  { %1709 = vmatprep.mubr.f32.mxu0 %v8547_v3  ;;  %7491 = vmatpush1.bf16.msra.mxu0 %v7490_v21 }
 0x1ad   :  { %7493 = vmatprep.subr.bf16.mxu0 %v7492_v1  ;;  %v569_v1 = vrot.slane %v9768_v27, 2 }
 0x1af   :  { %6552 = vmatmul.mubr.msk.f32.gmra.mrb[6].mxu0 %vm201_vm1, %v9674_v33  ;;  %v604_v23 = vsel %vm587_vm4, %v569_v1, %v570_v5 }
 0x1b0   :  { %1715 = vmatprep.mubr.f32.mxu0 %v8547_v3  ;;  %7495 = vmatpush1.bf16.msra.mxu0 %v7494_v26  ;;  %v572_v26 = vrot.slane %v9792_v10, 2 }
 0x1b1   :  { %7497 = vmatprep.subr.bf16.mxu0 %v7496_v12 }
 0x1b2   :  { %v602_v12 = vsel %vm587_vm4, %v571_v8, %v572_v26  ;;  %v601_v28 = vsel %vm587_vm4, %v572_v26, %v573_v63 }
 0x1b3   :  { %6553 = vmatmul.mubr.msk.f32.gmra.mrb[8].mxu0 %vm201_vm1, %v9688_v49 }
 0x1b4   :  { %1721 = vmatprep.mubr.f32.mxu0 %v8547_v3  ;;  %7499 = vmatpush1.bf16.msra.mxu0 %v7498_v41 }
 0x1b5   :  { %7501 = vmatprep.subr.bf16.mxu0 %v7500_v42 }
 0x1b7   :  { %6554 = vmatmul.mubr.msk.f32.gmra.mrb[10].mxu0 %vm201_vm1, %v9696_v38 }
 0x1b8   :  { %1727 = vmatprep.mubr.f32.mxu0 %v8547_v3  ;;  %7503 = vmatpush1.bf16.msra.mxu0 %v7502_v16  ;;  %v8537_v16 = vld [vmem:[%s12317_s0 + $0xb0] sm:$0xff] }
 0x1bb   :  { %6555 = vmatmul.mubr.msk.f32.gmra.mrb[12].mxu0 %vm201_vm1, %v9704_v52 }
 0x1bc   :  { %1733 = vmatprep.mubr.f32.mxu0 %v8547_v3 }
 0x1bf   :  { %6556 = vmatmul.mubr.msk.f32.gmra.mrb[14].mxu0 %vm201_vm1, %v9712_v53  ;;  %v8538_v53 = vld [vmem:[%s12317_s0 + $0xb8] sm:$0xff] }
 0x1c0   :  { %1739 = vmatprep.mubr.f32.mxu0 %v8547_v3 }
 0x1c3   :  { %6557 = vmatmul.mubr.msk.f32.gmra.mrb[16].mxu0 %vm201_vm1, %v9720_v57  ;;  %v578_v57 = vrot.slane %v8538_v53, 2 }
 0x1c4   :  { %1745 = vmatprep.mubr.f32.mxu0 %v8547_v3 }
 0x1c7   :  { %6558 = vmatmul.mubr.msk.f32.gmra.mrb[18].mxu0 %vm201_vm1, %v9728_v59 }
 0x1c8   :  { %1751 = vmatprep.mubr.f32.mxu0 %v8547_v3 }
 0x1cb   :  { %6559 = vmatmul.mubr.msk.f32.gmra.mrb[20].mxu0 %vm201_vm1, %v9736_v18  ;;  %v8539_v18 = vld [vmem:[%s12317_s0 + $0xc0] sm:$0xff] }
 0x1cc   :  { %1757 = vmatprep.mubr.f32.mxu0 %v8547_v3 }
 0x1cf   :  { %6560 = vmatmul.mubr.msk.f32.gmra.mrb[22].mxu0 %vm201_vm1, %v9744_v62  ;;  %v579_v62 = vrot.slane %v8539_v18, 2 }
 0x1d0   :  { %1763 = vmatprep.mubr.f32.mxu0 %v8547_v3 }
 0x1d3   :  { %6561 = vmatmul.mubr.msk.f32.gmra.mrb[24].mxu0 %vm201_vm1, %v9752_v0  ;;  %v595_v0 = vsel %vm587_vm4, %v578_v57, %v579_v62 }
 0x1d4   :  { %1769 = vmatprep.mubr.f32.mxu0 %v8547_v3 }
 0x1d7   :  { %6562 = vmatmul.mubr.msk.f32.gmra.mrb[26].mxu0 %vm201_vm1, %v9760_v4 }
 0x1d8   :  { %1775 = vmatprep.mubr.f32.mxu0 %v8547_v3 }
 0x1db   :  { %6563 = vmatmul.mubr.msk.f32.gmra.mrb[28].mxu0 %vm201_vm1, %v9768_v27 }
 0x1dc   :  { %1781 = vmatprep.mubr.f32.mxu0 %v8547_v3 }
 0x1df   :  { %6564 = vmatmul.mubr.msk.f32.gmra.mrb[30].mxu0 %vm201_vm1, %v9776_v45 }
 0x1e0   :  { %1787 = vmatprep.mubr.f32.mxu0 %v8547_v3 }
 0x1e3   :  { %6565 = vmatmul.mubr.msk.f32.gmra.mrb[32].mxu0 %vm201_vm1, %v9784_v6  ;;  %v8541_v6 = vld [vmem:[%s12317_s0 + $0xd0] sm:$0xff] }
 0x1e4   :  { %1793 = vmatprep.mubr.f32.mxu0 %v8547_v3 }
 0x1e7   :  { %6566 = vmatmul.mubr.msk.f32.gmra.mrb[34].mxu0 %vm201_vm1, %v9792_v10  ;;  %v581_v10 = vrot.slane %v8541_v6, 2 }
 0x1e8   :  { %1799 = vmatprep.mubr.f32.mxu0 %v8547_v3 }
 0x1eb   :  { %6567 = vmatmul.mubr.msk.f32.gmra.mrb[36].mxu0 %vm201_vm1, %v9800_v34 }
 0x1ec   :  { %1805 = vmatprep.mubr.f32.mxu0 %v8547_v3 }
 0x1ef   :  { %6568 = vmatmul.mubr.msk.f32.gmra.mrb[38].mxu0 %vm201_vm1, %v9808_v11  ;;  %v8542_v11 = vld [vmem:[%s12317_s0 + $0xd8] sm:$0xff] }
 0x1f0   :  { %1811 = vmatprep.mubr.f32.mxu0 %v8547_v3 }
 0x1f3   :  { %6569 = vmatmul.mubr.msk.f32.gmra.mrb[40].mxu0 %vm201_vm1, %v8978_v15  ;;  %v555_v15 = vrot.slane %v9614_v17, 2 }
 0x1f4   :  { %1817 = vmatprep.mubr.f32.mxu0 %v8547_v3 }
 0x1f7   :  { %6570 = vmatmul.mubr.msk.f32.gmra.mrb[42].mxu0 %vm201_vm1, %v8994_v22  ;;  %v556_v22 = vrot.slane %v9634_v61, 2  ;;  %v568_v61 = vrot.slane %v9760_v4, 2  ;;  %v8540_v4 = vld [vmem:[%s12317_s0 + $0xc8] sm:$0xff] }
 0x1f8   :  { %1823 = vmatprep.mubr.f32.mxu0 %v8547_v3  ;;  %v580_v27 = vrot.slane %v8540_v4, 2 }
 0x1f9   :  { %v606_v21 = vsel %vm587_vm4, %v567_v58, %v568_v61  ;;  %v605_v43 = vsel %vm587_vm4, %v568_v61, %v569_v1  ;;  %v2506_v1 = vld [vmem:[%s12319_s3 + $0x8] sm:$0xff] }
 0x1fa   :  { %v594_v45 = vsel %vm587_vm4, %v579_v62, %v580_v27  ;;  %v593_v34 = vsel %vm587_vm4, %v580_v27, %v581_v10  ;;  %2601 = vmatprep.mubr.f32.mxu1 %v2506_v1 }
 0x1fb   :  { %6571 = vmatmul.mubr.msk.f32.gmra.mrb[44].mxu0 %vm201_vm1, %v9004_v25  ;;  %v618_v25 = vsel %vm587_vm4, %v555_v15, %v556_v22 }
 0x1fc   :  { %1829 = vmatprep.mubr.f32.mxu0 %v8547_v3 }
 0x1ff   :  { %6572 = vmatmul.mubr.msk.f32.gmra.mrb[46].mxu0 %vm201_vm1, %v9014_v29  ;;  %v557_v29 = vrot.slane %v9654_v24, 2  ;;  %v603_v24 = vsel %vm587_vm4, %v570_v5, %v571_v8 }
 0x200   :  { %1835 = vmatprep.mubr.f32.mxu0 %v8547_v3 }
 0x203   :  { %6573 = vmatmul.mubr.msk.f32.gmra.mrb[48].mxu0 %vm201_vm1, %v9024_v32  ;;  %v617_v32 = vsel %vm587_vm4, %v556_v22, %v557_v29  ;;  %v582_v22 = vrot.slane %v8542_v11, 2 }
 0x204   :  { %1841 = vmatprep.mubr.f32.mxu0 %v8547_v3 }
 0x207   :  { %6574 = vmatmul.mubr.msk.f32.gmra.mrb[50].mxu0 %vm201_vm1, %v9034_v36  ;;  %v558_v36 = vrot.slane %v9674_v33, 2  ;;  %v8535_v33 = vld [vmem:[%s12317_s0 + $0xa0] sm:$0xff] }
 0x208   :  { %1847 = vmatprep.mubr.f32.mxu0 %v8547_v3  ;;  %v575_v41 = vrot.slane %v8535_v33, 2 }
 0x20a   :  { %v599_v42 = vsel %vm587_vm4, %v574_v30, %v575_v41 }
 0x20b   :  { %6575 = vmatmul.mubr.msk.f32.gmra.mrb[52].mxu0 %vm201_vm1, %v9044_v46  ;;  %v616_v46 = vsel %vm587_vm4, %v557_v29, %v558_v36  ;;  %v8543_v29 = vld [vmem:[%s12317_s0 + $0xe0] sm:$0xff] }
 0x20c   :  { %1853 = vmatprep.mubr.f32.mxu0 %v8547_v3 }
 0x20f   :  { %6576 = vmatmul.mubr.msk.f32.gmra.mrb[54].mxu0 %vm201_vm1, %v9054_v50  ;;  %v559_v50 = vrot.slane %v9688_v49, 2  ;;  %v598_v49 = vsel %vm587_vm4, %v575_v41, %v576_v9 }
 0x210   :  { %1859 = vmatprep.mubr.f32.mxu0 %v8547_v3 }
 0x213   :  { %6577 = vmatmul.mubr.msk.f32.gmra.mrb[56].mxu0 %vm201_vm1, %v9064_v56  ;;  %v615_v56 = vsel %vm587_vm4, %v558_v36, %v559_v50 }
 0x214   :  { %1865 = vmatprep.mubr.f32.mxu0 %v8547_v3 }
 0x217   :  { %6578 = vmatmul.mubr.msk.f32.gmra.mrb[58].mxu0 %vm201_vm1, %v9074_v60  ;;  %v560_v60 = vrot.slane %v9696_v38, 2  ;;  %v577_v38 = vrot.slane %v8537_v16, 2 }
 0x218   :  { %1871 = vmatprep.mubr.f32.mxu0 %v8547_v3 }
 0x219   :  { %v596_v59 = vsel %vm587_vm4, %v577_v38, %v578_v57 }
 0x21b   :  { %6579 = vmatmul.mubr.msk.f32.gmra.mrb[60].mxu0 %vm201_vm1, %v9084_v2  ;;  %v614_v2 = vsel %vm587_vm4, %v559_v50, %v560_v60 }
 0x21c   :  { %1877 = vmatprep.mubr.f32.mxu0 %v8547_v3 }
 0x21f   :  { %6580 = vmatmul.mubr.msk.f32.gmra.mrb[62].mxu0 %vm201_vm1, %v9094_v7  ;;  %v561_v7 = vrot.slane %v9704_v52, 2  ;;  %v597_v52 = vsel %vm587_vm4, %v576_v9, %v577_v38 }
 0x220   :  { %2044 = vmatprep.mubr.f32.mxu0 %v8547_v3 }
 0x221   :  { %v613_v40 = vsel %vm587_vm4, %v560_v60, %v561_v7  ;;  %v612_v35 = vsel %vm587_vm4, %v561_v7, %v562_v37  ;;  %v8545_v60 = vld [vmem:[%s12317_s0 + $0xf0] sm:$0xff] }
 0x223   :  { %6581 = vmatmul.mubr.msk.f32.vlgmr.msra.gmra.mrb[0].mxu0 %vm201_vm1, %v618_v25  ;;  %v592_v25 = vsel %vm587_vm4, %v581_v10, %v582_v22 }
 0x224   :  { %2050 = vmatprep.mubr.f32.mxu0 %v8547_v3 }
 0x227   :  { %6582 = vmatmul.mubr.msk.f32.gmra.mrb[2].mxu0 %vm201_vm1, %v617_v32  ;;  %v583_v32 = vrot.slane %v8543_v29, 2 }
 0x228   :  { %2056 = vmatprep.mubr.f32.mxu0 %v8547_v3 }
 0x229   :  { %v591_v36 = vsel %vm587_vm4, %v582_v22, %v583_v32 }
 0x22b   :  { %6583 = vmatmul.mubr.msk.f32.gmra.mrb[4].mxu0 %vm201_vm1, %v616_v46  ;;  %v8544_v46 = vld [vmem:[%s12317_s0 + $0xe8] sm:$0xff] }
 0x22c   :  { %2062 = vmatprep.mubr.f32.mxu0 %v8547_v3  ;;  %v584_v50 = vrot.slane %v8544_v46, 2 }
 0x22f   :  { %6584 = vmatmul.mubr.msk.f32.gmra.mrb[6].mxu0 %vm201_vm1, %v615_v56  ;;  %v590_v56 = vsel %vm587_vm4, %v583_v32, %v584_v50 }
 0x230   :  { %2068 = vmatprep.mubr.f32.mxu0 %v8547_v3 }
 0x233   :  { %6585 = vmatmul.mubr.msk.f32.gmra.mrb[8].mxu0 %vm201_vm1, %v614_v2  ;;  %v585_v2 = vrot.slane %v8545_v60, 2 }
 0x234   :  { %2074 = vmatprep.mubr.f32.mxu0 %v8547_v3 }
 0x235   :  { %v589_v7 = vsel %vm587_vm4, %v584_v50, %v585_v2 }
 0x237   :  { %6586 = vmatmul.mubr.msk.f32.gmra.mrb[10].mxu0 %vm201_vm1, %v613_v40  ;;  %v8546_v40 = vld [vmem:[%s12317_s0 + $0xf8] sm:$0xff] }
 0x238   :  { %2080 = vmatprep.mubr.f32.mxu0 %v8547_v3  ;;  %v586_v37 = vrot.slane %v8546_v40, 2 }
 0x23a   :  { %v619_v13 = vsel %vm587_vm4, %v586_v37, %v555_v15 }
 0x23b   :  { %6587 = vmatmul.mubr.msk.f32.gmra.mrb[12].mxu0 %vm201_vm1, %v612_v35  ;;  %v588_v35 = vsel %vm587_vm4, %v585_v2, %v586_v37 }
 0x23c   :  { %2086 = vmatprep.mubr.f32.mxu0 %v8547_v3 }
 0x23f   :  { %6588 = vmatmul.mubr.msk.f32.gmra.mrb[14].mxu0 %vm201_vm1, %v611_v44  ;;  %v2369_v44 = vsub.s32 0, %v8718_v39 }
 0x240   :  { %2092 = vmatprep.mubr.f32.mxu0 %v8547_v3 }
 0x241   :  { %v10045_v51 = vrot.slane %v2365_v14, %v2369_v44 }
 0x243   :  { %6589 = vmatmul.mubr.msk.f32.gmra.mrb[16].mxu0 %vm201_vm1, %v610_v48  ;;  %v2373_v48 = vsub.s32 1, %v8718_v39 }
 0x244   :  { %2098 = vmatprep.mubr.f32.mxu0 %v8547_v3 }
 0x245   :  { %v10049_v15 = vrot.slane %v2365_v14, %v2373_v48 }
 0x247   :  { %6590 = vmatmul.mubr.msk.f32.gmra.mrb[18].mxu0 %vm201_vm1, %v609_v54 }
 0x248   :  { %2104 = vmatprep.mubr.f32.mxu0 %v8547_v3 }
 0x24b   :  { %6591 = vmatmul.mubr.msk.f32.gmra.mrb[20].mxu0 %vm201_vm1, %v608_v19 }
 0x24c   :  { %2110 = vmatprep.mubr.f32.mxu0 %v8547_v3 }
 0x24f   :  { %6592 = vmatmul.mubr.msk.f32.gmra.mrb[22].mxu0 %vm201_vm1, %v607_v20 }
 0x250   :  { %2116 = vmatprep.mubr.f32.mxu0 %v8547_v3 }
 0x253   :  { %6593 = vmatmul.mubr.msk.f32.gmra.mrb[24].mxu0 %vm201_vm1, %v606_v21 }
 0x254   :  { %2122 = vmatprep.mubr.f32.mxu0 %v8547_v3 }
 0x257   :  { %6594 = vmatmul.mubr.msk.f32.gmra.mrb[26].mxu0 %vm201_vm1, %v605_v43 }
 0x258   :  { %2128 = vmatprep.mubr.f32.mxu0 %v8547_v3 }
 0x25b   :  { %6595 = vmatmul.mubr.msk.f32.gmra.mrb[28].mxu0 %vm201_vm1, %v604_v23 }
 0x25c   :  { %2134 = vmatprep.mubr.f32.mxu0 %v8547_v3 }
 0x25f   :  { %6596 = vmatmul.mubr.msk.f32.gmra.mrb[30].mxu0 %vm201_vm1, %v603_v24 }
 0x260   :  { %2140 = vmatprep.mubr.f32.mxu0 %v8547_v3 }
 0x263   :  { %6597 = vmatmul.mubr.msk.f32.gmra.mrb[32].mxu0 %vm201_vm1, %v602_v12 }
 0x264   :  { %2146 = vmatprep.mubr.f32.mxu0 %v8547_v3 }
 0x267   :  { %6598 = vmatmul.mubr.msk.f32.gmra.mrb[34].mxu0 %vm201_vm1, %v601_v28 }
 0x268   :  { %2152 = vmatprep.mubr.f32.mxu0 %v8547_v3 }
 0x26b   :  { %6599 = vmatmul.mubr.msk.f32.gmra.mrb[36].mxu0 %vm201_vm1, %v600_v31 }
 0x26c   :  { %2158 = vmatprep.mubr.f32.mxu0 %v8547_v3 }
 0x26f   :  { %6600 = vmatmul.mubr.msk.f32.gmra.mrb[38].mxu0 %vm201_vm1, %v599_v42 }
 0x270   :  { %2164 = vmatprep.mubr.f32.mxu0 %v8547_v3 }
 0x273   :  { %6601 = vmatmul.mubr.msk.f32.gmra.mrb[40].mxu0 %vm201_vm1, %v598_v49 }
 0x274   :  { %2170 = vmatprep.mubr.f32.mxu0 %v8547_v3 }
 0x277   :  { %6602 = vmatmul.mubr.msk.f32.gmra.mrb[42].mxu0 %vm201_vm1, %v597_v52 }
 0x278   :  { %2176 = vmatprep.mubr.f32.mxu0 %v8547_v3 }
 0x27b   :  { %6603 = vmatmul.mubr.msk.f32.gmra.mrb[44].mxu0 %vm201_vm1, %v596_v59 }
 0x27c   :  { %2182 = vmatprep.mubr.f32.mxu0 %v8547_v3 }
 0x27f   :  { %6604 = vmatmul.mubr.msk.f32.gmra.mrb[46].mxu0 %vm201_vm1, %v595_v0 }
 0x280   :  { %2188 = vmatprep.mubr.f32.mxu0 %v8547_v3 }
 0x283   :  { %6605 = vmatmul.mubr.msk.f32.gmra.mrb[48].mxu0 %vm201_vm1, %v594_v45 }
 0x284   :  { %2194 = vmatprep.mubr.f32.mxu0 %v8547_v3 }
 0x287   :  { %6606 = vmatmul.mubr.msk.f32.gmra.mrb[50].mxu0 %vm201_vm1, %v593_v34 }
 0x288   :  { %2200 = vmatprep.mubr.f32.mxu0 %v8547_v3 }
 0x28b   :  { %6607 = vmatmul.mubr.msk.f32.gmra.mrb[52].mxu0 %vm201_vm1, %v592_v25 }
 0x28c   :  { %2206 = vmatprep.mubr.f32.mxu0 %v8547_v3 }
 0x28f   :  { %6608 = vmatmul.mubr.msk.f32.gmra.mrb[54].mxu0 %vm201_vm1, %v591_v36 }
 0x290   :  { %2212 = vmatprep.mubr.f32.mxu0 %v8547_v3 }
 0x293   :  { %6609 = vmatmul.mubr.msk.f32.gmra.mrb[56].mxu0 %vm201_vm1, %v590_v56 }
 0x294   :  { %2218 = vmatprep.mubr.f32.mxu0 %v8547_v3 }
 0x297   :  { %6610 = vmatmul.mubr.msk.f32.gmra.mrb[58].mxu0 %vm201_vm1, %v589_v7 }
 0x298   :  { %2224 = vmatprep.mubr.f32.mxu0 %v8547_v3 }
 0x29b   :  { %6611 = vmatmul.mubr.msk.f32.gmra.mrb[60].mxu0 %vm201_vm1, %v588_v35 }
 0x29c   :  { %2230 = vmatprep.mubr.f32.mxu0 %v8547_v3 }
 0x29f   :  { %6612 = vmatmul.mubr.msk.f32.gmra.mrb[62].mxu0 %vm201_vm1, %v619_v13 }
 0x2a0   :  { %4953 = vmatprep.mubr.f32.mxu0 %v8547_v3 }
 0x2f6   :  { %v2046_v17 = vpop.f32.mrb[0].mxu0 }
 0x2f7   :  { %v2048_v54 = vpop.f32.mrb[1].mxu0  ;;  %v2377_v55 = vadd.f32 %v10045_v51, %v2046_v17 }
 0x2f8   :  { %v2378_v19 = vadd.f32 %v10049_v15, %v2048_v54 }
 0x2f9   :  { %v2441_v43 = vmax.f32 %v2377_v55, 0.0 }
 0x2fa   :  { %v2052_v58 = vpop.f32.mrb[2].mxu0  ;;  %v2442_v23 = vmax.f32 %v2378_v19, 0.0 }
 0x2fb   :  { %v2379_v20 = vadd.f32 %v10045_v51, %v2052_v58  ;;  %v2054_v61 = vpop.f32.mrb[3].mxu0 }
 0x2fc   :  { %v2380_v21 = vadd.f32 %v10049_v15, %v2054_v61 }
 0x2fd   :  { %v2443_v5 = vmax.f32 %v2379_v20, 0.0 }
 0x2fe   :  { %v2444_v8 = vmax.f32 %v2380_v21, 0.0  ;;  %v2058_v24 = vpop.f32.mrb[4].mxu0 }
 0x2ff   :  { %v2060_v26 = vpop.f32.mrb[5].mxu0  ;;  %v10058_v12 = vpack.c.bf16 %v2443_v5, %v2441_v43  ;;  %v2381_v28 = vadd.f32 %v10045_v51, %v2058_v24 }
 0x300   :  { %v10060_v63 = vpack.c.bf16 %v2444_v8, %v2442_v23  ;;  %v2382_v30 = vadd.f32 %v10049_v15, %v2060_v26 }
 0x301   :  { %v2445_v47 = vmax.f32 %v2381_v28, 0.0 }
 0x302   :  { %v2064_v31 = vpop.f32.mrb[6].mxu0  ;;  %7505 = vmatprep.subr.bf16.mxu1 %v10060_v63  ;;  %v2446_v49 = vmax.f32 %v2382_v30, 0.0 }
 0x303   :  { %v2383_v33 = vadd.f32 %v10045_v51, %v2064_v31  ;;  %v2066_v41 = vpop.f32.mrb[7].mxu0  ;;  %7507 = vmatpush1.bf16.msra.mxu1 %v10058_v12 }
 0x304   :  { %v2384_v42 = vadd.f32 %v10049_v15, %v2066_v41 }
 0x305   :  { %v2447_v9 = vmax.f32 %v2383_v33, 0.0 }
 0x306   :  { %v2448_v16 = vmax.f32 %v2384_v42, 0.0  ;;  %v2070_v38 = vpop.f32.mrb[8].mxu0 }
 0x307   :  { %v10068_v52 = vpack.c.bf16 %v2447_v9, %v2445_v47  ;;  %v2072_v53 = vpop.f32.mrb[9].mxu0  ;;  %v2385_v59 = vadd.f32 %v10045_v51, %v2070_v38 }
 0x308   :  { %v10070_v57 = vpack.c.bf16 %v2448_v16, %v2446_v49  ;;  %v2386_v18 = vadd.f32 %v10049_v15, %v2072_v53 }
 0x309   :  { %v2449_v45 = vmax.f32 %v2385_v59, 0.0 }
 0x30a   :  { %v2076_v62 = vpop.f32.mrb[10].mxu0  ;;  %7509 = vmatprep.subr.bf16.mxu1 %v10070_v57  ;;  %v2450_v10 = vmax.f32 %v2386_v18, 0.0 }
 0x30b   :  { %v2387_v0 = vadd.f32 %v10045_v51, %v2076_v62  ;;  %v2078_v4 = vpop.f32.mrb[11].mxu0  ;;  %7511 = vmatpush1.bf16.msra.mxu1 %v10068_v52 }
 0x30c   :  { %v2388_v27 = vadd.f32 %v10049_v15, %v2078_v4 }
 0x30d   :  { %v2451_v6 = vmax.f32 %v2387_v0, 0.0 }
 0x30e   :  { %v2452_v34 = vmax.f32 %v2388_v27, 0.0  ;;  %v2082_v11 = vpop.f32.mrb[12].mxu0 }
 0x30f   :  { %v10078_v22 = vpack.c.bf16 %v2451_v6, %v2449_v45  ;;  %v2084_v25 = vpop.f32.mrb[13].mxu0  ;;  %v2389_v32 = vadd.f32 %v10045_v51, %v2082_v11 }
 0x310   :  { %v10080_v29 = vpack.c.bf16 %v2452_v34, %v2450_v10  ;;  %v2390_v36 = vadd.f32 %v10049_v15, %v2084_v25 }
 0x311   :  { %v2453_v2 = vmax.f32 %v2389_v32, 0.0 }
 0x312   :  { %v2088_v46 = vpop.f32.mrb[14].mxu0  ;;  %7513 = vmatprep.subr.bf16.mxu1 %v10080_v29  ;;  %v2454_v40 = vmax.f32 %v2390_v36, 0.0 }
 0x313   :  { %v2391_v50 = vadd.f32 %v10045_v51, %v2088_v46  ;;  %v2090_v56 = vpop.f32.mrb[15].mxu0  ;;  %7515 = vmatpush1.bf16.msra.mxu1 %v10078_v22 }
 0x314   :  { %v2392_v60 = vadd.f32 %v10049_v15, %v2090_v56 }
 0x315   :  { %v2455_v7 = vmax.f32 %v2391_v50, 0.0 }
 0x316   :  { %v2456_v37 = vmax.f32 %v2392_v60, 0.0  ;;  %v2094_v35 = vpop.f32.mrb[16].mxu0 }
 0x317   :  { %v10088_v13 = vpack.c.bf16 %v2455_v7, %v2453_v2  ;;  %v2096_v14 = vpop.f32.mrb[17].mxu0  ;;  %v2393_v54 = vadd.f32 %v10045_v51, %v2094_v35 }
 0x318   :  { %v10090_v17 = vpack.c.bf16 %v2456_v37, %v2454_v40  ;;  %v2394_v55 = vadd.f32 %v10049_v15, %v2096_v14 }
 0x319   :  { %v2457_v21 = vmax.f32 %v2393_v54, 0.0 }
 0x31a   :  { %v2100_v19 = vpop.f32.mrb[18].mxu0  ;;  %7517 = vmatprep.subr.bf16.mxu1 %v10090_v17  ;;  %v2458_v43 = vmax.f32 %v2394_v55, 0.0 }
 0x31b   :  { %v2395_v58 = vadd.f32 %v10045_v51, %v2100_v19  ;;  %v2102_v20 = vpop.f32.mrb[19].mxu0  ;;  %7519 = vmatpush1.bf16.msra.mxu1 %v10088_v13 }
 0x31c   :  { %v2396_v61 = vadd.f32 %v10049_v15, %v2102_v20 }
 0x31d   :  { %v2459_v1 = vmax.f32 %v2395_v58, 0.0 }
 0x31e   :  { %v2460_v5 = vmax.f32 %v2396_v61, 0.0  ;;  %v2106_v23 = vpop.f32.mrb[20].mxu0 }
 0x31f   :  { %v10098_v8 = vpack.c.bf16 %v2459_v1, %v2457_v21  ;;  %v2108_v24 = vpop.f32.mrb[21].mxu0  ;;  %v2397_v28 = vadd.f32 %v10045_v51, %v2106_v23 }
 0x320   :  { %v10100_v26 = vpack.c.bf16 %v2460_v5, %v2458_v43  ;;  %v2398_v30 = vadd.f32 %v10049_v15, %v2108_v24 }
 0x321   :  { %v2461_v47 = vmax.f32 %v2397_v28, 0.0 }
 0x322   :  { %v2112_v31 = vpop.f32.mrb[22].mxu0  ;;  %7521 = vmatprep.subr.bf16.mxu1 %v10100_v26  ;;  %v2462_v49 = vmax.f32 %v2398_v30, 0.0 }
 0x323   :  { %v2399_v33 = vadd.f32 %v10045_v51, %v2112_v31  ;;  %v2114_v41 = vpop.f32.mrb[23].mxu0  ;;  %7523 = vmatpush1.bf16.msra.mxu1 %v10098_v8 }
 0x324   :  { %v2400_v42 = vadd.f32 %v10049_v15, %v2114_v41 }
 0x325   :  { %v2463_v9 = vmax.f32 %v2399_v33, 0.0 }
 0x326   :  { %v2464_v16 = vmax.f32 %v2400_v42, 0.0  ;;  %v2118_v38 = vpop.f32.mrb[24].mxu0 }
 0x327   :  { %v10108_v53 = vpack.c.bf16 %v2463_v9, %v2461_v47  ;;  %v2120_v59 = vpop.f32.mrb[25].mxu0  ;;  %v2401_v62 = vadd.f32 %v10045_v51, %v2118_v38 }
 0x328   :  { %v10110_v18 = vpack.c.bf16 %v2464_v16, %v2462_v49  ;;  %v2402_v0 = vadd.f32 %v10049_v15, %v2120_v59 }
 0x329   :  { %v2465_v10 = vmax.f32 %v2401_v62, 0.0 }
 0x32a   :  { %v2124_v4 = vpop.f32.mrb[26].mxu0  ;;  %7525 = vmatprep.subr.bf16.mxu1 %v10110_v18  ;;  %v2466_v11 = vmax.f32 %v2402_v0, 0.0 }
 0x32b   :  { %v2403_v27 = vadd.f32 %v10045_v51, %v2124_v4  ;;  %v2126_v45 = vpop.f32.mrb[27].mxu0  ;;  %7527 = vmatpush1.bf16.msra.mxu1 %v10108_v53 }
 0x32c   :  { %v2404_v6 = vadd.f32 %v10049_v15, %v2126_v45 }
 0x32d   :  { %v2467_v34 = vmax.f32 %v2403_v27, 0.0 }
 0x32e   :  { %v2468_v25 = vmax.f32 %v2404_v6, 0.0  ;;  %v2130_v32 = vpop.f32.mrb[28].mxu0 }
 0x32f   :  { %v10118_v36 = vpack.c.bf16 %v2467_v34, %v2465_v10  ;;  %v2132_v46 = vpop.f32.mrb[29].mxu0  ;;  %v2405_v56 = vadd.f32 %v10045_v51, %v2130_v32 }
 0x330   :  { %v10120_v50 = vpack.c.bf16 %v2468_v25, %v2466_v11  ;;  %v2406_v60 = vadd.f32 %v10049_v15, %v2132_v46 }
 0x331   :  { %v2469_v35 = vmax.f32 %v2405_v56, 0.0 }
 0x332   :  { %v2136_v2 = vpop.f32.mrb[30].mxu0  ;;  %7529 = vmatprep.subr.bf16.mxu1 %v10120_v50  ;;  %v2470_v54 = vmax.f32 %v2406_v60, 0.0 }
 0x333   :  { %v2407_v7 = vadd.f32 %v10045_v51, %v2136_v2  ;;  %v2138_v40 = vpop.f32.mrb[31].mxu0  ;;  %7531 = vmatpush1.bf16.msra.mxu1 %v10118_v36 }
 0x334   :  { %v2408_v37 = vadd.f32 %v10049_v15, %v2138_v40 }
 0x335   :  { %v2471_v14 = vmax.f32 %v2407_v7, 0.0 }
 0x336   :  { %v2472_v55 = vmax.f32 %v2408_v37, 0.0  ;;  %v2142_v19 = vpop.f32.mrb[32].mxu0 }
 0x337   :  { %v10128_v58 = vpack.c.bf16 %v2471_v14, %v2469_v35  ;;  %v2144_v20 = vpop.f32.mrb[33].mxu0  ;;  %v2409_v21 = vadd.f32 %v10045_v51, %v2142_v19 }
 0x338   :  { %v10130_v61 = vpack.c.bf16 %v2472_v55, %v2470_v54  ;;  %v2410_v1 = vadd.f32 %v10049_v15, %v2144_v20 }
 0x339   :  { %v2473_v28 = vmax.f32 %v2409_v21, 0.0 }
 0x33a   :  { %v2148_v43 = vpop.f32.mrb[34].mxu0  ;;  %7533 = vmatprep.subr.bf16.mxu1 %v10130_v61  ;;  %v2474_v31 = vmax.f32 %v2410_v1, 0.0 }
 0x33b   :  { %v2411_v5 = vadd.f32 %v10045_v51, %v2148_v43  ;;  %v2150_v23 = vpop.f32.mrb[35].mxu0  ;;  %7535 = vmatpush1.bf16.msra.mxu1 %v10128_v58 }
 0x33c   :  { %v2412_v24 = vadd.f32 %v10049_v15, %v2150_v23 }
 0x33d   :  { %v2475_v30 = vmax.f32 %v2411_v5, 0.0 }
 0x33e   :  { %v2476_v33 = vmax.f32 %v2412_v24, 0.0  ;;  %v2154_v41 = vpop.f32.mrb[36].mxu0 }
 0x33f   :  { %v10138_v42 = vpack.c.bf16 %v2475_v30, %v2473_v28  ;;  %v2156_v47 = vpop.f32.mrb[37].mxu0  ;;  %v2413_v49 = vadd.f32 %v10045_v51, %v2154_v41 }
 0x340   :  { %v10140_v9 = vpack.c.bf16 %v2476_v33, %v2474_v31  ;;  %v2414_v16 = vadd.f32 %v10049_v15, %v2156_v47 }
 0x341   :  { %v2477_v4 = vmax.f32 %v2413_v49, 0.0 }
 0x342   :  { %v2160_v38 = vpop.f32.mrb[38].mxu0  ;;  %7537 = vmatprep.subr.bf16.mxu1 %v10140_v9  ;;  %v2478_v45 = vmax.f32 %v2414_v16, 0.0 }
 0x343   :  { %v2415_v59 = vadd.f32 %v10045_v51, %v2160_v38  ;;  %v2162_v62 = vpop.f32.mrb[39].mxu0  ;;  %7539 = vmatpush1.bf16.msra.mxu1 %v10138_v42 }
 0x344   :  { %v2416_v0 = vadd.f32 %v10049_v15, %v2162_v62 }
 0x345   :  { %v2479_v27 = vmax.f32 %v2415_v59, 0.0 }
 0x346   :  { %v2480_v6 = vmax.f32 %v2416_v0, 0.0  ;;  %v2166_v10 = vpop.f32.mrb[40].mxu0 }
 0x347   :  { %v10148_v34 = vpack.c.bf16 %v2479_v27, %v2477_v4  ;;  %v2168_v11 = vpop.f32.mrb[41].mxu0  ;;  %v2417_v32 = vadd.f32 %v10045_v51, %v2166_v10 }
 0x348   :  { %v10150_v25 = vpack.c.bf16 %v2480_v6, %v2478_v45  ;;  %v2418_v46 = vadd.f32 %v10049_v15, %v2168_v11 }
 0x349   :  { %v2481_v40 = vmax.f32 %v2417_v32, 0.0 }
 0x34a   :  { %v2172_v56 = vpop.f32.mrb[42].mxu0  ;;  %7541 = vmatprep.subr.bf16.mxu1 %v10150_v25  ;;  %v2482_v35 = vmax.f32 %v2418_v46, 0.0 }
 0x34b   :  { %v2419_v60 = vadd.f32 %v10045_v51, %v2172_v56  ;;  %v2174_v2 = vpop.f32.mrb[43].mxu0  ;;  %7543 = vmatpush1.bf16.msra.mxu1 %v10148_v34 }
 0x34c   :  { %v2420_v7 = vadd.f32 %v10049_v15, %v2174_v2 }
 0x34d   :  { %v2483_v37 = vmax.f32 %v2419_v60, 0.0 }
 0x34e   :  { %v2484_v14 = vmax.f32 %v2420_v7, 0.0  ;;  %v2178_v54 = vpop.f32.mrb[44].mxu0 }
 0x34f   :  { %v10158_v55 = vpack.c.bf16 %v2483_v37, %v2481_v40  ;;  %v2180_v19 = vpop.f32.mrb[45].mxu0  ;;  %v2421_v21 = vadd.f32 %v10045_v51, %v2178_v54 }
 0x350   :  { %v10160_v20 = vpack.c.bf16 %v2484_v14, %v2482_v35  ;;  %v2422_v1 = vadd.f32 %v10049_v15, %v2180_v19 }
 0x351   :  { %v2485_v28 = vmax.f32 %v2421_v21, 0.0 }
 0x352   :  { %v2184_v43 = vpop.f32.mrb[46].mxu0  ;;  %7545 = vmatprep.subr.bf16.mxu1 %v10160_v20  ;;  %v2486_v31 = vmax.f32 %v2422_v1, 0.0 }
 0x353   :  { %v2423_v5 = vadd.f32 %v10045_v51, %v2184_v43  ;;  %v2186_v23 = vpop.f32.mrb[47].mxu0  ;;  %7547 = vmatpush1.bf16.msra.mxu1 %v10158_v55 }
 0x354   :  { %v2424_v24 = vadd.f32 %v10049_v15, %v2186_v23 }
 0x355   :  { %v2487_v30 = vmax.f32 %v2423_v5, 0.0 }
 0x356   :  { %v2488_v33 = vmax.f32 %v2424_v24, 0.0  ;;  %v2190_v41 = vpop.f32.mrb[48].mxu0 }
 0x357   :  { %v10168_v47 = vpack.c.bf16 %v2487_v30, %v2485_v28  ;;  %v2192_v49 = vpop.f32.mrb[49].mxu0  ;;  %v2425_v38 = vadd.f32 %v10045_v51, %v2190_v41 }
 0x358   :  { %v10170_v16 = vpack.c.bf16 %v2488_v33, %v2486_v31  ;;  %v2426_v59 = vadd.f32 %v10049_v15, %v2192_v49 }
 0x359   :  { %v2489_v45 = vmax.f32 %v2425_v38, 0.0 }
 0x35a   :  { %v2196_v62 = vpop.f32.mrb[50].mxu0  ;;  %7549 = vmatprep.subr.bf16.mxu1 %v10170_v16  ;;  %v2490_v10 = vmax.f32 %v2426_v59, 0.0 }
 0x35b   :  { %v2427_v0 = vadd.f32 %v10045_v51, %v2196_v62  ;;  %v2198_v4 = vpop.f32.mrb[51].mxu0  ;;  %7551 = vmatpush1.bf16.msra.mxu1 %v10168_v47 }
 0x35c   :  { %v2428_v27 = vadd.f32 %v10049_v15, %v2198_v4 }
 0x35d   :  { %v2491_v6 = vmax.f32 %v2427_v0, 0.0 }
 0x35e   :  { %v2492_v11 = vmax.f32 %v2428_v27, 0.0  ;;  %v2202_v32 = vpop.f32.mrb[52].mxu0 }
 0x35f   :  { %v10178_v46 = vpack.c.bf16 %v2491_v6, %v2489_v45  ;;  %v2204_v56 = vpop.f32.mrb[53].mxu0  ;;  %v2429_v2 = vadd.f32 %v10045_v51, %v2202_v32 }
 0x360   :  { %v10180_v60 = vpack.c.bf16 %v2492_v11, %v2490_v10  ;;  %v2430_v7 = vadd.f32 %v10049_v15, %v2204_v56 }
 0x361   :  { %v2493_v54 = vmax.f32 %v2429_v2, 0.0 }
 0x362   :  { %v2208_v40 = vpop.f32.mrb[54].mxu0  ;;  %7553 = vmatprep.subr.bf16.mxu1 %v10180_v60  ;;  %v2494_v21 = vmax.f32 %v2430_v7, 0.0 }
 0x363   :  { %v2431_v37 = vadd.f32 %v10045_v51, %v2208_v40  ;;  %v2210_v35 = vpop.f32.mrb[55].mxu0  ;;  %7555 = vmatpush1.bf16.msra.mxu1 %v10178_v46 }
 0x364   :  { %v2432_v14 = vadd.f32 %v10049_v15, %v2210_v35 }
 0x365   :  { %v2495_v19 = vmax.f32 %v2431_v37, 0.0 }
 0x366   :  { %v2496_v1 = vmax.f32 %v2432_v14, 0.0  ;;  %v2214_v43 = vpop.f32.mrb[56].mxu0 }
 0x367   :  { %v10188_v5 = vpack.c.bf16 %v2495_v19, %v2493_v54  ;;  %v2216_v23 = vpop.f32.mrb[57].mxu0  ;;  %v2433_v28 = vadd.f32 %v10045_v51, %v2214_v43  ;;  %v2535_v43 = vld [vmem:[%s12319_s3 + $0xf0] sm:$0xff] }
 0x368   :  { %v10190_v24 = vpack.c.bf16 %v2496_v1, %v2494_v21  ;;  %v2434_v30 = vadd.f32 %v10049_v15, %v2216_v23  ;;  %v2507_v21 = vld [vmem:[%s12319_s3 + $0x10] sm:$0xff]  ;;  %v2510_v1 = vld [vmem:[%s12319_s3 + $0x28] sm:$0xff]  ;;  %v6613_v23 = vld [vmem:[%s12319_s3 + $0x100] sm:$0xff] }
 0x369   :  { %v2497_v38 = vmax.f32 %v2433_v28, 0.0  ;;  %v6615_v28 = vld [vmem:[%s12319_s3 + $0x110] sm:$0xff] }
 0x36a   :  { %v2220_v31 = vpop.f32.mrb[58].mxu0  ;;  %7557 = vmatprep.subr.bf16.mxu1 %v10190_v24  ;;  %v2498_v62 = vmax.f32 %v2434_v30, 0.0  ;;  %v6618_v30 = vld [vmem:[%s12319_s3 + $0x128] sm:$0xff] }
 0x36b   :  { %v2435_v33 = vadd.f32 %v10045_v51, %v2220_v31  ;;  %v2222_v41 = vpop.f32.mrb[59].mxu0  ;;  %7559 = vmatpush1.bf16.msra.mxu1 %v10188_v5  ;;  %v6617_v31 = vld [vmem:[%s12319_s3 + $0x120] sm:$0xff] }
 0x36c   :  { %v2436_v49 = vadd.f32 %v10049_v15, %v2222_v41  ;;  %v6619_v41 = vld [vmem:[%s12319_s3 + $0x130] sm:$0xff] }
 0x36d   :  { %v2499_v59 = vmax.f32 %v2435_v33, 0.0  ;;  %v6620_v33 = vld [vmem:[%s12319_s3 + $0x138] sm:$0xff] }
 0x36e   :  { %v2500_v0 = vmax.f32 %v2436_v49, 0.0  ;;  %v2226_v4 = vpop.f32.mrb[60].mxu0  ;;  %v6622_v49 = vld [vmem:[%s12319_s3 + $0x148] sm:$0xff] }
 0x36f   :  { %v10198_v27 = vpack.c.bf16 %v2499_v59, %v2497_v38  ;;  %v2228_v45 = vpop.f32.mrb[61].mxu0  ;;  %v2437_v10 = vadd.f32 %v10045_v51, %v2226_v4  ;;  %v6621_v38 = vld [vmem:[%s12319_s3 + $0x140] sm:$0xff]  ;;  %v6624_v59 = vld [vmem:[%s12319_s3 + $0x158] sm:$0xff] }
 0x370   :  { %v10200_v6 = vpack.c.bf16 %v2500_v0, %v2498_v62  ;;  %v2438_v11 = vadd.f32 %v10049_v15, %v2228_v45  ;;  %v6623_v62 = vld [vmem:[%s12319_s3 + $0x150] sm:$0xff]  ;;  %v6626_v0 = vld [vmem:[%s12319_s3 + $0x168] sm:$0xff]  ;;  %v6625_v4 = vld [vmem:[%s12319_s3 + $0x160] sm:$0xff] }
 0x371   :  { %v2501_v40 = vmax.f32 %v2437_v10, 0.0  ;;  %v6627_v45 = vld [vmem:[%s12319_s3 + $0x170] sm:$0xff]  ;;  %v6629_v10 = vld [vmem:[%s12319_s3 + $0x180] sm:$0xff] }
 0x372   :  { %v2232_v32 = vpop.f32.mrb[62].mxu0  ;;  %7561 = vmatprep.subr.bf16.mxu1 %v10200_v6  ;;  %v2502_v35 = vmax.f32 %v2438_v11, 0.0  ;;  %v6632_v11 = vld [vmem:[%s12319_s3 + $0x198] sm:$0xff] }
 0x373   :  { %v2439_v56 = vadd.f32 %v10045_v51, %v2232_v32  ;;  %v2234_v2 = vpop.f32.mrb[63].mxu0  ;;  %7563 = vmatpush1.bf16.msra.mxu1 %v10198_v27  ;;  %v2505_v51 = vld [vmem:[%s12319_s3] sm:$0xff]  ;;  %v6631_v32 = vld [vmem:[%s12319_s3 + $0x190] sm:$0xff] }
 0x374   :  { %v2440_v7 = vadd.f32 %v10049_v15, %v2234_v2  ;;  %v2508_v15 = vld [vmem:[%s12319_s3 + $0x18] sm:$0xff]  ;;  %v6633_v2 = vld [vmem:[%s12319_s3 + $0x1a0] sm:$0xff] }
 0x375   :  { %v2503_v37 = vmax.f32 %v2439_v56, 0.0  ;;  %v6634_v56 = vld [vmem:[%s12319_s3 + $0x1a8] sm:$0xff] }
 0x376   :  { %v2504_v14 = vmax.f32 %v2440_v7, 0.0  ;;  %v6636_v7 = vld [vmem:[%s12319_s3 + $0x1b8] sm:$0xff] }
 0x377   :  { %v10208_v54 = vpack.c.bf16 %v2503_v37, %v2501_v40  ;;  %v6635_v40 = vld [vmem:[%s12319_s3 + $0x1b0] sm:$0xff]  ;;  %v6638_v37 = vld [vmem:[%s12319_s3 + $0x1c8] sm:$0xff] }
 0x378   :  { %v10210_v19 = vpack.c.bf16 %v2504_v14, %v2502_v35  ;;  %v2924_v35 = vld [vmem:[%s12320_s4] sm:$0xff]  ;;  %v2925_v14 = vld [vmem:[%s12320_s4 + $0x8] sm:$0xff] }
 0x37a   :  { %7565 = vmatprep.subr.bf16.mxu1 %v10210_v19 }
 0x37b   :  { %7567 = vmatpush1.bf16.msra.mxu1 %v10208_v54 }
 0x37c   :  { %7569 = vmatprep.subr.bf16.mxu1 %v10060_v63  ;;  %v2509_v63 = vld [vmem:[%s12319_s3 + $0x20] sm:$0xff] }
 0x37e   :  { %2602 = vmatmul.mubr.f32.vlgmr.msra.gmra.mrb[0].mxu1 %v2505_v51  ;;  %v7633_v51 = vpack.c.bf16 %v2925_v14, %v2924_v35 }
 0x37f   :  { %7571 = vmatpush1.bf16.msra.mxu1 %v10058_v12  ;;  %2607 = vmatprep.mubr.f32.mxu1 %v2508_v15  ;;  %v2512_v12 = vld [vmem:[%s12319_s3 + $0x38] sm:$0xff] }
 0x380   :  { %7573 = vmatprep.subr.bf16.mxu1 %v10070_v57  ;;  %v2511_v57 = vld [vmem:[%s12319_s3 + $0x30] sm:$0xff]  ;;  %v6640_v15 = vld [vmem:[%s12319_s3 + $0x1d8] sm:$0xff] }
 0x382   :  { %2608 = vmatmul.mubr.f32.gmra.mrb[2].mxu1 %v2507_v21  ;;  %v2926_v21 = vld [vmem:[%s12320_s4 + $0x10] sm:$0xff] }
 0x383   :  { %7575 = vmatpush1.bf16.msra.mxu1 %v10068_v52  ;;  %2613 = vmatprep.mubr.f32.mxu1 %v2510_v1  ;;  %v2514_v52 = vld [vmem:[%s12319_s3 + $0x48] sm:$0xff]  ;;  %v2927_v1 = vld [vmem:[%s12320_s4 + $0x18] sm:$0xff] }
 0x384   :  { %7577 = vmatprep.subr.bf16.mxu1 %v10080_v29  ;;  %v2513_v29 = vld [vmem:[%s12319_s3 + $0x40] sm:$0xff] }
 0x386   :  { %2614 = vmatmul.mubr.f32.gmra.mrb[4].mxu1 %v2509_v63  ;;  %v6639_v63 = vld [vmem:[%s12319_s3 + $0x1d0] sm:$0xff] }
 0x387   :  { %7579 = vmatpush1.bf16.msra.mxu1 %v10078_v22  ;;  %2619 = vmatprep.mubr.f32.mxu1 %v2512_v12  ;;  %v2516_v22 = vld [vmem:[%s12319_s3 + $0x58] sm:$0xff]  ;;  %v7636_v12 = vpack.c.bf16 %v2927_v1, %v2926_v21 }
 0x388   :  { %7581 = vmatprep.subr.bf16.mxu1 %v10090_v17  ;;  %v2515_v17 = vld [vmem:[%s12319_s3 + $0x50] sm:$0xff] }
 0x38a   :  { %2620 = vmatmul.mubr.f32.gmra.mrb[6].mxu1 %v2511_v57  ;;  %v6642_v57 = vld [vmem:[%s12319_s3 + $0x1e8] sm:$0xff] }
 0x38b   :  { %7583 = vmatpush1.bf16.msra.mxu1 %v10088_v13  ;;  %2625 = vmatprep.mubr.f32.mxu1 %v2514_v52  ;;  %v2518_v13 = vld [vmem:[%s12319_s3 + $0x68] sm:$0xff]  ;;  %v2928_v52 = vld [vmem:[%s12320_s4 + $0x20] sm:$0xff] }
 0x38c   :  { %7585 = vmatprep.subr.bf16.mxu1 %v10100_v26  ;;  %v2517_v26 = vld [vmem:[%s12319_s3 + $0x60] sm:$0xff] }
 0x38e   :  { %2626 = vmatmul.mubr.f32.gmra.mrb[8].mxu1 %v2513_v29  ;;  %v2929_v29 = vld [vmem:[%s12320_s4 + $0x28] sm:$0xff] }
 0x38f   :  { %7587 = vmatpush1.bf16.msra.mxu1 %v10098_v8  ;;  %2631 = vmatprep.mubr.f32.mxu1 %v2516_v22  ;;  %v2520_v8 = vld [vmem:[%s12319_s3 + $0x78] sm:$0xff]  ;;  %v6641_v22 = vld [vmem:[%s12319_s3 + $0x1e0] sm:$0xff] }
 0x390   :  { %7589 = vmatprep.subr.bf16.mxu1 %v10110_v18  ;;  %v2519_v18 = vld [vmem:[%s12319_s3 + $0x70] sm:$0xff] }
 0x392   :  { %2632 = vmatmul.mubr.f32.gmra.mrb[10].mxu1 %v2515_v17  ;;  %v7639_v17 = vpack.c.bf16 %v2929_v29, %v2928_v52  ;;  %v6661_v29 = vld [vmem:[%s12320_s4 + $0xa8] sm:$0xff] }
 0x393   :  { %7591 = vmatpush1.bf16.msra.mxu1 %v10108_v53  ;;  %2637 = vmatprep.mubr.f32.mxu1 %v2518_v13  ;;  %v2522_v53 = vld [vmem:[%s12319_s3 + $0x88] sm:$0xff]  ;;  %v6644_v13 = vld [vmem:[%s12319_s3 + $0x1f8] sm:$0xff] }
 0x394   :  { %7593 = vmatprep.subr.bf16.mxu1 %v10120_v50  ;;  %v2521_v50 = vld [vmem:[%s12319_s3 + $0x80] sm:$0xff] }
 0x396   :  { %2638 = vmatmul.mubr.f32.gmra.mrb[12].mxu1 %v2517_v26  ;;  %v2930_v26 = vld [vmem:[%s12320_s4 + $0x30] sm:$0xff] }
 0x397   :  { %7595 = vmatpush1.bf16.msra.mxu1 %v10118_v36  ;;  %2643 = vmatprep.mubr.f32.mxu1 %v2520_v8  ;;  %v2524_v36 = vld [vmem:[%s12319_s3 + $0x98] sm:$0xff] }
 0x398   :  { %7597 = vmatprep.subr.bf16.mxu1 %v10130_v61  ;;  %v2523_v61 = vld [vmem:[%s12319_s3 + $0x90] sm:$0xff]  ;;  %v2931_v8 = vld [vmem:[%s12320_s4 + $0x38] sm:$0xff] }
 0x39a   :  { %2644 = vmatmul.mubr.f32.gmra.mrb[14].mxu1 %v2519_v18  ;;  %v6643_v18 = vld [vmem:[%s12319_s3 + $0x1f0] sm:$0xff] }
 0x39b   :  { %7599 = vmatpush1.bf16.msra.mxu1 %v10128_v58  ;;  %2649 = vmatprep.mubr.f32.mxu1 %v2522_v53  ;;  %v2526_v58 = vld [vmem:[%s12319_s3 + $0xa8] sm:$0xff]  ;;  %v7642_v53 = vpack.c.bf16 %v2931_v8, %v2930_v26 }
 0x39c   :  { %7601 = vmatprep.subr.bf16.mxu1 %v10140_v9  ;;  %v2525_v9 = vld [vmem:[%s12319_s3 + $0xa0] sm:$0xff] }
 0x39e   :  { %2650 = vmatmul.mubr.f32.gmra.mrb[16].mxu1 %v2521_v50  ;;  %v2932_v50 = vld [vmem:[%s12320_s4 + $0x40] sm:$0xff] }
 0x39f   :  { %7603 = vmatpush1.bf16.msra.mxu1 %v10138_v42  ;;  %2655 = vmatprep.mubr.f32.mxu1 %v2524_v36  ;;  %v2528_v42 = vld [vmem:[%s12319_s3 + $0xb8] sm:$0xff]  ;;  %v2933_v36 = vld [vmem:[%s12320_s4 + $0x48] sm:$0xff] }
 0x3a0   :  { %7605 = vmatprep.subr.bf16.mxu1 %v10150_v25  ;;  %v2527_v25 = vld [vmem:[%s12319_s3 + $0xb0] sm:$0xff] }
 0x3a2   :  { %2656 = vmatmul.mubr.f32.gmra.mrb[18].mxu1 %v2523_v61  ;;  %v7645_v61 = vpack.c.bf16 %v2933_v36, %v2932_v50  ;;  %v6664_v50 = vld [vmem:[%s12320_s4 + $0xc0] sm:$0xff] }
 0x3a3   :  { %7607 = vmatpush1.bf16.msra.mxu1 %v10148_v34  ;;  %2661 = vmatprep.mubr.f32.mxu1 %v2526_v58  ;;  %v2530_v34 = vld [vmem:[%s12319_s3 + $0xc8] sm:$0xff]  ;;  %v2934_v58 = vld [vmem:[%s12320_s4 + $0x50] sm:$0xff] }
 0x3a4   :  { %7609 = vmatprep.subr.bf16.mxu1 %v10160_v20  ;;  %v2529_v20 = vld [vmem:[%s12319_s3 + $0xc0] sm:$0xff] }
 0x3a6   :  { %2662 = vmatmul.mubr.f32.gmra.mrb[20].mxu1 %v2525_v9  ;;  %v2935_v9 = vld [vmem:[%s12320_s4 + $0x58] sm:$0xff] }
 0x3a7   :  { %7611 = vmatpush1.bf16.msra.mxu1 %v10158_v55  ;;  %2667 = vmatprep.mubr.f32.mxu1 %v2528_v42  ;;  %v2532_v55 = vld [vmem:[%s12319_s3 + $0xd8] sm:$0xff]  ;;  %v7648_v42 = vpack.c.bf16 %v2935_v9, %v2934_v58 }
 0x3a8   :  { %7613 = vmatprep.subr.bf16.mxu1 %v10170_v16  ;;  %v2531_v16 = vld [vmem:[%s12319_s3 + $0xd0] sm:$0xff] }
 0x3aa   :  { %2668 = vmatmul.mubr.f32.gmra.mrb[22].mxu1 %v2527_v25  ;;  %v2936_v25 = vld [vmem:[%s12320_s4 + $0x60] sm:$0xff] }
 0x3ab   :  { %7615 = vmatpush1.bf16.msra.mxu1 %v10168_v47  ;;  %2673 = vmatprep.mubr.f32.mxu1 %v2530_v34  ;;  %v2534_v47 = vld [vmem:[%s12319_s3 + $0xe8] sm:$0xff] }
 0x3ac   :  { %7617 = vmatprep.subr.bf16.mxu1 %v10180_v60  ;;  %v2533_v60 = vld [vmem:[%s12319_s3 + $0xe0] sm:$0xff]  ;;  %v2937_v34 = vld [vmem:[%s12320_s4 + $0x68] sm:$0xff] }
 0x3ae   :  { %2674 = vmatmul.mubr.f32.gmra.mrb[24].mxu1 %v2529_v20  ;;  %v7651_v20 = vpack.c.bf16 %v2937_v34, %v2936_v25  ;;  %v6665_v25 = vld [vmem:[%s12320_s4 + $0xc8] sm:$0xff]  ;;  %v6666_v34 = vld [vmem:[%s12320_s4 + $0xd0] sm:$0xff] }
 0x3af   :  { %7619 = vmatpush1.bf16.msra.mxu1 %v10178_v46  ;;  %2679 = vmatprep.mubr.f32.mxu1 %v2532_v55  ;;  %v2536_v46 = vld [vmem:[%s12319_s3 + $0xf8] sm:$0xff]  ;;  %v2938_v55 = vld [vmem:[%s12320_s4 + $0x70] sm:$0xff] }
 0x3b0   :  { %7621 = vmatprep.subr.bf16.mxu1 %v10190_v24  ;;  %v6616_v24 = vld [vmem:[%s12319_s3 + $0x118] sm:$0xff] }
 0x3b2   :  { %2680 = vmatmul.mubr.f32.gmra.mrb[26].mxu1 %v2531_v16  ;;  %v2939_v16 = vld [vmem:[%s12320_s4 + $0x78] sm:$0xff] }
 0x3b3   :  { %7623 = vmatpush1.bf16.msra.mxu1 %v10188_v5  ;;  %2685 = vmatprep.mubr.f32.mxu1 %v2534_v47  ;;  %v6614_v5 = vld [vmem:[%s12319_s3 + $0x108] sm:$0xff]  ;;  %v7654_v47 = vpack.c.bf16 %v2939_v16, %v2938_v55 }
 0x3b4   :  { %7625 = vmatprep.subr.bf16.mxu1 %v10200_v6  ;;  %v6630_v6 = vld [vmem:[%s12319_s3 + $0x188] sm:$0xff] }
 0x3b6   :  { %2686 = vmatmul.mubr.f32.gmra.mrb[28].mxu1 %v2533_v60  ;;  %v2940_v60 = vld [vmem:[%s12320_s4 + $0x80] sm:$0xff] }
 0x3b7   :  { %7627 = vmatpush1.bf16.msra.mxu1 %v10198_v27  ;;  %2691 = vmatprep.mubr.f32.mxu1 %v2536_v46  ;;  %v6628_v27 = vld [vmem:[%s12319_s3 + $0x178] sm:$0xff]  ;;  %v2941_v46 = vld [vmem:[%s12320_s4 + $0x88] sm:$0xff] }
 0x3b8   :  { %7629 = vmatprep.subr.bf16.mxu1 %v10210_v19  ;;  %v8548_v19 = vmov 0.0|0.0  }
 0x3ba   :  { %2692 = vmatmul.mubr.f32.gmra.mrb[30].mxu1 %v2535_v43  ;;  %v7657_v43 = vpack.c.bf16 %v2941_v46, %v2940_v60  ;;  %v7669_v60 = vpack.c.bf16 %v6666_v34, %v6665_v25  ;;  %v6667_v46 = vld [vmem:[%s12320_s4 + $0xd8] sm:$0xff]  ;;  %v6676_v34 = vld [vmem:[%s12320_s4 + $0x120] sm:$0xff] }
 0x3bb   :  { %7631 = vmatpush1.bf16.msra.mxu1 %v10208_v54  ;;  %2795 = vmatprep.mubr.f32.mxu1 %v6614_v5  ;;  %v6637_v54 = vld [vmem:[%s12319_s3 + $0x1c0] sm:$0xff]  ;;  %v2942_v5 = vld [vmem:[%s12320_s4 + $0x90] sm:$0xff]  ;;  %v6675_v25 = vld [vmem:[%s12320_s4 + $0x118] sm:$0xff] }
 0x3bc   :  { %7632 = vmatprep.subr.bf16.mxu1 %v8548_v19 }
 0x3be   :  { %2796 = vmatmul.mubr.f32.vlgmr.msra.gmra.mrb[32].mxu1 %v6613_v23  ;;  %v2943_v23 = vld [vmem:[%s12320_s4 + $0x98] sm:$0xff] }
 0x3bf   :  { %2801 = vmatprep.mubr.f32.mxu1 %v6616_v24  ;;  %7634 = vmatpush1.bf16.msra.mxu1 %v7633_v51  ;;  %v7660_v24 = vpack.c.bf16 %v2943_v23, %v2942_v5 }
 0x3c0   :  { %7635 = vmatprep.subr.bf16.mxu1 %v8548_v19 }
 0x3c2   :  { %2802 = vmatmul.mubr.f32.gmra.mrb[34].mxu1 %v6615_v28  ;;  %v2944_v28 = vld [vmem:[%s12320_s4 + $0xa0] sm:$0xff] }
 0x3c3   :  { %2807 = vmatprep.mubr.f32.mxu1 %v6618_v30  ;;  %7637 = vmatpush1.bf16.msra.mxu1 %v7636_v12 }
 0x3c4   :  { %7638 = vmatprep.subr.bf16.mxu1 %v8548_v19 }
 0x3c6   :  { %2808 = vmatmul.mubr.f32.gmra.mrb[36].mxu1 %v6617_v31 }
 0x3c7   :  { %2813 = vmatprep.mubr.f32.mxu1 %v6620_v33  ;;  %7640 = vmatpush1.bf16.msra.mxu1 %v7639_v17 }
 0x3c8   :  { %7641 = vmatprep.subr.bf16.mxu1 %v8548_v19 }
 0x3ca   :  { %2814 = vmatmul.mubr.f32.gmra.mrb[38].mxu1 %v6619_v41 }
 0x3cb   :  { %2819 = vmatprep.mubr.f32.mxu1 %v6622_v49  ;;  %7643 = vmatpush1.bf16.msra.mxu1 %v7642_v53  ;;  %v6663_v53 = vld [vmem:[%s12320_s4 + $0xb8] sm:$0xff] }
 0x3cc   :  { %7644 = vmatprep.subr.bf16.mxu1 %v8548_v19 }
 0x3ce   :  { %2820 = vmatmul.mubr.f32.gmra.mrb[40].mxu1 %v6621_v38 }
 0x3cf   :  { %2825 = vmatprep.mubr.f32.mxu1 %v6624_v59  ;;  %7646 = vmatpush1.bf16.msra.mxu1 %v7645_v61 }
 0x3d0   :  { %7647 = vmatprep.subr.bf16.mxu1 %v8548_v19 }
 0x3d2   :  { %2826 = vmatmul.mubr.f32.gmra.mrb[42].mxu1 %v6623_v62 }
 0x3d3   :  { %2831 = vmatprep.mubr.f32.mxu1 %v6626_v0  ;;  %7649 = vmatpush1.bf16.msra.mxu1 %v7648_v42  ;;  %v7666_v42 = vpack.c.bf16 %v6664_v50, %v6663_v53  ;;  %v6673_v53 = vld [vmem:[%s12320_s4 + $0x108] sm:$0xff]  ;;  %v6674_v50 = vld [vmem:[%s12320_s4 + $0x110] sm:$0xff] }
 0x3d4   :  { %7650 = vmatprep.subr.bf16.mxu1 %v8548_v19 }
 0x3d6   :  { %2832 = vmatmul.mubr.f32.gmra.mrb[44].mxu1 %v6625_v4 }
 0x3d7   :  { %2837 = vmatprep.mubr.f32.mxu1 %v6628_v27  ;;  %7652 = vmatpush1.bf16.msra.mxu1 %v7651_v20 }
 0x3d8   :  { %7653 = vmatprep.subr.bf16.mxu1 %v8548_v19 }
 0x3da   :  { %2838 = vmatmul.mubr.f32.gmra.mrb[46].mxu1 %v6627_v45 }
 0x3db   :  { %2843 = vmatprep.mubr.f32.mxu1 %v6630_v6  ;;  %7655 = vmatpush1.bf16.msra.mxu1 %v7654_v47 }
 0x3dc   :  { %7656 = vmatprep.subr.bf16.mxu1 %v8548_v19 }
 0x3de   :  { %2844 = vmatmul.mubr.f32.gmra.mrb[48].mxu1 %v6629_v10 }
 0x3df   :  { %2849 = vmatprep.mubr.f32.mxu1 %v6632_v11  ;;  %7658 = vmatpush1.bf16.msra.mxu1 %v7657_v43  ;;  %v6668_v43 = vld [vmem:[%s12320_s4 + $0xe0] sm:$0xff] }
 0x3e0   :  { %7659 = vmatprep.subr.bf16.mxu1 %v8548_v19 }
 0x3e2   :  { %2850 = vmatmul.mubr.f32.gmra.mrb[50].mxu1 %v6631_v32 }
 0x3e3   :  { %2855 = vmatprep.mubr.f32.mxu1 %v6634_v56  ;;  %7661 = vmatpush1.bf16.msra.mxu1 %v7660_v24 }
 0x3e4   :  { %3034 = vmatprep.subr.mxu1 %v8547_v3 }
 0x3e6   :  { %2856 = vmatmul.mubr.f32.gmra.mrb[52].mxu1 %v6633_v2 }
 0x3e7   :  { %2861 = vmatprep.mubr.f32.mxu1 %v6636_v7  ;;  %3035 = vmatpush1.msra.mxu1 %v2944_v28 }
 0x3e8   :  { %7662 = vmatprep.subr.bf16.mxu1 %v8548_v19 }
 0x3ea   :  { %2862 = vmatmul.mubr.f32.gmra.mrb[54].mxu1 %v6635_v40 }
 0x3eb   :  { %2867 = vmatprep.mubr.f32.mxu1 %v6638_v37 }
 0x3ee   :  { %2868 = vmatmul.mubr.f32.gmra.mrb[56].mxu1 %v6637_v54 }
 0x3ef   :  { %2873 = vmatprep.mubr.f32.mxu1 %v6640_v15 }
 0x3f2   :  { %2874 = vmatmul.mubr.f32.gmra.mrb[58].mxu1 %v6639_v63 }
 0x3f3   :  { %2879 = vmatprep.mubr.f32.mxu1 %v6642_v57 }
 0x3f6   :  { %2880 = vmatmul.mubr.f32.gmra.mrb[60].mxu1 %v6641_v22  ;;  %v6662_v22 = vld [vmem:[%s12320_s4 + $0xb0] sm:$0xff] }
 0x3f7   :  { %2885 = vmatprep.mubr.f32.mxu1 %v6644_v13 }
 0x3fa   :  { %2886 = vmatmul.mubr.f32.gmra.mrb[62].mxu1 %v6643_v18  ;;  %v7663_v18 = vpack.c.bf16 %v6662_v22, %v6661_v29  ;;  %v6671_v29 = vld [vmem:[%s12320_s4 + $0xf8] sm:$0xff]  ;;  %v6672_v22 = vld [vmem:[%s12320_s4 + $0x100] sm:$0xff] }
 0x451   :  { %v2603_v30 = vpop.f32.mrb[0].mxu1 }
 0x452   :  { %v2605_v31 = vpop.f32.mrb[1].mxu1 }
 0x455   :  { %v2609_v33 = vpop.f32.mrb[2].mxu1 }
 0x456   :  { %v2611_v41 = vpop.f32.mrb[3].mxu1 }
 0x459   :  { %v2615_v49 = vpop.f32.mrb[4].mxu1 }
 0x45a   :  { %v2617_v38 = vpop.f32.mrb[5].mxu1 }
 0x45d   :  { %v2621_v59 = vpop.f32.mrb[6].mxu1 }
 0x45e   :  { %v2623_v62 = vpop.f32.mrb[7].mxu1 }
 0x461   :  { %v10510_v0 = vpop.f32.mrb[8].mxu1 }
 0x462   :  { %v10512_v4 = vpop.f32.mrb[9].mxu1 }
 0x465   :  { %v10514_v27 = vpop.f32.mrb[10].mxu1 }
 0x466   :  { %v10516_v45 = vpop.f32.mrb[11].mxu1 }
 0x469   :  { %v10518_v6 = vpop.f32.mrb[12].mxu1 }
 0x46a   :  { %v10520_v10 = vpop.f32.mrb[13].mxu1 }
 0x46d   :  { %v10522_v11 = vpop.f32.mrb[14].mxu1 }
 0x46e   :  { %v10524_v32 = vpop.f32.mrb[15].mxu1 }
 0x471   :  { %v10526_v56 = vpop.f32.mrb[16].mxu1 }
 0x472   :  { %v10528_v2 = vpop.f32.mrb[17].mxu1 }
 0x475   :  { %v10530_v7 = vpop.f32.mrb[18].mxu1 }
 0x476   :  { %v10532_v40 = vpop.f32.mrb[19].mxu1 }
 0x479   :  { %v10534_v37 = vpop.f32.mrb[20].mxu1 }
 0x47a   :  { %v10536_v35 = vpop.f32.mrb[21].mxu1 }
 0x47d   :  { %v10538_v14 = vpop.f32.mrb[22].mxu1 }
 0x47e   :  { %v10540_v54 = vpop.f32.mrb[23].mxu1 }
 0x481   :  { %v10542_v51 = vpop.f32.mrb[24].mxu1 }
 0x482   :  { %v10544_v15 = vpop.f32.mrb[25].mxu1 }
 0x485   :  { %v10546_v21 = vpop.f32.mrb[26].mxu1 }
 0x486   :  { %v10548_v1 = vpop.f32.mrb[27].mxu1 }
 0x489   :  { %v10550_v63 = vpop.f32.mrb[28].mxu1 }
 0x48a   :  { %v10552_v12 = vpop.f32.mrb[29].mxu1 }
 0x48d   :  { %v10554_v57 = vpop.f32.mrb[30].mxu1 }
 0x48e   :  { %v10556_v52 = vpop.f32.mrb[31].mxu1 }
 0x491   :  { %v2797_v17 = vpop.f32.mrb[32].mxu1 }
 0x492   :  { %v10564_v13 = vmax.f32 %v2603_v30, %v2797_v17  ;;  %v2799_v26 = vpop.f32.mrb[33].mxu1  ;;  %v7672_v30 = vpack.c.bf16 %v6668_v43, %v6667_v46  ;;  %v6677_v46 = vld [vmem:[%s12320_s4 + $0x128] sm:$0xff]  ;;  %v6678_v43 = vld [vmem:[%s12320_s4 + $0x130] sm:$0xff] }
 0x493   :  { %v10566_v8 = vmax.f32 %v2605_v31, %v2799_v26  ;;  %v6669_v31 = vld [vmem:[%s12320_s4 + $0xe8] sm:$0xff] }
 0x495   :  { %v2803_v36 = vpop.f32.mrb[34].mxu1  ;;  %6645 = vmatprep.mubr.msk.f32.mxu1 %vm2945_vm5, %v10566_v8 }
 0x496   :  { %v10576_v61 = vmax.f32 %v2609_v33, %v2803_v36  ;;  %v2805_v58 = vpop.f32.mrb[35].mxu1  ;;  %3059 = vmatmul.mubr.f32.vlgmr.msra.gmra.mrb[64].mxu1 %v10564_v13  ;;  %v6670_v33 = vld [vmem:[%s12320_s4 + $0xf0] sm:$0xff] }
 0x497   :  { %v10579_v9 = vmax.f32 %v2611_v41, %v2805_v58  ;;  %7664 = vmatpush1.bf16.msra.mxu1 %v7663_v18  ;;  %v7678_v18 = vpack.c.bf16 %v6672_v22, %v6671_v29 }
 0x498   :  { %7665 = vmatprep.subr.bf16.mxu1 %v8548_v19 }
 0x499   :  { %v2809_v20 = vpop.f32.mrb[36].mxu1  ;;  %6646 = vmatprep.mubr.msk.f32.mxu1 %vm2945_vm5, %v10579_v9 }
 0x49a   :  { %v10590_v55 = vmax.f32 %v2615_v49, %v2809_v20  ;;  %v2811_v16 = vpop.f32.mrb[37].mxu1  ;;  %3064 = vmatmul.mubr.f32.gmra.mrb[66].mxu1 %v10576_v61 }
 0x49b   :  { %v10593_v47 = vmax.f32 %v2617_v38, %v2811_v16  ;;  %7667 = vmatpush1.bf16.msra.mxu1 %v7666_v42  ;;  %v7681_v42 = vpack.c.bf16 %v6674_v50, %v6673_v53 }
 0x49c   :  { %7668 = vmatprep.subr.bf16.mxu1 %v8548_v19 }
 0x49d   :  { %v2815_v5 = vpop.f32.mrb[38].mxu1  ;;  %6647 = vmatprep.mubr.msk.f32.mxu1 %vm2945_vm5, %v10593_v47 }
 0x49e   :  { %v10604_v23 = vmax.f32 %v2621_v59, %v2815_v5  ;;  %v2817_v24 = vpop.f32.mrb[39].mxu1  ;;  %3069 = vmatmul.mubr.f32.gmra.mrb[68].mxu1 %v10590_v55 }
 0x49f   :  { %v10607_v28 = vmax.f32 %v2623_v62, %v2817_v24  ;;  %7670 = vmatpush1.bf16.msra.mxu1 %v7669_v60  ;;  %v7675_v62 = vpack.c.bf16 %v6670_v33, %v6669_v31  ;;  %v7684_v60 = vpack.c.bf16 %v6676_v34, %v6675_v25  ;;  %v6679_v31 = vld [vmem:[%s12320_s4 + $0x138] sm:$0xff]  ;;  %v6680_v33 = vld [vmem:[%s12320_s4 + $0x140] sm:$0xff] }
 0x4a0   :  { %7671 = vmatprep.subr.bf16.mxu1 %v8548_v19 }
 0x4a1   :  { %v2821_v41 = vpop.f32.mrb[40].mxu1  ;;  %6648 = vmatprep.mubr.msk.f32.mxu1 %vm2945_vm5, %v10607_v28 }
 0x4a2   :  { %v10619_v49 = vmax.f32 %v10510_v0, %v2821_v41  ;;  %v2823_v38 = vpop.f32.mrb[41].mxu1  ;;  %3074 = vmatmul.mubr.f32.gmra.mrb[70].mxu1 %v10604_v23 }
 0x4a3   :  { %v10623_v59 = vmax.f32 %v10512_v4, %v2823_v38  ;;  %7673 = vmatpush1.bf16.msra.mxu1 %v7672_v30  ;;  %v7687_v30 = vpack.c.bf16 %v6678_v43, %v6677_v46  ;;  %v6710_v43 = vld [vmem:[%s12321_s5 + $0x120] sm:$0xff] }
 0x4a4   :  { %7674 = vmatprep.subr.bf16.mxu1 %v8548_v19 }
 0x4a5   :  { %v2827_v0 = vpop.f32.mrb[42].mxu1  ;;  %6649 = vmatprep.mubr.msk.f32.mxu1 %vm2945_vm5, %v10623_v59 }
 0x4a6   :  { %v10635_v17 = vmax.f32 %v10514_v27, %v2827_v0  ;;  %v2829_v4 = vpop.f32.mrb[43].mxu1  ;;  %3079 = vmatmul.mubr.f32.gmra.mrb[72].mxu1 %v10619_v49 }
 0x4a7   :  { %v10639_v26 = vmax.f32 %v10516_v45, %v2829_v4  ;;  %7676 = vmatpush1.bf16.msra.mxu1 %v7675_v62  ;;  %v7690_v62 = vpack.c.bf16 %v6680_v33, %v6679_v31  ;;  %v6714_v31 = vld [vmem:[%s12321_s5 + $0x140] sm:$0xff]  ;;  %v6716_v33 = vld [vmem:[%s12321_s5 + $0x150] sm:$0xff] }
 0x4a8   :  { %7677 = vmatprep.subr.bf16.mxu1 %v8548_v19 }
 0x4a9   :  { %v2833_v27 = vpop.f32.mrb[44].mxu1  ;;  %6650 = vmatprep.mubr.msk.f32.mxu1 %vm2945_vm5, %v10639_v26 }
 0x4aa   :  { %v10651_v36 = vmax.f32 %v10518_v6, %v2833_v27  ;;  %v2835_v45 = vpop.f32.mrb[45].mxu1  ;;  %3084 = vmatmul.mubr.f32.gmra.mrb[74].mxu1 %v10635_v17 }
 0x4ab   :  { %v10655_v58 = vmax.f32 %v10520_v10, %v2835_v45  ;;  %7679 = vmatpush1.bf16.msra.mxu1 %v7678_v18 }
 0x4ac   :  { %7680 = vmatprep.subr.bf16.mxu1 %v8548_v19 }
 0x4ad   :  { %v2839_v6 = vpop.f32.mrb[46].mxu1  ;;  %6651 = vmatprep.mubr.msk.f32.mxu1 %vm2945_vm5, %v10655_v58 }
 0x4ae   :  { %v10667_v20 = vmax.f32 %v10522_v11, %v2839_v6  ;;  %v2841_v10 = vpop.f32.mrb[47].mxu1  ;;  %3089 = vmatmul.mubr.f32.gmra.mrb[76].mxu1 %v10651_v36 }
 0x4af   :  { %v10671_v16 = vmax.f32 %v10524_v32, %v2841_v10  ;;  %7682 = vmatpush1.bf16.msra.mxu1 %v7681_v42 }
 0x4b0   :  { %7683 = vmatprep.subr.bf16.mxu1 %v8548_v19 }
 0x4b1   :  { %v2845_v11 = vpop.f32.mrb[48].mxu1  ;;  %6652 = vmatprep.mubr.msk.f32.mxu1 %vm2945_vm5, %v10671_v16 }
 0x4b2   :  { %v10683_v5 = vmax.f32 %v10526_v56, %v2845_v11  ;;  %v2847_v32 = vpop.f32.mrb[49].mxu1  ;;  %3094 = vmatmul.mubr.f32.gmra.mrb[78].mxu1 %v10667_v20  ;;  %v6712_v11 = vld [vmem:[%s12321_s5 + $0x130] sm:$0xff] }
 0x4b3   :  { %v10687_v24 = vmax.f32 %v10528_v2, %v2847_v32  ;;  %7685 = vmatpush1.bf16.msra.mxu1 %v7684_v60  ;;  %v6715_v32 = vld [vmem:[%s12321_s5 + $0x148] sm:$0xff] }
 0x4b4   :  { %7686 = vmatprep.subr.bf16.mxu1 %v8548_v19 }
 0x4b5   :  { %v2851_v56 = vpop.f32.mrb[50].mxu1  ;;  %6653 = vmatprep.mubr.msk.f32.mxu1 %vm2945_vm5, %v10687_v24 }
 0x4b6   :  { %v10699_v41 = vmax.f32 %v10530_v7, %v2851_v56  ;;  %v2853_v2 = vpop.f32.mrb[51].mxu1  ;;  %3099 = vmatmul.mubr.f32.gmra.mrb[80].mxu1 %v10683_v5  ;;  %v7710_v56 = vpack.c.bf16 %v6716_v33, %v6714_v31  ;;  %v6766_v31 = vld [vmem:[%s12321_s5 + $0x260] sm:$0xff]  ;;  %v6768_v33 = vld [vmem:[%s12321_s5 + $0x270] sm:$0xff] }
 0x4b7   :  { %v10703_v38 = vmax.f32 %v10532_v40, %v2853_v2  ;;  %7688 = vmatpush1.bf16.msra.mxu1 %v7687_v30  ;;  %v6681_v40 = vld [vmem:[%s12320_s4 + $0x148] sm:$0xff]  ;;  %v6721_v2 = vld [vmem:[%s12321_s5 + $0x178] sm:$0xff] }
 0x4b8   :  { %7689 = vmatprep.subr.bf16.mxu1 %v8548_v19 }
 0x4b9   :  { %v2857_v29 = vpop.f32.mrb[52].mxu1  ;;  %6654 = vmatprep.mubr.msk.f32.mxu1 %vm2945_vm5, %v10703_v38 }
 0x4ba   :  { %v2912_v22 = vmax.f32 %v10534_v37, %v2857_v29  ;;  %v2859_v0 = vpop.f32.mrb[53].mxu1  ;;  %3104 = vmatmul.mubr.f32.gmra.mrb[82].mxu1 %v10699_v41  ;;  %v6720_v29 = vld [vmem:[%s12321_s5 + $0x170] sm:$0xff] }
 0x4bb   :  { %v2913_v7 = vmax.f32 %v10536_v35, %v2859_v0  ;;  %7691 = vmatpush1.bf16.msra.mxu1 %v7690_v62  ;;  %v6718_v62 = vld [vmem:[%s12321_s5 + $0x160] sm:$0xff]  ;;  %v6763_v0 = vld [vmem:[%s12321_s5 + $0x248] sm:$0xff] }
 0x4bc   :  { %3201 = vmatprep.subr.mxu1 %v8547_v3 }
 0x4bd   :  { %v2863_v4 = vpop.f32.mrb[54].mxu1  ;;  %6655 = vmatprep.mubr.msk.f32.mxu1 %vm2945_vm5, %v2913_v7 }
 0x4be   :  { %v2914_v18 = vmax.f32 %v10538_v14, %v2863_v4  ;;  %v2865_v53 = vpop.f32.mrb[55].mxu1  ;;  %3109 = vmatmul.mubr.f32.gmra.mrb[84].mxu1 %v2912_v22 }
 0x4bf   :  { %v2915_v37 = vmax.f32 %v10540_v54, %v2865_v53  ;;  %3202 = vmatpush1.msra.mxu1 %v6681_v40 }
 0x4c1   :  { %v2869_v50 = vpop.f32.mrb[56].mxu1  ;;  %6656 = vmatprep.mubr.msk.f32.mxu1 %vm2945_vm5, %v2915_v37 }
 0x4c2   :  { %v2916_v35 = vmax.f32 %v10542_v51, %v2869_v50  ;;  %v2871_v27 = vpop.f32.mrb[57].mxu1  ;;  %3114 = vmatmul.mubr.f32.gmra.mrb[86].mxu1 %v2914_v18 }
 0x4c3   :  { %v2917_v45 = vmax.f32 %v10544_v15, %v2871_v27 }
 0x4c5   :  { %v2875_v42 = vpop.f32.mrb[58].mxu1  ;;  %6657 = vmatprep.mubr.msk.f32.mxu1 %vm2945_vm5, %v2917_v45 }
 0x4c6   :  { %v2918_v25 = vmax.f32 %v10546_v21, %v2875_v42  ;;  %v2877_v14 = vpop.f32.mrb[59].mxu1  ;;  %3119 = vmatmul.mubr.f32.gmra.mrb[88].mxu1 %v2916_v35 }
 0x4c7   :  { %v2919_v34 = vmax.f32 %v10548_v1, %v2877_v14  ;;  %v6699_v1 = vld [vmem:[%s12321_s5 + $0xc8] sm:$0xff] }
 0x4c9   :  { %v2881_v54 = vpop.f32.mrb[60].mxu1  ;;  %6658 = vmatprep.mubr.msk.f32.mxu1 %vm2945_vm5, %v2919_v34 }
 0x4ca   :  { %v2920_v6 = vmax.f32 %v10550_v63, %v2881_v54  ;;  %v2883_v10 = vpop.f32.mrb[61].mxu1  ;;  %3124 = vmatmul.mubr.f32.gmra.mrb[90].mxu1 %v2918_v25  ;;  %v6701_v63 = vld [vmem:[%s12321_s5 + $0xd8] sm:$0xff] }
 0x4cb   :  { %v2921_v51 = vmax.f32 %v10552_v12, %v2883_v10  ;;  %v7692_v12 = vpack.c.bf16 %v6701_v63, %v6699_v1 }
 0x4cd   :  { %v2887_v60 = vpop.f32.mrb[62].mxu1  ;;  %6659 = vmatprep.mubr.msk.f32.mxu1 %vm2945_vm5, %v2921_v51  ;;  %7693 = vmatprep.subr.bf16.mxu1 %v7692_v12 }
 0x4ce   :  { %v2922_v15 = vmax.f32 %v10554_v57, %v2887_v60  ;;  %v2889_v46 = vpop.f32.mrb[63].mxu1  ;;  %3129 = vmatmul.mubr.f32.gmra.mrb[92].mxu1 %v2920_v6  ;;  %v6698_v57 = vld [vmem:[%s12321_s5 + $0xc0] sm:$0xff] }
 0x4cf   :  { %v2923_v21 = vmax.f32 %v10556_v52, %v2889_v46  ;;  %v6700_v52 = vld [vmem:[%s12321_s5 + $0xd0] sm:$0xff] }
 0x4d1   :  { %6660 = vmatprep.mubr.msk.f32.mxu1 %vm2945_vm5, %v2923_v21 }
 0x4d2   :  { %3134 = vmatmul.mubr.f32.gmra.mrb[94].mxu1 %v2922_v15 }
 0x4d3   :  { %6682 = vmatprep.mubr.msk.f32.mxu1 %vm2945_vm5, %v10566_v8  ;;  %v6703_v8 = vld [vmem:[%s12321_s5 + $0xe8] sm:$0xff] }
 0x4d6   :  { %3226 = vmatmul.mubr.f32.vlgmr.msra.gmra.mrb[96].mxu1 %v10564_v13  ;;  %v7694_v13 = vpack.c.bf16 %v6700_v52, %v6698_v57 }
 0x4d7   :  { %6683 = vmatprep.mubr.msk.f32.mxu1 %vm2945_vm5, %v10579_v9 }
 0x4d8   :  { %7695 = vmatpush1.bf16.msra.mxu1 %v7694_v13 }
 0x4da   :  { %3231 = vmatmul.mubr.f32.gmra.mrb[98].mxu1 %v10576_v61  ;;  %v6705_v61 = vld [vmem:[%s12321_s5 + $0xf8] sm:$0xff] }
 0x4db   :  { %6684 = vmatprep.mubr.msk.f32.mxu1 %vm2945_vm5, %v10593_v47  ;;  %v7696_v9 = vpack.c.bf16 %v6705_v61, %v6703_v8  ;;  %v6704_v47 = vld [vmem:[%s12321_s5 + $0xf0] sm:$0xff] }
 0x4dd   :  { %7697 = vmatprep.subr.bf16.mxu1 %v7696_v9 }
 0x4de   :  { %3236 = vmatmul.mubr.f32.gmra.mrb[100].mxu1 %v10590_v55  ;;  %v6702_v55 = vld [vmem:[%s12321_s5 + $0xe0] sm:$0xff] }
 0x4df   :  { %6685 = vmatprep.mubr.msk.f32.mxu1 %vm2945_vm5, %v10607_v28  ;;  %v6707_v28 = vld [vmem:[%s12321_s5 + $0x108] sm:$0xff] }
 0x4e2   :  { %3241 = vmatmul.mubr.f32.gmra.mrb[102].mxu1 %v10604_v23  ;;  %v7698_v23 = vpack.c.bf16 %v6704_v47, %v6702_v55 }
 0x4e3   :  { %6686 = vmatprep.mubr.msk.f32.mxu1 %vm2945_vm5, %v10623_v59 }
 0x4e4   :  { %7699 = vmatpush1.bf16.msra.mxu1 %v7698_v23 }
 0x4e6   :  { %3246 = vmatmul.mubr.f32.gmra.mrb[104].mxu1 %v10619_v49  ;;  %v6709_v49 = vld [vmem:[%s12321_s5 + $0x118] sm:$0xff] }
 0x4e7   :  { %6687 = vmatprep.mubr.msk.f32.mxu1 %vm2945_vm5, %v10639_v26  ;;  %v7700_v59 = vpack.c.bf16 %v6709_v49, %v6707_v28  ;;  %v6708_v26 = vld [vmem:[%s12321_s5 + $0x110] sm:$0xff] }
 0x4e9   :  { %7701 = vmatprep.subr.bf16.mxu1 %v7700_v59 }
 0x4ea   :  { %3251 = vmatmul.mubr.f32.gmra.mrb[106].mxu1 %v10635_v17  ;;  %v6706_v17 = vld [vmem:[%s12321_s5 + $0x100] sm:$0xff] }
 0x4eb   :  { %6688 = vmatprep.mubr.msk.f32.mxu1 %vm2945_vm5, %v10655_v58  ;;  %v6711_v58 = vld [vmem:[%s12321_s5 + $0x128] sm:$0xff] }
 0x4ee   :  { %3256 = vmatmul.mubr.f32.gmra.mrb[108].mxu1 %v10651_v36  ;;  %v7702_v36 = vpack.c.bf16 %v6708_v26, %v6706_v17  ;;  %v6762_v26 = vld [vmem:[%s12321_s5 + $0x240] sm:$0xff] }
 0x4ef   :  { %6689 = vmatprep.mubr.msk.f32.mxu1 %vm2945_vm5, %v10671_v16 }
 0x4f0   :  { %7703 = vmatpush1.bf16.msra.mxu1 %v7702_v36  ;;  %v6764_v36 = vld [vmem:[%s12321_s5 + $0x250] sm:$0xff] }
 0x4f2   :  { %3261 = vmatmul.mubr.f32.gmra.mrb[110].mxu1 %v10667_v20  ;;  %v6713_v20 = vld [vmem:[%s12321_s5 + $0x138] sm:$0xff] }
 0x4f3   :  { %6690 = vmatprep.mubr.msk.f32.mxu1 %vm2945_vm5, %v10687_v24  ;;  %v7704_v16 = vpack.c.bf16 %v6713_v20, %v6711_v58  ;;  %v6717_v24 = vld [vmem:[%s12321_s5 + $0x158] sm:$0xff] }
 0x4f4   :  { %v7708_v30 = vpack.c.bf16 %v6717_v24, %v6715_v32  ;;  %v7718_v32 = vpack.c.bf16 %v6764_v36, %v6762_v26 }
 0x4f5   :  { %7705 = vmatprep.subr.bf16.mxu1 %v7704_v16  ;;  %v6767_v16 = vld [vmem:[%s12321_s5 + $0x268] sm:$0xff] }
 0x4f6   :  { %3266 = vmatmul.mubr.f32.gmra.mrb[112].mxu1 %v10683_v5  ;;  %v7706_v5 = vpack.c.bf16 %v6712_v11, %v6710_v43  ;;  %v6769_v43 = vld [vmem:[%s12321_s5 + $0x278] sm:$0xff] }
 0x4f7   :  { %6691 = vmatprep.mubr.msk.f32.mxu1 %vm2945_vm5, %v10703_v38 }
 0x4f8   :  { %7707 = vmatpush1.bf16.msra.mxu1 %v7706_v5 }
 0x4f9   :  { %7709 = vmatprep.subr.bf16.mxu1 %v7708_v30  ;;  %v7720_v30 = vpack.c.bf16 %v6769_v43, %v6767_v16  ;;  %v6785_v16 = vld [vmem:[%s12321_s5 + $0x2f8] sm:$0xff] }
 0x4fa   :  { %3271 = vmatmul.mubr.f32.gmra.mrb[114].mxu1 %v10699_v41  ;;  %v6719_v41 = vld [vmem:[%s12321_s5 + $0x168] sm:$0xff] }
 0x4fb   :  { %6692 = vmatprep.mubr.msk.f32.mxu1 %vm2945_vm5, %v2913_v7  ;;  %v7712_v38 = vpack.c.bf16 %v6721_v2, %v6719_v41  ;;  %v6765_v7 = vld [vmem:[%s12321_s5 + $0x258] sm:$0xff] }
 0x4fc   :  { %7711 = vmatpush1.bf16.msra.mxu1 %v7710_v56  ;;  %v7716_v40 = vpack.c.bf16 %v6765_v7, %v6763_v0 }
 0x4fd   :  { %7713 = vmatprep.subr.bf16.mxu1 %v7712_v38  ;;  %v6771_v38 = vld [vmem:[%s12321_s5 + $0x288] sm:$0xff] }
 0x4fe   :  { %3276 = vmatmul.mubr.f32.gmra.mrb[116].mxu1 %v2912_v22  ;;  %v7714_v22 = vpack.c.bf16 %v6720_v29, %v6718_v62  ;;  %v6773_v62 = vld [vmem:[%s12321_s5 + $0x298] sm:$0xff] }
 0x4ff   :  { %6693 = vmatprep.mubr.msk.f32.mxu1 %vm2945_vm5, %v2915_v37  ;;  %v7724_v7 = vpack.c.bf16 %v6773_v62, %v6771_v38  ;;  %v6805_v38 = vld [vmem:[%s12321_s5 + $0x318] sm:$0xff] }
 0x500   :  { %7715 = vmatpush1.bf16.msra.mxu1 %v7714_v22  ;;  %v7722_v22 = vpack.c.bf16 %v6768_v33, %v6766_v31 }
 0x501   :  { %7717 = vmatprep.subr.bf16.mxu1 %v7716_v40  ;;  %v6770_v40 = vld [vmem:[%s12321_s5 + $0x280] sm:$0xff] }
 0x502   :  { %3281 = vmatmul.mubr.f32.gmra.mrb[118].mxu1 %v2914_v18 }
 0x503   :  { %6694 = vmatprep.mubr.msk.f32.mxu1 %vm2945_vm5, %v2917_v45 }
 0x506   :  { %3286 = vmatmul.mubr.f32.gmra.mrb[120].mxu1 %v2916_v35 }
 0x507   :  { %6695 = vmatprep.mubr.msk.f32.mxu1 %vm2945_vm5, %v2919_v34 }
 0x50a   :  { %3291 = vmatmul.mubr.f32.gmra.mrb[122].mxu1 %v2918_v25 }
 0x50b   :  { %6696 = vmatprep.mubr.msk.f32.mxu1 %vm2945_vm5, %v2921_v51 }
 0x50e   :  { %3296 = vmatmul.mubr.f32.gmra.mrb[124].mxu1 %v2920_v6 }
 0x50f   :  { %6697 = vmatprep.mubr.msk.f32.mxu1 %vm2945_vm5, %v2923_v21 }
 0x512   :  { %3301 = vmatmul.mubr.f32.gmra.mrb[126].mxu1 %v2922_v15 }
 0x513   :  { %3515 = vmatprep.mubr.f32.mxu1 %v8547_v3 }
 0x569   :  { %v3060_v4 = vpop.f32.mrb[64].mxu1 }
 0x56a   :  { %v3062_v18 = vpop.f32.mrb[65].mxu1 }
 0x56d   :  { %v3065_v53 = vpop.f32.mrb[66].mxu1 }
 0x56e   :  { %v3067_v37 = vpop.f32.mrb[67].mxu1 }
 0x571   :  { %v3070_v50 = vpop.f32.mrb[68].mxu1 }
 0x572   :  { %v3072_v35 = vpop.f32.mrb[69].mxu1 }
 0x573   :  { %v6777_v35 = vld [vmem:[%s12321_s5 + $0x2b8] sm:$0xff] }
 0x575   :  { %v3075_v27 = vpop.f32.mrb[70].mxu1 }
 0x576   :  { %v3077_v45 = vpop.f32.mrb[71].mxu1 }
 0x579   :  { %v10846_v42 = vpop.f32.mrb[72].mxu1 }
 0x57a   :  { %v3082_v25 = vpop.f32.mrb[73].mxu1 }
 0x57d   :  { %v10848_v14 = vpop.f32.mrb[74].mxu1 }
 0x57e   :  { %v3087_v34 = vpop.f32.mrb[75].mxu1 }
 0x581   :  { %v10850_v54 = vpop.f32.mrb[76].mxu1 }
 0x582   :  { %v3092_v6 = vpop.f32.mrb[77].mxu1 }
 0x583   :  { %v6774_v6 = vld [vmem:[%s12321_s5 + $0x2a0] sm:$0xff] }
 0x585   :  { %v10852_v10 = vpop.f32.mrb[78].mxu1 }
 0x586   :  { %v3097_v51 = vpop.f32.mrb[79].mxu1 }
 0x587   :  { %v6776_v51 = vld [vmem:[%s12321_s5 + $0x2b0] sm:$0xff] }
 0x589   :  { %v10854_v60 = vpop.f32.mrb[80].mxu1 }
 0x58a   :  { %v3102_v15 = vpop.f32.mrb[81].mxu1 }
 0x58d   :  { %v10856_v46 = vpop.f32.mrb[82].mxu1 }
 0x58e   :  { %v3107_v21 = vpop.f32.mrb[83].mxu1 }
 0x591   :  { %v10858_v1 = vpop.f32.mrb[84].mxu1 }
 0x592   :  { %v3112_v63 = vpop.f32.mrb[85].mxu1 }
 0x595   :  { %v10860_v12 = vpop.f32.mrb[86].mxu1 }
 0x596   :  { %v3117_v57 = vpop.f32.mrb[87].mxu1 }
 0x597   :  { %v6779_v57 = vld [vmem:[%s12321_s5 + $0x2c8] sm:$0xff] }
 0x599   :  { %v10862_v52 = vpop.f32.mrb[88].mxu1 }
 0x59a   :  { %v3122_v13 = vpop.f32.mrb[89].mxu1 }
 0x59b   :  { %v6781_v13 = vld [vmem:[%s12321_s5 + $0x2d8] sm:$0xff] }
 0x59d   :  { %v10864_v8 = vpop.f32.mrb[90].mxu1 }
 0x59e   :  { %v3127_v61 = vpop.f32.mrb[91].mxu1 }
 0x5a1   :  { %v10866_v9 = vpop.f32.mrb[92].mxu1 }
 0x5a2   :  { %v3132_v55 = vpop.f32.mrb[93].mxu1 }
 0x5a5   :  { %v10868_v47 = vpop.f32.mrb[94].mxu1 }
 0x5a6   :  { %v3137_v23 = vpop.f32.mrb[95].mxu1 }
 0x5a7   :  { %v7732_v23 = vpack.c.bf16 %v6781_v13, %v6779_v57 }
 0x5a9   :  { %v3227_v28 = vpop.f32.mrb[96].mxu1 }
 0x5aa   :  { %v10870_v49 = vmax.f32 %v3060_v4, %v3227_v28  ;;  %v3229_v59 = vpop.f32.mrb[97].mxu1  ;;  %v6772_v4 = vld [vmem:[%s12321_s5 + $0x290] sm:$0xff]  ;;  %v6778_v28 = vld [vmem:[%s12321_s5 + $0x2c0] sm:$0xff] }
 0x5ab   :  { %v6780_v59 = vld [vmem:[%s12321_s5 + $0x2d0] sm:$0xff] }
 0x5ac   :  { %v3346_v11 = vrot.slane %v10870_v49, 1 }
 0x5ad   :  { %v3232_v17 = vpop.f32.mrb[98].mxu1 }
 0x5ae   :  { %v10878_v58 = vmax.f32 %v3065_v53, %v3232_v17  ;;  %v3234_v20 = vpop.f32.mrb[99].mxu1 }
 0x5af   :  { %v6783_v20 = vld [vmem:[%s12321_s5 + $0x2e8] sm:$0xff] }
 0x5b0   :  { %v3347_v5 = vrot.slane %v10878_v58, 1 }
 0x5b1   :  { %v3237_v24 = vpop.f32.mrb[100].mxu1 }
 0x5b2   :  { %v10894_v56 = vmax.f32 %v3070_v50, %v3237_v24  ;;  %v3239_v41 = vpop.f32.mrb[101].mxu1  ;;  %v3376_v2 = vsel %vm143_vm0, %v3346_v11, %v3347_v5  ;;  %v6775_v50 = vld [vmem:[%s12321_s5 + $0x2a8] sm:$0xff]  ;;  %v6782_v24 = vld [vmem:[%s12321_s5 + $0x2e0] sm:$0xff] }
 0x5b3   :  { %6722 = vmatmul.mubr.msk.f32.vlgmr.msra.gmra.mrb[128].mxu1 %vm201_vm1, %v3376_v2  ;;  %v7728_v34 = vpack.c.bf16 %v6777_v35, %v6775_v50  ;;  %v6803_v2 = vld [vmem:[%s12321_s5 + $0x308] sm:$0xff] }
 0x5b4   :  { %3521 = vmatprep.mubr.f32.mxu1 %v8547_v3  ;;  %v3348_v29 = vrot.slane %v10894_v56, 1  ;;  %7719 = vmatpush1.bf16.msra.mxu1 %v7718_v32  ;;  %v7736_v32 = vpack.c.bf16 %v6785_v16, %v6783_v20 }
 0x5b5   :  { %v3242_v0 = vpop.f32.mrb[102].mxu1  ;;  %7721 = vmatprep.subr.bf16.mxu1 %v7720_v30  ;;  %v6784_v30 = vld [vmem:[%s12321_s5 + $0x2f0] sm:$0xff] }
 0x5b6   :  { %v10915_v18 = vmax.f32 %v3075_v27, %v3242_v0  ;;  %v3244_v53 = vpop.f32.mrb[103].mxu1  ;;  %v3375_v37 = vsel %vm143_vm0, %v3347_v5, %v3348_v29  ;;  %v7726_v27 = vpack.c.bf16 %v6772_v4, %v6770_v40 }
 0x5b7   :  { %6723 = vmatmul.mubr.msk.f32.gmra.mrb[130].mxu1 %vm201_vm1, %v3375_v37 }
 0x5b8   :  { %3527 = vmatprep.mubr.f32.mxu1 %v8547_v3  ;;  %v3349_v45 = vrot.slane %v10915_v18, 1  ;;  %7723 = vmatpush1.bf16.msra.mxu1 %v7722_v22  ;;  %v7740_v22 = vpack.c.bf16 %v6805_v38, %v6803_v2  ;;  %v6804_v38 = vld [vmem:[%s12321_s5 + $0x310] sm:$0xff] }
 0x5b9   :  { %v3247_v25 = vpop.f32.mrb[104].mxu1  ;;  %7725 = vmatprep.subr.bf16.mxu1 %v7724_v7 }
 0x5ba   :  { %v10935_v15 = vmax.f32 %v10846_v42, %v3247_v25  ;;  %v3249_v21 = vpop.f32.mrb[105].mxu1  ;;  %v3374_v63 = vsel %vm143_vm0, %v3348_v29, %v3349_v45  ;;  %v7730_v42 = vpack.c.bf16 %v6776_v51, %v6774_v6 }
 0x5bb   :  { %6724 = vmatmul.mubr.msk.f32.gmra.mrb[132].mxu1 %vm201_vm1, %v3374_v63 }
 0x5bc   :  { %3533 = vmatprep.mubr.f32.mxu1 %v8547_v3  ;;  %v3350_v61 = vrot.slane %v10935_v15, 1  ;;  %7727 = vmatpush1.bf16.msra.mxu1 %v7726_v27 }
 0x5bd   :  { %v3252_v55 = vpop.f32.mrb[106].mxu1  ;;  %7729 = vmatprep.subr.bf16.mxu1 %v7728_v34 }
 0x5be   :  { %v10955_v17 = vmax.f32 %v10848_v14, %v3252_v55  ;;  %v3254_v26 = vpop.f32.mrb[107].mxu1  ;;  %v3373_v36 = vsel %vm143_vm0, %v3349_v45, %v3350_v61  ;;  %v7734_v14 = vpack.c.bf16 %v6780_v59, %v6778_v28 }
 0x5bf   :  { %6725 = vmatmul.mubr.msk.f32.gmra.mrb[134].mxu1 %vm201_vm1, %v3373_v36 }
 0x5c0   :  { %3539 = vmatprep.mubr.f32.mxu1 %v8547_v3  ;;  %v3351_v43 = vrot.slane %v10955_v17, 1  ;;  %7731 = vmatpush1.bf16.msra.mxu1 %v7730_v42 }
 0x5c1   :  { %v3257_v5 = vpop.f32.mrb[108].mxu1  ;;  %7733 = vmatprep.subr.bf16.mxu1 %v7732_v23 }
 0x5c2   :  { %v10975_v31 = vmax.f32 %v10850_v54, %v3257_v5  ;;  %v3259_v33 = vpop.f32.mrb[109].mxu1  ;;  %v3372_v41 = vsel %vm143_vm0, %v3350_v61, %v3351_v43  ;;  %v7738_v54 = vpack.c.bf16 %v6784_v30, %v6782_v24 }
 0x5c3   :  { %6726 = vmatmul.mubr.msk.f32.gmra.mrb[136].mxu1 %vm201_vm1, %v3372_v41 }
 0x5c4   :  { %3545 = vmatprep.mubr.f32.mxu1 %v8547_v3  ;;  %v3352_v62 = vrot.slane %v10975_v31, 1  ;;  %7735 = vmatpush1.bf16.msra.mxu1 %v7734_v14 }
 0x5c5   :  { %v3262_v29 = vpop.f32.mrb[110].mxu1  ;;  %7737 = vmatprep.subr.bf16.mxu1 %v7736_v32 }
 0x5c6   :  { %v10989_v0 = vmax.f32 %v10852_v10, %v3262_v29  ;;  %v3264_v7 = vpop.f32.mrb[111].mxu1  ;;  %v3371_v40 = vsel %vm143_vm0, %v3351_v43, %v3352_v62  ;;  %v6807_v29 = vld [vmem:[%s12321_s5 + $0x328] sm:$0xff] }
 0x5c7   :  { %6727 = vmatmul.mubr.msk.f32.gmra.mrb[138].mxu1 %vm201_vm1, %v3371_v40  ;;  %v3669_v7 = vrot.slane %v10870_v49, 3 }
 0x5c8   :  { %3551 = vmatprep.mubr.f32.mxu1 %v8547_v3  ;;  %v3353_v4 = vrot.slane %v10989_v0, 1  ;;  %7739 = vmatpush1.bf16.msra.mxu1 %v7738_v54  ;;  %v3670_v54 = vrot.slane %v10878_v58, 3 }
 0x5c9   :  { %v3267_v53 = vpop.f32.mrb[112].mxu1  ;;  %7741 = vmatprep.subr.bf16.mxu1 %v7740_v22  ;;  %v6809_v22 = vld [vmem:[%s12321_s5 + $0x338] sm:$0xff] }
 0x5ca   :  { %v10997_v37 = vmax.f32 %v10854_v60, %v3267_v53  ;;  %v3269_v50 = vpop.f32.mrb[113].mxu1  ;;  %v3370_v10 = vsel %vm143_vm0, %v3352_v62, %v3353_v4  ;;  %v6808_v53 = vld [vmem:[%s12321_s5 + $0x330] sm:$0xff] }
 0x5cb   :  { %6728 = vmatmul.mubr.msk.f32.gmra.mrb[140].mxu1 %vm201_vm1, %v3370_v10  ;;  %v3699_v50 = vsel %vm677_vm2, %v3669_v7, %v3670_v54  ;;  %v3671_v10 = vrot.slane %v10894_v56, 3 }
 0x5cc   :  { %3557 = vmatprep.mubr.f32.mxu1 %v8547_v3  ;;  %v3354_v35 = vrot.slane %v10997_v37, 1 }
 0x5cd   :  { %v3272_v45 = vpop.f32.mrb[114].mxu1 }
 0x5ce   :  { %v11005_v27 = vmax.f32 %v10856_v46, %v3272_v45  ;;  %v3274_v25 = vpop.f32.mrb[115].mxu1  ;;  %v3369_v34 = vsel %vm143_vm0, %v3353_v4, %v3354_v35  ;;  %v7744_v4 = vpack.c.bf16 %v6809_v22, %v6807_v29  ;;  %v6813_v45 = vld [vmem:[%s12321_s5 + $0x358] sm:$0xff] }
 0x5cf   :  { %6729 = vmatmul.mubr.msk.f32.gmra.mrb[142].mxu1 %vm201_vm1, %v3369_v34 }
 0x5d0   :  { %3563 = vmatprep.mubr.f32.mxu1 %v8547_v3  ;;  %v3355_v60 = vrot.slane %v11005_v27, 1 }
 0x5d1   :  { %v3277_v6 = vpop.f32.mrb[116].mxu1 }
 0x5d2   :  { %v11013_v51 = vmax.f32 %v10858_v1, %v3277_v6  ;;  %v3279_v21 = vpop.f32.mrb[117].mxu1  ;;  %v3368_v63 = vsel %vm143_vm0, %v3354_v35, %v3355_v60  ;;  %v6811_v35 = vld [vmem:[%s12321_s5 + $0x348] sm:$0xff]  ;;  %v6812_v6 = vld [vmem:[%s12321_s5 + $0x350] sm:$0xff] }
 0x5d3   :  { %6730 = vmatmul.mubr.msk.f32.gmra.mrb[144].mxu1 %vm201_vm1, %v3368_v63  ;;  %v7748_v34 = vpack.c.bf16 %v6813_v45, %v6811_v35  ;;  %v3698_v21 = vsel %vm677_vm2, %v3670_v54, %v3671_v10  ;;  %v3672_v63 = vrot.slane %v10915_v18, 3  ;;  %v3325_v54 = vld [vmem:[%s12321_s5 + $0x18] sm:$0xff] }
 0x5d4   :  { %3569 = vmatprep.mubr.f32.mxu1 %v8547_v3  ;;  %v3356_v46 = vrot.slane %v11013_v51, 1  ;;  %v3679_v45 = vrot.slane %v11013_v51, 3 }
 0x5d5   :  { %v3282_v57 = vpop.f32.mrb[118].mxu1 }
 0x5d6   :  { %v11021_v13 = vmax.f32 %v10860_v12, %v3282_v57  ;;  %v3284_v61 = vpop.f32.mrb[119].mxu1  ;;  %v3367_v42 = vsel %vm143_vm0, %v3355_v60, %v3356_v46  ;;  %v6810_v60 = vld [vmem:[%s12321_s5 + $0x340] sm:$0xff]  ;;  %v6817_v57 = vld [vmem:[%s12321_s5 + $0x378] sm:$0xff] }
 0x5d7   :  { %6731 = vmatmul.mubr.msk.f32.gmra.mrb[146].mxu1 %vm201_vm1, %v3367_v42  ;;  %v7750_v61 = vpack.c.bf16 %v6812_v6, %v6810_v60 }
 0x5d8   :  { %3575 = vmatprep.mubr.f32.mxu1 %v8547_v3  ;;  %v3357_v1 = vrot.slane %v11021_v13, 1 }
 0x5d9   :  { %v3287_v55 = vpop.f32.mrb[120].mxu1 }
 0x5da   :  { %v11029_v23 = vmax.f32 %v10862_v52, %v3287_v55  ;;  %v3289_v28 = vpop.f32.mrb[121].mxu1  ;;  %v3366_v59 = vsel %vm143_vm0, %v3356_v46, %v3357_v1  ;;  %v6815_v46 = vld [vmem:[%s12321_s5 + $0x368] sm:$0xff]  ;;  %v6816_v55 = vld [vmem:[%s12321_s5 + $0x370] sm:$0xff] }
 0x5db   :  { %6732 = vmatmul.mubr.msk.f32.gmra.mrb[148].mxu1 %vm201_vm1, %v3366_v59  ;;  %v7752_v42 = vpack.c.bf16 %v6817_v57, %v6815_v46  ;;  %v3697_v28 = vsel %vm677_vm2, %v3671_v10, %v3672_v63  ;;  %v3673_v59 = vrot.slane %v10935_v15, 3  ;;  %v3678_v10 = vrot.slane %v11005_v27, 3 }
 0x5dc   :  { %3581 = vmatprep.mubr.f32.mxu1 %v8547_v3  ;;  %v3358_v12 = vrot.slane %v11029_v23, 1  ;;  %v3681_v6 = vrot.slane %v11029_v23, 3 }
 0x5dd   :  { %v3292_v26 = vpop.f32.mrb[122].mxu1 }
 0x5de   :  { %v11037_v36 = vmax.f32 %v10864_v8, %v3292_v26  ;;  %v3294_v20 = vpop.f32.mrb[123].mxu1  ;;  %v3365_v16 = vsel %vm143_vm0, %v3357_v1, %v3358_v12  ;;  %v6814_v1 = vld [vmem:[%s12321_s5 + $0x360] sm:$0xff]  ;;  %v6821_v26 = vld [vmem:[%s12321_s5 + $0x398] sm:$0xff] }
 0x5df   :  { %6733 = vmatmul.mubr.msk.f32.gmra.mrb[150].mxu1 %vm201_vm1, %v3365_v16  ;;  %v7754_v20 = vpack.c.bf16 %v6816_v55, %v6814_v1  ;;  %v3322_v55 = vld [vmem:[%s12321_s5] sm:$0xff] }
 0x5e0   :  { %3587 = vmatprep.mubr.f32.mxu1 %v8547_v3  ;;  %v3359_v52 = vrot.slane %v11037_v36, 1 }
 0x5e1   :  { %v3297_v43 = vpop.f32.mrb[124].mxu1 }
 0x5e2   :  { %v11045_v14 = vmax.f32 %v10866_v9, %v3297_v43  ;;  %v3299_v5 = vpop.f32.mrb[125].mxu1  ;;  %v3364_v32 = vsel %vm143_vm0, %v3358_v12, %v3359_v52  ;;  %v6819_v12 = vld [vmem:[%s12321_s5 + $0x388] sm:$0xff]  ;;  %v6820_v43 = vld [vmem:[%s12321_s5 + $0x390] sm:$0xff] }
 0x5e3   :  { %6734 = vmatmul.mubr.msk.f32.gmra.mrb[152].mxu1 %vm201_vm1, %v3364_v32  ;;  %v7756_v16 = vpack.c.bf16 %v6821_v26, %v6819_v12  ;;  %v3696_v5 = vsel %vm677_vm2, %v3672_v63, %v3673_v59  ;;  %v3674_v32 = vrot.slane %v10955_v17, 3  ;;  %v3682_v63 = vrot.slane %v11037_v36, 3  ;;  %v3327_v26 = vld [vmem:[%s12321_s5 + $0x28] sm:$0xff] }
 0x5e4   :  { %3593 = vmatprep.mubr.f32.mxu1 %v8547_v3  ;;  %v3360_v8 = vrot.slane %v11045_v14, 1  ;;  %v3683_v57 = vrot.slane %v11045_v14, 3  ;;  %v3936_v12 = vrot.slane %v10878_v58, 4 }
 0x5e5   :  { %v3302_v24 = vpop.f32.mrb[126].mxu1  ;;  %v3687_v46 = vsel %vm677_vm2, %v3681_v6, %v3682_v63 }
 0x5e6   :  { %v11053_v30 = vmax.f32 %v10868_v47, %v3302_v24  ;;  %v3304_v33 = vpop.f32.mrb[127].mxu1  ;;  %v3363_v41 = vsel %vm143_vm0, %v3359_v52, %v3360_v8  ;;  %v6802_v47 = vld [vmem:[%s12321_s5 + $0x300] sm:$0xff]  ;;  %v6825_v24 = vld [vmem:[%s12321_s5 + $0x3b8] sm:$0xff] }
 0x5e7   :  { %6735 = vmatmul.mubr.msk.f32.gmra.mrb[154].mxu1 %vm201_vm1, %v3363_v41  ;;  %v7742_v40 = vpack.c.bf16 %v6804_v38, %v6802_v47  ;;  %v6818_v52 = vld [vmem:[%s12321_s5 + $0x380] sm:$0xff]  ;;  %v3695_v47 = vsel %vm677_vm2, %v3673_v59, %v3674_v32  ;;  %v3675_v38 = vrot.slane %v10975_v31, 3 }
 0x5e8   :  { %3599 = vmatprep.mubr.f32.mxu1 %v8547_v3  ;;  %v3361_v9 = vrot.slane %v11053_v30, 1  ;;  %v7758_v33 = vpack.c.bf16 %v6820_v43, %v6818_v52 }
 0x5ea   :  { %v3362_v2 = vsel %vm143_vm0, %v3360_v8, %v3361_v9  ;;  %v3377_v62 = vsel %vm143_vm0, %v3361_v9, %v3346_v11  ;;  %v6806_v11 = vld [vmem:[%s12321_s5 + $0x320] sm:$0xff]  ;;  %v6823_v8 = vld [vmem:[%s12321_s5 + $0x3a8] sm:$0xff] }
 0x5eb   :  { %6736 = vmatmul.mubr.msk.f32.gmra.mrb[156].mxu1 %vm201_vm1, %v3362_v2  ;;  %v7746_v25 = vpack.c.bf16 %v6808_v53, %v6806_v11  ;;  %v7760_v41 = vpack.c.bf16 %v6825_v24, %v6823_v8  ;;  %v6822_v9 = vld [vmem:[%s12321_s5 + $0x3a0] sm:$0xff]  ;;  %v6824_v2 = vld [vmem:[%s12321_s5 + $0x3b0] sm:$0xff]  ;;  %v3677_v53 = vrot.slane %v10997_v37, 3  ;;  %v3937_v8 = vrot.slane %v10894_v56, 4  ;;  %v3331_v24 = vld [vmem:[%s12321_s5 + $0x48] sm:$0xff] }
 0x5ec   :  { %3605 = vmatprep.mubr.f32.mxu1 %v8547_v3  ;;  %v7762_v29 = vpack.c.bf16 %v6824_v2, %v6822_v9  ;;  %v3330_v2 = vld [vmem:[%s12321_s5 + $0x40] sm:$0xff] }
 0x5ed   :  { %v3691_v35 = vsel %vm677_vm2, %v3677_v53, %v3678_v10 }
 0x5ef   :  { %6737 = vmatmul.mubr.msk.f32.gmra.mrb[158].mxu1 %vm201_vm1, %v3377_v62  ;;  %v3323_v62 = vld [vmem:[%s12321_s5 + $0x8] sm:$0xff] }
 0x5f0   :  { %3838 = vmatprep.mubr.f32.mxu1 %v8547_v3  ;;  %v7764_v22 = vpack.c.bf16 %v3325_v54, %v3323_v62  ;;  %v3938_v62 = vrot.slane %v10915_v18, 4  ;;  %v3335_v54 = vld [vmem:[%s12321_s5 + $0x68] sm:$0xff] }
 0x5f3   :  { %6786 = vmatmul.mubr.msk.f32.vlgmr.msra.gmra.mrb[128].mxu1 %vm201_vm1, %v3699_v50 }
 0x5f4   :  { %3844 = vmatprep.mubr.f32.mxu1 %v8547_v3  ;;  %7743 = vmatpush1.bf16.msra.mxu1 %v7742_v40  ;;  %v3694_v40 = vsel %vm677_vm2, %v3674_v32, %v3675_v38 }
 0x5f5   :  { %7745 = vmatprep.subr.bf16.mxu1 %v7744_v4  ;;  %v3676_v4 = vrot.slane %v10989_v0, 3 }
 0x5f7   :  { %6787 = vmatmul.mubr.msk.f32.gmra.mrb[130].mxu1 %vm201_vm1, %v3698_v21  ;;  %v3693_v11 = vsel %vm677_vm2, %v3675_v38, %v3676_v4  ;;  %v3692_v50 = vsel %vm677_vm2, %v3676_v4, %v3677_v53  ;;  %v3964_v38 = vsel %vm1120_vm3, %v3936_v12, %v3937_v8  ;;  %v3334_v4 = vld [vmem:[%s12321_s5 + $0x60] sm:$0xff]  ;;  %v3963_v53 = vsel %vm1120_vm3, %v3937_v8, %v3938_v62 }
 0x5f8   :  { %3850 = vmatprep.mubr.f32.mxu1 %v8547_v3  ;;  %7747 = vmatpush1.bf16.msra.mxu1 %v7746_v25  ;;  %v3690_v25 = vsel %vm677_vm2, %v3678_v10, %v3679_v45  ;;  %v3339_v10 = vld [vmem:[%s12321_s5 + $0x88] sm:$0xff]  ;;  %v3944_v8 = vrot.slane %v11005_v27, 4 }
 0x5f9   :  { %7749 = vmatprep.subr.bf16.mxu1 %v7748_v34  ;;  %v3680_v34 = vrot.slane %v11021_v13, 3 }
 0x5fb   :  { %6788 = vmatmul.mubr.msk.f32.gmra.mrb[132].mxu1 %vm201_vm1, %v3697_v28  ;;  %v3689_v60 = vsel %vm677_vm2, %v3679_v45, %v3680_v34  ;;  %v3688_v21 = vsel %vm677_vm2, %v3680_v34, %v3681_v6  ;;  %v3324_v28 = vld [vmem:[%s12321_s5 + $0x10] sm:$0xff]  ;;  %v3338_v34 = vld [vmem:[%s12321_s5 + $0x80] sm:$0xff] }
 0x5fc   :  { %3856 = vmatprep.mubr.f32.mxu1 %v8547_v3  ;;  %7751 = vmatpush1.bf16.msra.mxu1 %v7750_v61  ;;  %v3686_v61 = vsel %vm677_vm2, %v3682_v63, %v3683_v57  ;;  %v7766_v52 = vpack.c.bf16 %v3324_v28, %v3322_v55  ;;  %v3343_v63 = vld [vmem:[%s12321_s5 + $0xa8] sm:$0xff]  ;;  %v3941_v28 = vrot.slane %v10975_v31, 4 }
 0x5fd   :  { %7753 = vmatprep.subr.bf16.mxu1 %v7752_v42  ;;  %v3684_v42 = vrot.slane %v11053_v30, 3 }
 0x5ff   :  { %6789 = vmatmul.mubr.msk.f32.gmra.mrb[134].mxu1 %vm201_vm1, %v3696_v5  ;;  %v3685_v1 = vsel %vm677_vm2, %v3683_v57, %v3684_v42  ;;  %v3700_v59 = vsel %vm677_vm2, %v3684_v42, %v3669_v7  ;;  %v3326_v7 = vld [vmem:[%s12321_s5 + $0x20] sm:$0xff]  ;;  %v3328_v5 = vld [vmem:[%s12321_s5 + $0x30] sm:$0xff] }
 0x600   :  { %3862 = vmatprep.mubr.f32.mxu1 %v8547_v3  ;;  %7755 = vmatpush1.bf16.msra.mxu1 %v7754_v20  ;;  %v3329_v20 = vld [vmem:[%s12321_s5 + $0x38] sm:$0xff]  ;;  %v3342_v42 = vld [vmem:[%s12321_s5 + $0xa0] sm:$0xff] }
 0x601   :  { %7757 = vmatprep.subr.bf16.mxu1 %v7756_v16  ;;  %v3935_v16 = vrot.slane %v10870_v49, 4  ;;  %v7768_v43 = vpack.c.bf16 %v3329_v20, %v3327_v26 }
 0x603   :  { %6790 = vmatmul.mubr.msk.f32.gmra.mrb[136].mxu1 %vm201_vm1, %v3695_v47  ;;  %v3965_v32 = vsel %vm1120_vm3, %v3935_v16, %v3936_v12  ;;  %v3332_v47 = vld [vmem:[%s12321_s5 + $0x50] sm:$0xff]  ;;  %v6741_v12 = vld [vmem:[%s12321_s5 + $0x198] sm:$0xff] }
 0x604   :  { %3868 = vmatprep.mubr.f32.mxu1 %v8547_v3  ;;  %7759 = vmatpush1.bf16.msra.mxu1 %v7758_v33  ;;  %v3333_v33 = vld [vmem:[%s12321_s5 + $0x58] sm:$0xff] }
 0x605   :  { %7761 = vmatprep.subr.bf16.mxu1 %v7760_v41  ;;  %v7770_v41 = vpack.c.bf16 %v3328_v5, %v3326_v7  ;;  %v7772_v9 = vpack.c.bf16 %v3333_v33, %v3331_v24  ;;  %v3943_v5 = vrot.slane %v10997_v37, 4  ;;  %v3945_v33 = vrot.slane %v11013_v51, 4 }
 0x607   :  { %6791 = vmatmul.mubr.msk.f32.gmra.mrb[138].mxu1 %vm201_vm1, %v3694_v40  ;;  %v3957_v24 = vsel %vm1120_vm3, %v3943_v5, %v3944_v8 }
 0x608   :  { %3874 = vmatprep.mubr.f32.mxu1 %v8547_v3  ;;  %7763 = vmatpush1.bf16.msra.mxu1 %v7762_v29  ;;  %v3337_v29 = vld [vmem:[%s12321_s5 + $0x78] sm:$0xff] }
 0x609   :  { %7765 = vmatprep.subr.bf16.mxu1 %v7764_v22  ;;  %v7774_v22 = vpack.c.bf16 %v3332_v47, %v3330_v2  ;;  %v7776_v40 = vpack.c.bf16 %v3337_v29, %v3335_v54  ;;  %v3947_v47 = vrot.slane %v11029_v23, 4  ;;  %v3949_v29 = vrot.slane %v11045_v14, 4 }
 0x60b   :  { %6792 = vmatmul.mubr.msk.f32.gmra.mrb[140].mxu1 %vm201_vm1, %v3693_v11  ;;  %v3336_v11 = vld [vmem:[%s12321_s5 + $0x70] sm:$0xff] }
 0x60c   :  { %3880 = vmatprep.mubr.f32.mxu1 %v8547_v3  ;;  %v7778_v45 = vpack.c.bf16 %v3336_v11, %v3334_v4  ;;  %v6738_v11 = vld [vmem:[%s12321_s5 + $0x180] sm:$0xff] }
 0x60f   :  { %6793 = vmatmul.mubr.msk.f32.gmra.mrb[142].mxu1 %vm201_vm1, %v3692_v50  ;;  %v3939_v50 = vrot.slane %v10935_v15, 4 }
 0x610   :  { %3886 = vmatprep.mubr.f32.mxu1 %v8547_v3 }
 0x611   :  { %v3962_v6 = vsel %vm1120_vm3, %v3938_v62, %v3939_v50  ;;  %v3948_v62 = vrot.slane %v11037_v36, 4 }
 0x613   :  { %6794 = vmatmul.mubr.msk.f32.gmra.mrb[144].mxu1 %vm201_vm1, %v3691_v35  ;;  %v3341_v35 = vld [vmem:[%s12321_s5 + $0x98] sm:$0xff]  ;;  %v3953_v54 = vsel %vm1120_vm3, %v3947_v47, %v3948_v62 }
 0x614   :  { %3892 = vmatprep.mubr.f32.mxu1 %v8547_v3 }
 0x617   :  { %6795 = vmatmul.mubr.msk.f32.gmra.mrb[146].mxu1 %vm201_vm1, %v3690_v25  ;;  %v7780_v25 = vpack.c.bf16 %v3341_v35, %v3339_v10  ;;  %v6743_v10 = vld [vmem:[%s12321_s5 + $0x1a8] sm:$0xff]  ;;  %v6745_v35 = vld [vmem:[%s12321_s5 + $0x1b8] sm:$0xff] }
 0x618   :  { %3898 = vmatprep.mubr.f32.mxu1 %v8547_v3 }
 0x61b   :  { %6796 = vmatmul.mubr.msk.f32.gmra.mrb[148].mxu1 %vm201_vm1, %v3689_v60  ;;  %v3340_v60 = vld [vmem:[%s12321_s5 + $0x90] sm:$0xff] }
 0x61c   :  { %3904 = vmatprep.mubr.f32.mxu1 %v8547_v3  ;;  %v7782_v57 = vpack.c.bf16 %v3340_v60, %v3338_v34  ;;  %v6742_v34 = vld [vmem:[%s12321_s5 + $0x1a0] sm:$0xff]  ;;  %v6747_v60 = vld [vmem:[%s12321_s5 + $0x1c8] sm:$0xff] }
 0x61f   :  { %6797 = vmatmul.mubr.msk.f32.gmra.mrb[150].mxu1 %vm201_vm1, %v3688_v21  ;;  %v3940_v21 = vrot.slane %v10955_v17, 4 }
 0x620   :  { %3910 = vmatprep.mubr.f32.mxu1 %v8547_v3 }
 0x621   :  { %v3961_v55 = vsel %vm1120_vm3, %v3939_v50, %v3940_v21 }
 0x623   :  { %6798 = vmatmul.mubr.msk.f32.gmra.mrb[152].mxu1 %vm201_vm1, %v3687_v46  ;;  %v3345_v46 = vld [vmem:[%s12321_s5 + $0xb8] sm:$0xff] }
 0x624   :  { %3916 = vmatprep.mubr.f32.mxu1 %v8547_v3 }
 0x627   :  { %6799 = vmatmul.mubr.msk.f32.gmra.mrb[154].mxu1 %vm201_vm1, %v3686_v61  ;;  %v7784_v61 = vpack.c.bf16 %v3345_v46, %v3343_v63  ;;  %v6746_v46 = vld [vmem:[%s12321_s5 + $0x1c0] sm:$0xff] }
 0x628   :  { %3922 = vmatprep.mubr.f32.mxu1 %v8547_v3 }
 0x62b   :  { %6800 = vmatmul.mubr.msk.f32.gmra.mrb[156].mxu1 %vm201_vm1, %v3685_v1  ;;  %v3344_v1 = vld [vmem:[%s12321_s5 + $0xb0] sm:$0xff] }
 0x62c   :  { %3928 = vmatprep.mubr.f32.mxu1 %v8547_v3  ;;  %v7786_v26 = vpack.c.bf16 %v3344_v1, %v3342_v42  ;;  %v6753_v42 = vld [vmem:[%s12321_s5 + $0x1f8] sm:$0xff] }
 0x62f   :  { %6801 = vmatmul.mubr.msk.f32.gmra.mrb[158].mxu1 %vm201_vm1, %v3700_v59  ;;  %v6739_v59 = vld [vmem:[%s12321_s5 + $0x188] sm:$0xff] }
 0x630   :  { %4104 = vmatprep.mubr.f32.mxu1 %v8547_v3  ;;  %v7788_v20 = vpack.c.bf16 %v6741_v12, %v6739_v59  ;;  %v6752_v59 = vld [vmem:[%s12321_s5 + $0x1f0] sm:$0xff]  ;;  %v6755_v12 = vld [vmem:[%s12321_s5 + $0x208] sm:$0xff] }
 0x633   :  { %6826 = vmatmul.mubr.msk.f32.vlgmr.msra.gmra.mrb[128].mxu1 %vm201_vm1, %v3965_v32 }
 0x634   :  { %4110 = vmatprep.mubr.f32.mxu1 %v8547_v3  ;;  %7767 = vmatpush1.bf16.msra.mxu1 %v7766_v52  ;;  %v3960_v52 = vsel %vm1120_vm3, %v3940_v21, %v3941_v28 }
 0x635   :  { %7769 = vmatprep.subr.bf16.mxu1 %v7768_v43  ;;  %v3942_v43 = vrot.slane %v10989_v0, 4 }
 0x637   :  { %6827 = vmatmul.mubr.msk.f32.gmra.mrb[130].mxu1 %vm201_vm1, %v3964_v38  ;;  %v3959_v7 = vsel %vm1120_vm3, %v3941_v28, %v3942_v43  ;;  %v3958_v32 = vsel %vm1120_vm3, %v3942_v43, %v3943_v5  ;;  %v6750_v28 = vld [vmem:[%s12321_s5 + $0x1e0] sm:$0xff]  ;;  %v6759_v5 = vld [vmem:[%s12321_s5 + $0x228] sm:$0xff] }
 0x638   :  { %4116 = vmatprep.mubr.f32.mxu1 %v8547_v3  ;;  %7771 = vmatpush1.bf16.msra.mxu1 %v7770_v41  ;;  %v3956_v41 = vsel %vm1120_vm3, %v3944_v8, %v3945_v33  ;;  %v6754_v43 = vld [vmem:[%s12321_s5 + $0x200] sm:$0xff] }
 0x639   :  { %7773 = vmatprep.subr.bf16.mxu1 %v7772_v9  ;;  %v3946_v9 = vrot.slane %v11021_v13, 4 }
 0x63b   :  { %6828 = vmatmul.mubr.msk.f32.gmra.mrb[132].mxu1 %vm201_vm1, %v3963_v53  ;;  %v3955_v2 = vsel %vm1120_vm3, %v3945_v33, %v3946_v9  ;;  %v3954_v38 = vsel %vm1120_vm3, %v3946_v9, %v3947_v47  ;;  %v6740_v53 = vld [vmem:[%s12321_s5 + $0x190] sm:$0xff]  ;;  %v6758_v33 = vld [vmem:[%s12321_s5 + $0x220] sm:$0xff]  ;;  %v3612_v47 = vrot.slane %v10870_v49, 2 }
 0x63c   :  { %4122 = vmatprep.mubr.f32.mxu1 %v8547_v3  ;;  %7775 = vmatpush1.bf16.msra.mxu1 %v7774_v22  ;;  %v3952_v22 = vsel %vm1120_vm3, %v3948_v62, %v3949_v29  ;;  %v3614_v62 = vrot.slane %v10894_v56, 2 }
 0x63d   :  { %7777 = vmatprep.subr.bf16.mxu1 %v7776_v40  ;;  %v3950_v40 = vrot.slane %v11053_v30, 4 }
 0x63f   :  { %6829 = vmatmul.mubr.msk.f32.gmra.mrb[134].mxu1 %vm201_vm1, %v3962_v6  ;;  %v3951_v4 = vsel %vm1120_vm3, %v3949_v29, %v3950_v40  ;;  %v3966_v50 = vsel %vm1120_vm3, %v3950_v40, %v3935_v16  ;;  %v6744_v16 = vld [vmem:[%s12321_s5 + $0x1b0] sm:$0xff]  ;;  %v6749_v6 = vld [vmem:[%s12321_s5 + $0x1d8] sm:$0xff]  ;;  %v3616_v29 = vrot.slane %v10935_v15, 2  ;;  %v3618_v40 = vrot.slane %v10975_v31, 2 }
 0x640   :  { %4128 = vmatprep.mubr.f32.mxu1 %v8547_v3  ;;  %7779 = vmatpush1.bf16.msra.mxu1 %v7778_v45  ;;  %v7790_v45 = vpack.c.bf16 %v6740_v53, %v6738_v11  ;;  %v7794_v21 = vpack.c.bf16 %v6744_v16, %v6742_v34  ;;  %v7796_v63 = vpack.c.bf16 %v6749_v6, %v6747_v60  ;;  %v3620_v11 = vrot.slane %v10997_v37, 2 }
 0x641   :  { %7781 = vmatprep.subr.bf16.mxu1 %v7780_v25  ;;  %v7792_v25 = vpack.c.bf16 %v6745_v35, %v6743_v10  ;;  %v3621_v53 = vrot.slane %v11005_v27, 2  ;;  %v3623_v10 = vrot.slane %v11021_v13, 2  ;;  %v3624_v35 = vrot.slane %v11029_v23, 2 }
 0x642   :  { %v3627_v34 = vrot.slane %v11053_v30, 2 }
 0x643   :  { %6830 = vmatmul.mubr.msk.f32.gmra.mrb[136].mxu1 %vm201_vm1, %v3961_v55 }
 0x644   :  { %4134 = vmatprep.mubr.f32.mxu1 %v8547_v3  ;;  %7783 = vmatpush1.bf16.msra.mxu1 %v7782_v57  ;;  %v6748_v57 = vld [vmem:[%s12321_s5 + $0x1d0] sm:$0xff] }
 0x645   :  { %7785 = vmatprep.subr.bf16.mxu1 %v7784_v61  ;;  %v6751_v61 = vld [vmem:[%s12321_s5 + $0x1e8] sm:$0xff]  ;;  %v7798_v1 = vpack.c.bf16 %v6748_v57, %v6746_v46 }
 0x646   :  { %v7800_v55 = vpack.c.bf16 %v6753_v42, %v6751_v61 }
 0x647   :  { %6831 = vmatmul.mubr.msk.f32.gmra.mrb[138].mxu1 %vm201_vm1, %v3960_v52 }
 0x648   :  { %4140 = vmatprep.mubr.f32.mxu1 %v8547_v3  ;;  %7787 = vmatpush1.bf16.msra.mxu1 %v7786_v26  ;;  %v6757_v26 = vld [vmem:[%s12321_s5 + $0x218] sm:$0xff] }
 0x649   :  { %7789 = vmatprep.subr.bf16.mxu1 %v7788_v20  ;;  %v7802_v20 = vpack.c.bf16 %v6752_v59, %v6750_v28  ;;  %v7804_v52 = vpack.c.bf16 %v6757_v26, %v6755_v12 }
 0x64b   :  { %6832 = vmatmul.mubr.msk.f32.gmra.mrb[140].mxu1 %vm201_vm1, %v3959_v7  ;;  %v6756_v7 = vld [vmem:[%s12321_s5 + $0x210] sm:$0xff] }
 0x64c   :  { %4146 = vmatprep.mubr.f32.mxu1 %v8547_v3  ;;  %v7806_v8 = vpack.c.bf16 %v6756_v7, %v6754_v43 }
 0x64f   :  { %6833 = vmatmul.mubr.msk.f32.gmra.mrb[142].mxu1 %vm201_vm1, %v3958_v32  ;;  %v6761_v32 = vld [vmem:[%s12321_s5 + $0x238] sm:$0xff] }
 0x650   :  { %4152 = vmatprep.mubr.f32.mxu1 %v8547_v3 }
 0x653   :  { %6834 = vmatmul.mubr.msk.f32.gmra.mrb[144].mxu1 %vm201_vm1, %v3957_v24  ;;  %v7808_v24 = vpack.c.bf16 %v6761_v32, %v6759_v5 }
 0x654   :  { %4158 = vmatprep.mubr.f32.mxu1 %v8547_v3 }
 0x657   :  { %6835 = vmatmul.mubr.msk.f32.gmra.mrb[146].mxu1 %vm201_vm1, %v3956_v41  ;;  %v6760_v41 = vld [vmem:[%s12321_s5 + $0x230] sm:$0xff] }
 0x658   :  { %4164 = vmatprep.mubr.f32.mxu1 %v8547_v3  ;;  %v7810_v9 = vpack.c.bf16 %v6760_v41, %v6758_v33 }
 0x65b   :  { %6836 = vmatmul.mubr.msk.f32.gmra.mrb[148].mxu1 %vm201_vm1, %v3955_v2  ;;  %v3613_v2 = vrot.slane %v10878_v58, 2 }
 0x65c   :  { %4170 = vmatprep.mubr.f32.mxu1 %v8547_v3 }
 0x65f   :  { %6837 = vmatmul.mubr.msk.f32.gmra.mrb[150].mxu1 %vm201_vm1, %v3954_v38  ;;  %v3642_v38 = vsel %vm587_vm4, %v3612_v47, %v3613_v2 }
 0x660   :  { %4176 = vmatprep.mubr.f32.mxu1 %v8547_v3 }
 0x663   :  { %6838 = vmatmul.mubr.msk.f32.gmra.mrb[152].mxu1 %vm201_vm1, %v3953_v54  ;;  %v3641_v54 = vsel %vm587_vm4, %v3613_v2, %v3614_v62 }
 0x664   :  { %4182 = vmatprep.mubr.f32.mxu1 %v8547_v3 }
 0x667   :  { %6839 = vmatmul.mubr.msk.f32.gmra.mrb[154].mxu1 %vm201_vm1, %v3952_v22  ;;  %v3617_v22 = vrot.slane %v10955_v17, 2 }
 0x668   :  { %4188 = vmatprep.mubr.f32.mxu1 %v8547_v3 }
 0x66b   :  { %6840 = vmatmul.mubr.msk.f32.gmra.mrb[156].mxu1 %vm201_vm1, %v3951_v4  ;;  %v3619_v4 = vrot.slane %v10989_v0, 2 }
 0x66c   :  { %4194 = vmatprep.mubr.f32.mxu1 %v8547_v3 }
 0x66f   :  { %6841 = vmatmul.mubr.msk.f32.gmra.mrb[158].mxu1 %vm201_vm1, %v3966_v50  ;;  %v3622_v50 = vrot.slane %v11013_v51, 2 }
 0x670   :  { %4313 = vmatprep.mubr.f32.mxu1 %v8547_v3 }
 0x673   :  { %6842 = vmatmul.mubr.msk.f32.vlgmr.msra.gmra.mrb[128].mxu1 %vm201_vm1, %v10870_v49 }
 0x674   :  { %4319 = vmatprep.mubr.f32.mxu1 %v8547_v3  ;;  %7791 = vmatpush1.bf16.msra.mxu1 %v7790_v45  ;;  %v3625_v45 = vrot.slane %v11037_v36, 2 }
 0x675   :  { %7793 = vmatprep.subr.bf16.mxu1 %v7792_v25  ;;  %v3626_v25 = vrot.slane %v11045_v14, 2 }
 0x677   :  { %6843 = vmatmul.mubr.msk.f32.gmra.mrb[130].mxu1 %vm201_vm1, %v10878_v58  ;;  %v3615_v58 = vrot.slane %v10915_v18, 2 }
 0x678   :  { %4325 = vmatprep.mubr.f32.mxu1 %v8547_v3  ;;  %7795 = vmatpush1.bf16.msra.mxu1 %v7794_v21 }
 0x679   :  { %7797 = vmatprep.subr.bf16.mxu1 %v7796_v63  ;;  %v3640_v49 = vsel %vm587_vm4, %v3614_v62, %v3615_v58 }
 0x67b   :  { %6844 = vmatmul.mubr.msk.f32.gmra.mrb[132].mxu1 %vm201_vm1, %v10894_v56  ;;  %v3639_v56 = vsel %vm587_vm4, %v3615_v58, %v3616_v29 }
 0x67c   :  { %4331 = vmatprep.mubr.f32.mxu1 %v8547_v3  ;;  %7799 = vmatpush1.bf16.msra.mxu1 %v7798_v1 }
 0x67d   :  { %7801 = vmatprep.subr.bf16.mxu1 %v7800_v55 }
 0x67f   :  { %6845 = vmatmul.mubr.msk.f32.gmra.mrb[134].mxu1 %vm201_vm1, %v10915_v18  ;;  %v3638_v18 = vsel %vm587_vm4, %v3616_v29, %v3617_v22 }
 0x680   :  { %4337 = vmatprep.mubr.f32.mxu1 %v8547_v3  ;;  %7803 = vmatpush1.bf16.msra.mxu1 %v7802_v20 }
 0x681   :  { %7805 = vmatprep.subr.bf16.mxu1 %v7804_v52 }
 0x683   :  { %6846 = vmatmul.mubr.msk.f32.gmra.mrb[136].mxu1 %vm201_vm1, %v10935_v15  ;;  %v3637_v15 = vsel %vm587_vm4, %v3617_v22, %v3618_v40 }
 0x684   :  { %4343 = vmatprep.mubr.f32.mxu1 %v8547_v3  ;;  %7807 = vmatpush1.bf16.msra.mxu1 %v7806_v8 }
 0x685   :  { %7809 = vmatprep.subr.bf16.mxu1 %v7808_v24 }
 0x687   :  { %6847 = vmatmul.mubr.msk.f32.gmra.mrb[138].mxu1 %vm201_vm1, %v10955_v17  ;;  %v3636_v17 = vsel %vm587_vm4, %v3618_v40, %v3619_v4 }
 0x688   :  { %4349 = vmatprep.mubr.f32.mxu1 %v8547_v3  ;;  %7811 = vmatpush1.bf16.msra.mxu1 %v7810_v9 }
 0x68b   :  { %6848 = vmatmul.mubr.msk.f32.gmra.mrb[140].mxu1 %vm201_vm1, %v10975_v31  ;;  %v3635_v31 = vsel %vm587_vm4, %v3619_v4, %v3620_v11 }
 0x68c   :  { %4355 = vmatprep.mubr.f32.mxu1 %v8547_v3 }
 0x68f   :  { %6849 = vmatmul.mubr.msk.f32.gmra.mrb[142].mxu1 %vm201_vm1, %v10989_v0  ;;  %v3634_v0 = vsel %vm587_vm4, %v3620_v11, %v3621_v53 }
 0x690   :  { %4361 = vmatprep.mubr.f32.mxu1 %v8547_v3 }
 0x693   :  { %6850 = vmatmul.mubr.msk.f32.gmra.mrb[144].mxu1 %vm201_vm1, %v10997_v37  ;;  %v3633_v37 = vsel %vm587_vm4, %v3621_v53, %v3622_v50 }
 0x694   :  { %4367 = vmatprep.mubr.f32.mxu1 %v8547_v3 }
 0x697   :  { %6851 = vmatmul.mubr.msk.f32.gmra.mrb[146].mxu1 %vm201_vm1, %v11005_v27  ;;  %v3632_v27 = vsel %vm587_vm4, %v3622_v50, %v3623_v10 }
 0x698   :  { %4373 = vmatprep.mubr.f32.mxu1 %v8547_v3 }
 0x69b   :  { %6852 = vmatmul.mubr.msk.f32.gmra.mrb[148].mxu1 %vm201_vm1, %v11013_v51  ;;  %v3631_v51 = vsel %vm587_vm4, %v3623_v10, %v3624_v35 }
 0x69c   :  { %4379 = vmatprep.mubr.f32.mxu1 %v8547_v3 }
 0x69f   :  { %6853 = vmatmul.mubr.msk.f32.gmra.mrb[150].mxu1 %vm201_vm1, %v11021_v13  ;;  %v3630_v13 = vsel %vm587_vm4, %v3624_v35, %v3625_v45 }
 0x6a0   :  { %4385 = vmatprep.mubr.f32.mxu1 %v8547_v3 }
 0x6a3   :  { %6854 = vmatmul.mubr.msk.f32.gmra.mrb[152].mxu1 %vm201_vm1, %v11029_v23  ;;  %v3629_v23 = vsel %vm587_vm4, %v3625_v45, %v3626_v25 }
 0x6a4   :  { %4391 = vmatprep.mubr.f32.mxu1 %v8547_v3 }
 0x6a7   :  { %6855 = vmatmul.mubr.msk.f32.gmra.mrb[154].mxu1 %vm201_vm1, %v11037_v36  ;;  %v3628_v36 = vsel %vm587_vm4, %v3626_v25, %v3627_v34 }
 0x6a8   :  { %4397 = vmatprep.mubr.f32.mxu1 %v8547_v3 }
 0x6ab   :  { %6856 = vmatmul.mubr.msk.f32.gmra.mrb[156].mxu1 %vm201_vm1, %v11045_v14  ;;  %v3643_v14 = vsel %vm587_vm4, %v3627_v34, %v3612_v47 }
 0x6ac   :  { %4403 = vmatprep.mubr.f32.mxu1 %v8547_v3 }
 0x6af   :  { %6857 = vmatmul.mubr.msk.f32.gmra.mrb[158].mxu1 %vm201_vm1, %v11053_v30  ;;  %v4683_v30 = vld [vmem:[%s12322_s6] sm:$0x3] }
 0x6b0   :  { %4522 = vmatprep.mubr.f32.mxu1 %v8547_v3  ;;  %v11581_v16 = vrot.slane %v4683_v30, %v2369_v44  ;;  %v11585_v6 = vrot.slane %v4683_v30, %v2373_v48 }
 0x6b3   :  { %6858 = vmatmul.mubr.msk.f32.vlgmr.msra.gmra.mrb[128].mxu1 %vm201_vm1, %v3642_v38 }
 0x6b4   :  { %4528 = vmatprep.mubr.f32.mxu1 %v8547_v3 }
 0x6b7   :  { %6859 = vmatmul.mubr.msk.f32.gmra.mrb[130].mxu1 %vm201_vm1, %v3641_v54 }
 0x6b8   :  { %4534 = vmatprep.mubr.f32.mxu1 %v8547_v3 }
 0x6bb   :  { %6860 = vmatmul.mubr.msk.f32.gmra.mrb[132].mxu1 %vm201_vm1, %v3640_v49 }
 0x6bc   :  { %4540 = vmatprep.mubr.f32.mxu1 %v8547_v3 }
 0x6bf   :  { %6861 = vmatmul.mubr.msk.f32.gmra.mrb[134].mxu1 %vm201_vm1, %v3639_v56 }
 0x6c0   :  { %4546 = vmatprep.mubr.f32.mxu1 %v8547_v3 }
 0x6c3   :  { %6862 = vmatmul.mubr.msk.f32.gmra.mrb[136].mxu1 %vm201_vm1, %v3638_v18 }
 0x6c4   :  { %4552 = vmatprep.mubr.f32.mxu1 %v8547_v3 }
 0x6c7   :  { %6863 = vmatmul.mubr.msk.f32.gmra.mrb[138].mxu1 %vm201_vm1, %v3637_v15 }
 0x6c8   :  { %4558 = vmatprep.mubr.f32.mxu1 %v8547_v3 }
 0x6cb   :  { %6864 = vmatmul.mubr.msk.f32.gmra.mrb[140].mxu1 %vm201_vm1, %v3636_v17 }
 0x6cc   :  { %4564 = vmatprep.mubr.f32.mxu1 %v8547_v3 }
 0x6cf   :  { %6865 = vmatmul.mubr.msk.f32.gmra.mrb[142].mxu1 %vm201_vm1, %v3635_v31 }
 0x6d0   :  { %4570 = vmatprep.mubr.f32.mxu1 %v8547_v3 }
 0x6d3   :  { %6866 = vmatmul.mubr.msk.f32.gmra.mrb[144].mxu1 %vm201_vm1, %v3634_v0 }
 0x6d4   :  { %4576 = vmatprep.mubr.f32.mxu1 %v8547_v3 }
 0x6d7   :  { %6867 = vmatmul.mubr.msk.f32.gmra.mrb[146].mxu1 %vm201_vm1, %v3633_v37 }
 0x6d8   :  { %4582 = vmatprep.mubr.f32.mxu1 %v8547_v3 }
 0x6db   :  { %6868 = vmatmul.mubr.msk.f32.gmra.mrb[148].mxu1 %vm201_vm1, %v3632_v27 }
 0x6dc   :  { %4588 = vmatprep.mubr.f32.mxu1 %v8547_v3 }
 0x6df   :  { %6869 = vmatmul.mubr.msk.f32.gmra.mrb[150].mxu1 %vm201_vm1, %v3631_v51 }
 0x6e0   :  { %4594 = vmatprep.mubr.f32.mxu1 %v8547_v3 }
 0x6e3   :  { %6870 = vmatmul.mubr.msk.f32.gmra.mrb[152].mxu1 %vm201_vm1, %v3630_v13 }
 0x6e4   :  { %4600 = vmatprep.mubr.f32.mxu1 %v8547_v3 }
 0x6e7   :  { %6871 = vmatmul.mubr.msk.f32.gmra.mrb[154].mxu1 %vm201_vm1, %v3629_v23 }
 0x6e8   :  { %4606 = vmatprep.mubr.f32.mxu1 %v8547_v3 }
 0x6eb   :  { %6872 = vmatmul.mubr.msk.f32.gmra.mrb[156].mxu1 %vm201_vm1, %v3628_v36 }
 0x6ec   :  { %4612 = vmatprep.mubr.f32.mxu1 %v8547_v3 }
 0x6ef   :  { %6873 = vmatmul.mubr.msk.f32.gmra.mrb[158].mxu1 %vm201_vm1, %v3643_v14 }
 0x6f0   :  { %4831 = vmatprep.mubr.f32.mxu1 %v8547_v3 }
 0x786   :  { %v4524_v60 = vpop.f32.mrb[128].mxu1 }
 0x787   :  { %v4526_v21 = vpop.f32.mrb[129].mxu1  ;;  %v4695_v63 = vadd.f32 %v11581_v16, %v4524_v60 }
 0x788   :  { %v4696_v46 = vadd.f32 %v11585_v6, %v4526_v21 }
 0x789   :  { %v4727_v55 = vmax.f32 %v4695_v63, 0.0 }
 0x78a   :  { %v4530_v57 = vpop.f32.mrb[130].mxu1  ;;  %v4728_v44 = vmax.f32 %v4696_v46, 0.0 }
 0x78b   :  { %v4697_v61 = vadd.f32 %v11581_v16, %v4530_v57  ;;  %v4532_v42 = vpop.f32.mrb[131].mxu1 }
 0x78c   :  { %v4698_v1 = vadd.f32 %v11585_v6, %v4532_v42 }
 0x78d   :  { %v4729_v28 = vmax.f32 %v4697_v61, 0.0 }
 0x78e   :  { %v4730_v59 = vmax.f32 %v4698_v1, 0.0  ;;  %v4536_v12 = vpop.f32.mrb[132].mxu1 }
 0x78f   :  { %v7814_v26 = vpack.c.bf16 %v4729_v28, %v4727_v55  ;;  %v4538_v20 = vpop.f32.mrb[133].mxu1  ;;  %v4699_v52 = vadd.f32 %v11581_v16, %v4536_v12 }
 0x790   :  { %v7812_v48 = vpack.c.bf16 %v4730_v59, %v4728_v44  ;;  %v4700_v43 = vadd.f32 %v11585_v6, %v4538_v20 }
 0x791   :  { %v4731_v24 = vmax.f32 %v4699_v52, 0.0 }
 0x792   :  { %v4542_v7 = vpop.f32.mrb[134].mxu1  ;;  %7813 = vmatprep.subr.bf16.mxu1 %v7812_v48  ;;  %7845 = vmatprep.subr.bf16.mxu0 %v7812_v48  ;;  %v4732_v41 = vmax.f32 %v4700_v43, 0.0 }
 0x793   :  { %v4701_v5 = vadd.f32 %v11581_v16, %v4542_v7  ;;  %v4544_v32 = vpop.f32.mrb[135].mxu1  ;;  %7815 = vmatpush1.bf16.msra.mxu1 %v7814_v26  ;;  %7847 = vmatpush1.bf16.msra.mxu0 %v7814_v26 }
 0x794   :  { %v4702_v8 = vadd.f32 %v11585_v6, %v4544_v32 }
 0x795   :  { %v4733_v33 = vmax.f32 %v4701_v5, 0.0 }
 0x796   :  { %v4734_v9 = vmax.f32 %v4702_v8, 0.0  ;;  %v4548_v2 = vpop.f32.mrb[136].mxu1 }
 0x797   :  { %v7818_v47 = vpack.c.bf16 %v4733_v33, %v4731_v24  ;;  %v4550_v38 = vpop.f32.mrb[137].mxu1  ;;  %v4703_v54 = vadd.f32 %v11581_v16, %v4548_v2 }
 0x798   :  { %v7816_v62 = vpack.c.bf16 %v4734_v9, %v4732_v41  ;;  %v4704_v58 = vadd.f32 %v11585_v6, %v4550_v38 }
 0x799   :  { %v4735_v18 = vmax.f32 %v4703_v54, 0.0 }
 0x79a   :  { %v4554_v49 = vpop.f32.mrb[138].mxu1  ;;  %7817 = vmatprep.subr.bf16.mxu1 %v7816_v62  ;;  %7849 = vmatprep.subr.bf16.mxu0 %v7816_v62  ;;  %v4736_v15 = vmax.f32 %v4704_v58, 0.0 }
 0x79b   :  { %v4705_v29 = vadd.f32 %v11581_v16, %v4554_v49  ;;  %v4556_v56 = vpop.f32.mrb[139].mxu1  ;;  %7819 = vmatpush1.bf16.msra.mxu1 %v7818_v47  ;;  %7851 = vmatpush1.bf16.msra.mxu0 %v7818_v47 }
 0x79c   :  { %v4706_v22 = vadd.f32 %v11585_v6, %v4556_v56 }
 0x79d   :  { %v4737_v40 = vmax.f32 %v4705_v29, 0.0 }
 0x79e   :  { %v4738_v4 = vmax.f32 %v4706_v22, 0.0  ;;  %v4560_v17 = vpop.f32.mrb[140].mxu1 }
 0x79f   :  { %v7822_v11 = vpack.c.bf16 %v4737_v40, %v4735_v18  ;;  %v4562_v31 = vpop.f32.mrb[141].mxu1  ;;  %v4707_v0 = vadd.f32 %v11581_v16, %v4560_v17 }
 0x7a0   :  { %v7820_v53 = vpack.c.bf16 %v4738_v4, %v4736_v15  ;;  %v4708_v50 = vadd.f32 %v11585_v6, %v4562_v31 }
 0x7a1   :  { %v4739_v51 = vmax.f32 %v4707_v0, 0.0 }
 0x7a2   :  { %v4566_v37 = vpop.f32.mrb[142].mxu1  ;;  %7821 = vmatprep.subr.bf16.mxu1 %v7820_v53  ;;  %7853 = vmatprep.subr.bf16.mxu0 %v7820_v53  ;;  %v4740_v13 = vmax.f32 %v4708_v50, 0.0 }
 0x7a3   :  { %v4709_v10 = vadd.f32 %v11581_v16, %v4566_v37  ;;  %v4568_v27 = vpop.f32.mrb[143].mxu1  ;;  %7823 = vmatpush1.bf16.msra.mxu1 %v7822_v11  ;;  %7855 = vmatpush1.bf16.msra.mxu0 %v7822_v11 }
 0x7a4   :  { %v4710_v35 = vadd.f32 %v11585_v6, %v4568_v27 }
 0x7a5   :  { %v4741_v45 = vmax.f32 %v4709_v10, 0.0 }
 0x7a6   :  { %v4742_v25 = vmax.f32 %v4710_v35, 0.0  ;;  %v4572_v23 = vpop.f32.mrb[144].mxu1 }
 0x7a7   :  { %v7826_v34 = vpack.c.bf16 %v4741_v45, %v4739_v51  ;;  %v4574_v36 = vpop.f32.mrb[145].mxu1  ;;  %v4711_v30 = vadd.f32 %v11581_v16, %v4572_v23  ;;  %v5019_v23 = vld [vmem:[%s12323_s8 + $0x8] sm:$0xff] }
 0x7a8   :  { %v7824_v14 = vpack.c.bf16 %v4742_v25, %v4740_v13  ;;  %v4712_v60 = vadd.f32 %v11585_v6, %v4574_v36  ;;  %v5018_v25 = vld [vmem:[%s12323_s8] sm:$0xff] }
 0x7a9   :  { %v4743_v61 = vmax.f32 %v4711_v30, 0.0  ;;  %v6874_v36 = vld [vmem:[%s12324_s7 + $0x40] sm:$0xff] }
 0x7aa   :  { %v4578_v21 = vpop.f32.mrb[146].mxu1  ;;  %7825 = vmatprep.subr.bf16.mxu1 %v7824_v14  ;;  %7857 = vmatprep.subr.bf16.mxu0 %v7824_v14  ;;  %v4744_v1 = vmax.f32 %v4712_v60, 0.0  ;;  %v7877_v14 = vpack.c.bf16 %v5019_v23, %v5018_v25  ;;  %v5020_v60 = vld [vmem:[%s12323_s8 + $0x10] sm:$0xff]  ;;  %v6881_v25 = vld [vmem:[%s12324_s7 + $0x78] sm:$0xff] }
 0x7ab   :  { %v4713_v63 = vadd.f32 %v11581_v16, %v4578_v21  ;;  %v4580_v46 = vpop.f32.mrb[147].mxu1  ;;  %7827 = vmatpush1.bf16.msra.mxu1 %v7826_v34  ;;  %7859 = vmatpush1.bf16.msra.mxu0 %v7826_v34  ;;  %v4759_v34 = vld [vmem:[%s12324_s7] sm:$0xff]  ;;  %v5021_v21 = vld [vmem:[%s12323_s8 + $0x18] sm:$0xff] }
 0x7ac   :  { %v4714_v57 = vadd.f32 %v11585_v6, %v4580_v46  ;;  %v6893_v46 = vld [vmem:[%s12323_s8 + $0xb8] sm:$0xff] }
 0x7ad   :  { %v4745_v42 = vmax.f32 %v4713_v63, 0.0  ;;  %v6892_v63 = vld [vmem:[%s12323_s8 + $0xb0] sm:$0xff] }
 0x7ae   :  { %v4746_v55 = vmax.f32 %v4714_v57, 0.0  ;;  %v4584_v28 = vpop.f32.mrb[148].mxu1  ;;  %v4760_v57 = vld [vmem:[%s12324_s7 + $0x8] sm:$0xff] }
 0x7af   :  { %v7830_v44 = vpack.c.bf16 %v4745_v42, %v4743_v61  ;;  %v4586_v59 = vpop.f32.mrb[149].mxu1  ;;  %v4715_v26 = vadd.f32 %v11581_v16, %v4584_v28  ;;  %v6875_v61 = vld [vmem:[%s12324_s7 + $0x48] sm:$0xff]  ;;  %v7880_v42 = vpack.c.bf16 %v5021_v21, %v5020_v60  ;;  %v5036_v21 = vld [vmem:[%s12323_s8 + $0x90] sm:$0xff] }
 0x7b0   :  { %v7828_v12 = vpack.c.bf16 %v4746_v55, %v4744_v1  ;;  %v4716_v20 = vadd.f32 %v11585_v6, %v4586_v59  ;;  %v7910_v1 = vpack.c.bf16 %v6893_v46, %v6892_v63  ;;  %v5022_v55 = vld [vmem:[%s12323_s8 + $0x20] sm:$0xff]  ;;  %v5023_v28 = vld [vmem:[%s12323_s8 + $0x28] sm:$0xff]  ;;  %v5037_v63 = vld [vmem:[%s12323_s8 + $0x98] sm:$0xff] }
 0x7b1   :  { %v4747_v5 = vmax.f32 %v4715_v26, 0.0  ;;  %v6895_v59 = vld [vmem:[%s12323_s8 + $0xc8] sm:$0xff]  ;;  %v6876_v26 = vld [vmem:[%s12324_s7 + $0x50] sm:$0xff] }
 0x7b2   :  { %v4590_v48 = vpop.f32.mrb[150].mxu1  ;;  %7829 = vmatprep.subr.bf16.mxu1 %v7828_v12  ;;  %7861 = vmatprep.subr.bf16.mxu0 %v7828_v12  ;;  %v4748_v8 = vmax.f32 %v4716_v20, 0.0  ;;  %v4761_v12 = vld [vmem:[%s12324_s7 + $0x10] sm:$0xff]  ;;  %v7883_v20 = vpack.c.bf16 %v5023_v28, %v5022_v55  ;;  %v6919_v55 = vld [vmem:[%s12325_s10 + $0x58] sm:$0xff] }
 0x7b3   :  { %v4717_v52 = vadd.f32 %v11581_v16, %v4590_v48  ;;  %v4592_v43 = vpop.f32.mrb[151].mxu1  ;;  %7831 = vmatpush1.bf16.msra.mxu1 %v7830_v44  ;;  %7863 = vmatpush1.bf16.msra.mxu0 %v7830_v44  ;;  %v6894_v44 = vld [vmem:[%s12323_s8 + $0xc0] sm:$0xff]  ;;  %v6908_v46 = vld [vmem:[%s12323_s8 + $0x130] sm:$0xff] }
 0x7b4   :  { %v4718_v7 = vadd.f32 %v11585_v6, %v4592_v43  ;;  %v7913_v48 = vpack.c.bf16 %v6895_v59, %v6894_v44  ;;  %v5025_v43 = vld [vmem:[%s12323_s8 + $0x38] sm:$0xff] }
 0x7b5   :  { %v4749_v32 = vmax.f32 %v4717_v52, 0.0  ;;  %v5024_v52 = vld [vmem:[%s12323_s8 + $0x30] sm:$0xff] }
 0x7b6   :  { %v4750_v24 = vmax.f32 %v4718_v7, 0.0  ;;  %v4596_v33 = vpop.f32.mrb[152].mxu1  ;;  %v6896_v7 = vld [vmem:[%s12323_s8 + $0xd0] sm:$0xff] }
 0x7b7   :  { %v7834_v41 = vpack.c.bf16 %v4749_v32, %v4747_v5  ;;  %v4598_v9 = vpop.f32.mrb[153].mxu1  ;;  %v4719_v47 = vadd.f32 %v11581_v16, %v4596_v33  ;;  %v6897_v5 = vld [vmem:[%s12323_s8 + $0xd8] sm:$0xff] }
 0x7b8   :  { %v7832_v2 = vpack.c.bf16 %v4750_v24, %v4748_v8  ;;  %v4720_v38 = vadd.f32 %v11585_v6, %v4598_v9  ;;  %v4762_v32 = vld [vmem:[%s12324_s7 + $0x18] sm:$0xff]  ;;  %v7886_v24 = vpack.c.bf16 %v5025_v43, %v5024_v52  ;;  %v7916_v33 = vpack.c.bf16 %v6897_v5, %v6896_v7  ;;  %v5027_v9 = vld [vmem:[%s12323_s8 + $0x48] sm:$0xff] }
 0x7b9   :  { %v4751_v29 = vmax.f32 %v4719_v47, 0.0  ;;  %v6877_v8 = vld [vmem:[%s12324_s7 + $0x58] sm:$0xff]  ;;  %v6899_v47 = vld [vmem:[%s12323_s8 + $0xe8] sm:$0xff] }
 0x7ba   :  { %v4602_v62 = vpop.f32.mrb[154].mxu1  ;;  %7833 = vmatprep.subr.bf16.mxu1 %v7832_v2  ;;  %7865 = vmatprep.subr.bf16.mxu0 %v7832_v2  ;;  %v4752_v22 = vmax.f32 %v4720_v38, 0.0  ;;  %v6898_v2 = vld [vmem:[%s12323_s8 + $0xe0] sm:$0xff] }
 0x7bb   :  { %v4721_v54 = vadd.f32 %v11581_v16, %v4602_v62  ;;  %v4604_v58 = vpop.f32.mrb[155].mxu1  ;;  %7835 = vmatpush1.bf16.msra.mxu1 %v7834_v41  ;;  %7867 = vmatpush1.bf16.msra.mxu0 %v7834_v41  ;;  %v5026_v41 = vld [vmem:[%s12323_s8 + $0x40] sm:$0xff] }
 0x7bc   :  { %v4722_v49 = vadd.f32 %v11585_v6, %v4604_v58  ;;  %v4763_v38 = vld [vmem:[%s12324_s7 + $0x20] sm:$0xff]  ;;  %v7919_v58 = vpack.c.bf16 %v6899_v47, %v6898_v2 }
 0x7bd   :  { %v4753_v56 = vmax.f32 %v4721_v54, 0.0  ;;  %v6878_v62 = vld [vmem:[%s12324_s7 + $0x60] sm:$0xff]  ;;  %v7889_v54 = vpack.c.bf16 %v5027_v9, %v5026_v41 }
 0x7be   :  { %v4754_v18 = vmax.f32 %v4722_v49, 0.0  ;;  %v4608_v40 = vpop.f32.mrb[156].mxu1  ;;  %v5028_v49 = vld [vmem:[%s12323_s8 + $0x50] sm:$0xff] }
 0x7bf   :  { %v7838_v15 = vpack.c.bf16 %v4753_v56, %v4751_v29  ;;  %v4610_v4 = vpop.f32.mrb[157].mxu1  ;;  %v4723_v11 = vadd.f32 %v11581_v16, %v4608_v40  ;;  %v5029_v29 = vld [vmem:[%s12323_s8 + $0x58] sm:$0xff]  ;;  %v6900_v56 = vld [vmem:[%s12323_s8 + $0xf0] sm:$0xff]  ;;  %v6879_v40 = vld [vmem:[%s12324_s7 + $0x68] sm:$0xff] }
 0x7c0   :  { %v7836_v17 = vpack.c.bf16 %v4754_v18, %v4752_v22  ;;  %v4724_v31 = vadd.f32 %v11585_v6, %v4610_v4  ;;  %v6901_v22 = vld [vmem:[%s12323_s8 + $0xf8] sm:$0xff]  ;;  %v4764_v18 = vld [vmem:[%s12324_s7 + $0x28] sm:$0xff] }
 0x7c1   :  { %v4755_v10 = vmax.f32 %v4723_v11, 0.0  ;;  %v7922_v4 = vpack.c.bf16 %v6901_v22, %v6900_v56  ;;  %v5031_v11 = vld [vmem:[%s12323_s8 + $0x68] sm:$0xff] }
 0x7c2   :  { %v4614_v53 = vpop.f32.mrb[158].mxu1  ;;  %7837 = vmatprep.subr.bf16.mxu1 %v7836_v17  ;;  %7869 = vmatprep.subr.bf16.mxu0 %v7836_v17  ;;  %v4756_v35 = vmax.f32 %v4724_v31, 0.0  ;;  %v5030_v17 = vld [vmem:[%s12323_s8 + $0x60] sm:$0xff] }
 0x7c3   :  { %v4725_v0 = vadd.f32 %v11581_v16, %v4614_v53  ;;  %v4616_v50 = vpop.f32.mrb[159].mxu1  ;;  %7839 = vmatpush1.bf16.msra.mxu1 %v7838_v15  ;;  %7871 = vmatpush1.bf16.msra.mxu0 %v7838_v15  ;;  %v6890_v16 = vld [vmem:[%s12323_s8 + $0xa0] sm:$0xff]  ;;  %v7892_v15 = vpack.c.bf16 %v5029_v29, %v5028_v49  ;;  %v6903_v53 = vld [vmem:[%s12323_s8 + $0x108] sm:$0xff] }
 0x7c4   :  { %v4726_v37 = vadd.f32 %v11585_v6, %v4616_v50  ;;  %v6891_v6 = vld [vmem:[%s12323_s8 + $0xa8] sm:$0xff]  ;;  %v6902_v31 = vld [vmem:[%s12323_s8 + $0x100] sm:$0xff]  ;;  %v6880_v50 = vld [vmem:[%s12324_s7 + $0x70] sm:$0xff] }
 0x7c5   :  { %v4757_v27 = vmax.f32 %v4725_v0, 0.0  ;;  %v7907_v30 = vpack.c.bf16 %v6891_v6, %v6890_v16  ;;  %v4765_v0 = vld [vmem:[%s12324_s7 + $0x30] sm:$0xff]  ;;  %v5034_v6 = vld [vmem:[%s12323_s8 + $0x80] sm:$0xff] }
 0x7c6   :  { %v4758_v51 = vmax.f32 %v4726_v37, 0.0  ;;  %v7895_v37 = vpack.c.bf16 %v5031_v11, %v5030_v17 }
 0x7c7   :  { %v7842_v45 = vpack.c.bf16 %v4757_v27, %v4755_v10  ;;  %v7925_v10 = vpack.c.bf16 %v6903_v53, %v6902_v31  ;;  %v5032_v27 = vld [vmem:[%s12323_s8 + $0x70] sm:$0xff] }
 0x7c8   :  { %v7840_v13 = vpack.c.bf16 %v4758_v51, %v4756_v35  ;;  %v5033_v35 = vld [vmem:[%s12323_s8 + $0x78] sm:$0xff]  ;;  %v6904_v51 = vld [vmem:[%s12323_s8 + $0x110] sm:$0xff] }
 0x7c9   :  { %v7898_v23 = vpack.c.bf16 %v5033_v35, %v5032_v27 }
 0x7ca   :  { %7841 = vmatprep.subr.bf16.mxu1 %v7840_v13  ;;  %7873 = vmatprep.subr.bf16.mxu0 %v7840_v13  ;;  %v4766_v13 = vld [vmem:[%s12324_s7 + $0x38] sm:$0xff] }
 0x7cb   :  { %7843 = vmatpush1.bf16.msra.mxu1 %v7842_v45  ;;  %7875 = vmatpush1.bf16.msra.mxu0 %v7842_v45  ;;  %v6905_v45 = vld [vmem:[%s12323_s8 + $0x118] sm:$0xff] }
 0x7cc   :  { %7876 = vmatprep.subr.bf16.mxu1 %v8548_v19  ;;  %7906 = vmatprep.subr.bf16.mxu0 %v8548_v19  ;;  %v7928_v16 = vpack.c.bf16 %v6905_v45, %v6904_v51 }
 0x7ce   :  { %4832 = vmatmul.mubr.f32.vlgmr.msra.gmra.mrb[160].mxu1 %v4759_v34  ;;  %4954 = vmatmul.mubr.f32.vlgmr.msra.gmra.mrb[64].mxu0 %v6874_v36  ;;  %v5035_v34 = vld [vmem:[%s12323_s8 + $0x88] sm:$0xff]  ;;  %v6906_v36 = vld [vmem:[%s12323_s8 + $0x120] sm:$0xff] }
 0x7cf   :  { %4837 = vmatprep.mubr.f32.mxu1 %v8547_v3  ;;  %4959 = vmatprep.mubr.f32.mxu0 %v8547_v3 }
 0x7d0   :  { %7878 = vmatpush1.bf16.msra.mxu1 %v7877_v14  ;;  %7908 = vmatpush1.bf16.msra.mxu0 %v7907_v30  ;;  %v6907_v14 = vld [vmem:[%s12323_s8 + $0x128] sm:$0xff]  ;;  %v7901_v30 = vpack.c.bf16 %v5035_v34, %v5034_v6 }
 0x7d1   :  { %7879 = vmatprep.subr.bf16.mxu1 %v8548_v19  ;;  %7909 = vmatprep.subr.bf16.mxu0 %v8548_v19  ;;  %v7931_v60 = vpack.c.bf16 %v6907_v14, %v6906_v36 }
 0x7d2   :  { %4838 = vmatmul.mubr.f32.gmra.mrb[162].mxu1 %v4760_v57  ;;  %4960 = vmatmul.mubr.f32.gmra.mrb[66].mxu0 %v6875_v61  ;;  %v7904_v57 = vpack.c.bf16 %v5037_v63, %v5036_v21  ;;  %v6909_v61 = vld [vmem:[%s12323_s8 + $0x138] sm:$0xff] }
 0x7d3   :  { %4843 = vmatprep.mubr.f32.mxu1 %v8547_v3  ;;  %4965 = vmatprep.mubr.f32.mxu0 %v8547_v3 }
 0x7d4   :  { %7881 = vmatpush1.bf16.msra.mxu1 %v7880_v42  ;;  %7911 = vmatpush1.bf16.msra.mxu0 %v7910_v1  ;;  %v7934_v42 = vpack.c.bf16 %v6909_v61, %v6908_v46  ;;  %v6918_v1 = vld [vmem:[%s12325_s10 + $0x50] sm:$0xff]  ;;  %v6924_v46 = vld [vmem:[%s12325_s10 + $0x80] sm:$0xff] }
 0x7d5   :  { %7882 = vmatprep.subr.bf16.mxu1 %v8548_v19  ;;  %7912 = vmatprep.subr.bf16.mxu0 %v8548_v19  ;;  %v7936_v28 = vpack.c.bf16 %v6919_v55, %v6918_v1  ;;  %v6927_v1 = vld [vmem:[%s12325_s10 + $0x98] sm:$0xff] }
 0x7d6   :  { %4844 = vmatmul.mubr.f32.gmra.mrb[164].mxu1 %v4761_v12  ;;  %4966 = vmatmul.mubr.f32.gmra.mrb[68].mxu0 %v6876_v26  ;;  %v6920_v12 = vld [vmem:[%s12325_s10 + $0x60] sm:$0xff]  ;;  %v6921_v26 = vld [vmem:[%s12325_s10 + $0x68] sm:$0xff] }
 0x7d7   :  { %4849 = vmatprep.mubr.f32.mxu1 %v8547_v3  ;;  %4971 = vmatprep.mubr.f32.mxu0 %v8547_v3  ;;  %v7940_v7 = vpack.c.bf16 %v6921_v26, %v6920_v12 }
 0x7d8   :  { %7884 = vmatpush1.bf16.msra.mxu1 %v7883_v20  ;;  %7914 = vmatpush1.bf16.msra.mxu0 %v7913_v48 }
 0x7d9   :  { %7885 = vmatprep.subr.bf16.mxu1 %v8548_v19  ;;  %7915 = vmatprep.subr.bf16.mxu0 %v8548_v19 }
 0x7da   :  { %4850 = vmatmul.mubr.f32.gmra.mrb[166].mxu1 %v4762_v32  ;;  %4972 = vmatmul.mubr.f32.gmra.mrb[70].mxu0 %v6877_v8  ;;  %v6922_v8 = vld [vmem:[%s12325_s10 + $0x70] sm:$0xff] }
 0x7db   :  { %4855 = vmatprep.mubr.f32.mxu1 %v8547_v3  ;;  %4977 = vmatprep.mubr.f32.mxu0 %v8547_v3 }
 0x7dc   :  { %7887 = vmatpush1.bf16.msra.mxu1 %v7886_v24  ;;  %7917 = vmatpush1.bf16.msra.mxu0 %v7916_v33  ;;  %v6923_v24 = vld [vmem:[%s12325_s10 + $0x78] sm:$0xff] }
 0x7dd   :  { %7888 = vmatprep.subr.bf16.mxu1 %v8548_v19  ;;  %7918 = vmatprep.subr.bf16.mxu0 %v8548_v19  ;;  %v7944_v47 = vpack.c.bf16 %v6923_v24, %v6922_v8 }
 0x7de   :  { %4856 = vmatmul.mubr.f32.gmra.mrb[168].mxu1 %v4763_v38  ;;  %4978 = vmatmul.mubr.f32.gmra.mrb[72].mxu0 %v6878_v62 }
 0x7df   :  { %4861 = vmatprep.mubr.f32.mxu1 %v8547_v3  ;;  %4983 = vmatprep.mubr.f32.mxu0 %v8547_v3 }
 0x7e0   :  { %7890 = vmatpush1.bf16.msra.mxu1 %v7889_v54  ;;  %7920 = vmatpush1.bf16.msra.mxu0 %v7919_v58 }
 0x7e1   :  { %7891 = vmatprep.subr.bf16.mxu1 %v8548_v19  ;;  %7921 = vmatprep.subr.bf16.mxu0 %v8548_v19 }
 0x7e2   :  { %4862 = vmatmul.mubr.f32.gmra.mrb[170].mxu1 %v4764_v18  ;;  %4984 = vmatmul.mubr.f32.gmra.mrb[74].mxu0 %v6879_v40 }
 0x7e3   :  { %4867 = vmatprep.mubr.f32.mxu1 %v8547_v3  ;;  %4989 = vmatprep.mubr.f32.mxu0 %v8547_v3 }
 0x7e4   :  { %7893 = vmatpush1.bf16.msra.mxu1 %v7892_v15  ;;  %7923 = vmatpush1.bf16.msra.mxu0 %v7922_v4 }
 0x7e5   :  { %7894 = vmatprep.subr.bf16.mxu1 %v8548_v19  ;;  %7924 = vmatprep.subr.bf16.mxu0 %v8548_v19 }
 0x7e6   :  { %4868 = vmatmul.mubr.f32.gmra.mrb[172].mxu1 %v4765_v0  ;;  %4990 = vmatmul.mubr.f32.gmra.mrb[76].mxu0 %v6880_v50 }
 0x7e7   :  { %4873 = vmatprep.mubr.f32.mxu1 %v8547_v3  ;;  %4995 = vmatprep.mubr.f32.mxu0 %v8547_v3 }
 0x7e8   :  { %7896 = vmatpush1.bf16.msra.mxu1 %v7895_v37  ;;  %7926 = vmatpush1.bf16.msra.mxu0 %v7925_v10 }
 0x7e9   :  { %7897 = vmatprep.subr.bf16.mxu1 %v8548_v19  ;;  %7927 = vmatprep.subr.bf16.mxu0 %v8548_v19 }
 0x7ea   :  { %4874 = vmatmul.mubr.f32.gmra.mrb[174].mxu1 %v4766_v13  ;;  %4996 = vmatmul.mubr.f32.gmra.mrb[78].mxu0 %v6881_v25 }
 0x7ec   :  { %7899 = vmatpush1.bf16.msra.mxu1 %v7898_v23  ;;  %7929 = vmatpush1.bf16.msra.mxu0 %v7928_v16 }
 0x7ed   :  { %7900 = vmatprep.subr.bf16.mxu1 %v8548_v19  ;;  %7930 = vmatprep.subr.bf16.mxu0 %v8548_v19 }
 0x7f0   :  { %7902 = vmatpush1.bf16.msra.mxu1 %v7901_v30  ;;  %7932 = vmatpush1.bf16.msra.mxu0 %v7931_v60 }
 0x7f1   :  { %7903 = vmatprep.subr.bf16.mxu1 %v8548_v19  ;;  %7933 = vmatprep.subr.bf16.mxu0 %v8548_v19 }
 0x7f4   :  { %7905 = vmatpush1.bf16.msra.mxu1 %v7904_v57  ;;  %7935 = vmatpush1.bf16.msra.mxu0 %v7934_v42  ;;  %v6925_v57 = vld [vmem:[%s12325_s10 + $0x88] sm:$0xff]  ;;  %v6926_v42 = vld [vmem:[%s12325_s10 + $0x90] sm:$0xff] }
 0x7f5   :  { %8036 = vmatprep.subr.bf16.mxu0 %v8548_v19  ;;  %7937 = vmatprep.subr.bf16.mxu1 %v7936_v28  ;;  %v7948_v61 = vpack.c.bf16 %v6925_v57, %v6924_v46  ;;  %v7952_v55 = vpack.c.bf16 %v6927_v1, %v6926_v42 }
 0x8a1   :  { %v4833_v44 = vpop.f32.mrb[160].mxu1  ;;  %v4955_v59 = vpop.f32.mrb[64].mxu0 }
 0x8a2   :  { %v5002_v20 = vmax.f32 %v4833_v44, %v4955_v59  ;;  %v4835_v48 = vpop.f32.mrb[161].mxu1  ;;  %v4957_v52 = vpop.f32.mrb[65].mxu0  ;;  %v6947_v44 = vld [vmem:[%s12325_s10 + $0xf8] sm:$0xff] }
 0x8a3   :  { %v5003_v43 = vmax.f32 %v4835_v48, %v4957_v52 }
 0x8a5   :  { %v4839_v5 = vpop.f32.mrb[162].mxu1  ;;  %v4961_v32 = vpop.f32.mrb[66].mxu0  ;;  %6882 = vmatprep.mubr.msk.f32.mxu1 %vm5038_vm6, %v5003_v43  ;;  %6910 = vmatprep.mubr.msk.f32.mxu0 %vm5038_vm6, %v5003_v43 }
 0x8a6   :  { %v5004_v33 = vmax.f32 %v4839_v5, %v4961_v32  ;;  %v4841_v41 = vpop.f32.mrb[163].mxu1  ;;  %v4963_v9 = vpop.f32.mrb[67].mxu0  ;;  %5128 = vmatmul.mubr.f32.vlgmr.msra.gmra.mrb[176].mxu1 %v5002_v20  ;;  %5254 = vmatmul.mubr.f32.vlgmr.msra.gmra.mrb[80].mxu0 %v5002_v20 }
 0x8a7   :  { %v5005_v2 = vmax.f32 %v4841_v41, %v4963_v9  ;;  %7939 = vmatpush3.bf16.msra.mxu1 %v7936_v28  ;;  %v6946_v28 = vld [vmem:[%s12325_s10 + $0xf0] sm:$0xff] }
 0x8a8   :  { %7941 = vmatprep.subr.bf16.mxu1 %v7940_v7  ;;  %v7956_v59 = vpack.c.bf16 %v6947_v44, %v6946_v28  ;;  %v6964_v28 = vld [vmem:[%s12325_s10 + $0x140] sm:$0xff]  ;;  %v6965_v44 = vld [vmem:[%s12325_s10 + $0x148] sm:$0xff] }
 0x8a9   :  { %v4845_v38 = vpop.f32.mrb[164].mxu1  ;;  %v4967_v62 = vpop.f32.mrb[68].mxu0  ;;  %6883 = vmatprep.mubr.msk.f32.mxu1 %vm5038_vm6, %v5005_v2  ;;  %6911 = vmatprep.mubr.msk.f32.mxu0 %vm5038_vm6, %v5005_v2 }
 0x8aa   :  { %v5006_v54 = vmax.f32 %v4845_v38, %v4967_v62  ;;  %v4847_v58 = vpop.f32.mrb[165].mxu1  ;;  %v4969_v49 = vpop.f32.mrb[69].mxu0  ;;  %5133 = vmatmul.mubr.f32.gmra.mrb[178].mxu1 %v5004_v33  ;;  %5259 = vmatmul.mubr.f32.gmra.mrb[82].mxu0 %v5004_v33 }
 0x8ab   :  { %v5007_v29 = vmax.f32 %v4847_v58, %v4969_v49  ;;  %7943 = vmatpush3.bf16.msra.mxu1 %v7940_v7  ;;  %v6949_v58 = vld [vmem:[%s12325_s10 + $0x108] sm:$0xff] }
 0x8ac   :  { %7945 = vmatprep.subr.bf16.mxu1 %v7944_v47 }
 0x8ad   :  { %v4851_v56 = vpop.f32.mrb[166].mxu1  ;;  %v4973_v22 = vpop.f32.mrb[70].mxu0  ;;  %6884 = vmatprep.mubr.msk.f32.mxu1 %vm5038_vm6, %v5007_v29  ;;  %6912 = vmatprep.mubr.msk.f32.mxu0 %vm5038_vm6, %v5007_v29 }
 0x8ae   :  { %v5008_v18 = vmax.f32 %v4851_v56, %v4973_v22  ;;  %v4853_v40 = vpop.f32.mrb[167].mxu1  ;;  %v4975_v15 = vpop.f32.mrb[71].mxu0  ;;  %5138 = vmatmul.mubr.f32.gmra.mrb[180].mxu1 %v5006_v54  ;;  %5264 = vmatmul.mubr.f32.gmra.mrb[84].mxu0 %v5006_v54  ;;  %v6948_v54 = vld [vmem:[%s12325_s10 + $0x100] sm:$0xff] }
 0x8af   :  { %v5009_v4 = vmax.f32 %v4853_v40, %v4975_v15  ;;  %7947 = vmatpush3.bf16.msra.mxu1 %v7944_v47  ;;  %v7960_v22 = vpack.c.bf16 %v6949_v58, %v6948_v54 }
 0x8b0   :  { %7949 = vmatprep.subr.bf16.mxu1 %v7948_v61 }
 0x8b1   :  { %v4857_v17 = vpop.f32.mrb[168].mxu1  ;;  %v4979_v11 = vpop.f32.mrb[72].mxu0  ;;  %6885 = vmatprep.mubr.msk.f32.mxu1 %vm5038_vm6, %v5009_v4  ;;  %6913 = vmatprep.mubr.msk.f32.mxu0 %vm5038_vm6, %v5009_v4 }
 0x8b2   :  { %v5010_v31 = vmax.f32 %v4857_v17, %v4979_v11  ;;  %v4859_v53 = vpop.f32.mrb[169].mxu1  ;;  %v4981_v0 = vpop.f32.mrb[73].mxu0  ;;  %5143 = vmatmul.mubr.f32.gmra.mrb[182].mxu1 %v5008_v18  ;;  %5269 = vmatmul.mubr.f32.gmra.mrb[86].mxu0 %v5008_v18  ;;  %v6950_v17 = vld [vmem:[%s12325_s10 + $0x110] sm:$0xff]  ;;  %v6951_v11 = vld [vmem:[%s12325_s10 + $0x118] sm:$0xff] }
 0x8b3   :  { %v5011_v50 = vmax.f32 %v4859_v53, %v4981_v0  ;;  %7951 = vmatpush3.bf16.msra.mxu1 %v7948_v61 }
 0x8b4   :  { %7953 = vmatprep.subr.bf16.mxu1 %v7952_v55 }
 0x8b5   :  { %v4863_v37 = vpop.f32.mrb[170].mxu1  ;;  %v4985_v10 = vpop.f32.mrb[74].mxu0  ;;  %6886 = vmatprep.mubr.msk.f32.mxu1 %vm5038_vm6, %v5011_v50  ;;  %6914 = vmatprep.mubr.msk.f32.mxu0 %vm5038_vm6, %v5011_v50  ;;  %v7964_v50 = vpack.c.bf16 %v6951_v11, %v6950_v17 }
 0x8b6   :  { %v5012_v27 = vmax.f32 %v4863_v37, %v4985_v10  ;;  %v4865_v35 = vpop.f32.mrb[171].mxu1  ;;  %v4987_v51 = vpop.f32.mrb[75].mxu0  ;;  %5148 = vmatmul.mubr.f32.gmra.mrb[184].mxu1 %v5010_v31  ;;  %5274 = vmatmul.mubr.f32.gmra.mrb[88].mxu0 %v5010_v31 }
 0x8b7   :  { %v5013_v45 = vmax.f32 %v4865_v35, %v4987_v51  ;;  %7955 = vmatpush3.bf16.msra.mxu1 %v7952_v55  ;;  %v6952_v51 = vld [vmem:[%s12325_s10 + $0x120] sm:$0xff] }
 0x8b8   :  { %7957 = vmatprep.subr.bf16.mxu1 %v7956_v59 }
 0x8b9   :  { %v4869_v13 = vpop.f32.mrb[172].mxu1  ;;  %v4991_v25 = vpop.f32.mrb[76].mxu0  ;;  %6887 = vmatprep.mubr.msk.f32.mxu1 %vm5038_vm6, %v5013_v45  ;;  %6915 = vmatprep.mubr.msk.f32.mxu0 %vm5038_vm6, %v5013_v45  ;;  %v6953_v45 = vld [vmem:[%s12325_s10 + $0x128] sm:$0xff] }
 0x8ba   :  { %v5014_v23 = vmax.f32 %v4869_v13, %v4991_v25  ;;  %v4871_v16 = vpop.f32.mrb[173].mxu1  ;;  %v4993_v6 = vpop.f32.mrb[77].mxu0  ;;  %5153 = vmatmul.mubr.f32.gmra.mrb[186].mxu1 %v5012_v27  ;;  %5279 = vmatmul.mubr.f32.gmra.mrb[90].mxu0 %v5012_v27 }
 0x8bb   :  { %v5015_v34 = vmax.f32 %v4871_v16, %v4993_v6  ;;  %v7968_v16 = vpack.c.bf16 %v6953_v45, %v6952_v51 }
 0x8bd   :  { %v4875_v36 = vpop.f32.mrb[174].mxu1  ;;  %v4997_v14 = vpop.f32.mrb[78].mxu0  ;;  %6888 = vmatprep.mubr.msk.f32.mxu1 %vm5038_vm6, %v5015_v34  ;;  %6916 = vmatprep.mubr.msk.f32.mxu0 %vm5038_vm6, %v5015_v34 }
 0x8be   :  { %v5016_v30 = vmax.f32 %v4875_v36, %v4997_v14  ;;  %v4877_v60 = vpop.f32.mrb[175].mxu1  ;;  %v4999_v21 = vpop.f32.mrb[79].mxu0  ;;  %5158 = vmatmul.mubr.f32.gmra.mrb[188].mxu1 %v5014_v23  ;;  %5284 = vmatmul.mubr.f32.gmra.mrb[92].mxu0 %v5014_v23 }
 0x8bf   :  { %v5017_v63 = vmax.f32 %v4877_v60, %v4999_v21  ;;  %v6955_v60 = vld [vmem:[%s12325_s10 + $0x138] sm:$0xff] }
 0x8c1   :  { %6889 = vmatprep.mubr.msk.f32.mxu1 %vm5038_vm6, %v5017_v63  ;;  %6917 = vmatprep.mubr.msk.f32.mxu0 %vm5038_vm6, %v5017_v63 }
 0x8c2   :  { %5163 = vmatmul.mubr.f32.gmra.mrb[190].mxu1 %v5016_v30  ;;  %5289 = vmatmul.mubr.f32.gmra.mrb[94].mxu0 %v5016_v30  ;;  %v6954_v30 = vld [vmem:[%s12325_s10 + $0x130] sm:$0xff] }
 0x8c3   :  { %v7972_v57 = vpack.c.bf16 %v6955_v60, %v6954_v30  ;;  %7311 = vmatprep.mubr.msk.f32.mxu0 %vm8549_vm8, %v8547_v3 }
 0x979   :  { %v5129_v12 = vpop.f32.mrb[176].mxu1  ;;  %v5255_v26 = vpop.f32.mrb[80].mxu0 }
 0x97a   :  { %v11874_v20 = vmax.f32 %v5129_v12, %v5255_v26  ;;  %v5131_v48 = vpop.f32.mrb[177].mxu1  ;;  %v5257_v52 = vpop.f32.mrb[81].mxu0 }
 0x97c   :  { %v5312_v24 = vrot.slane %v11874_v20, 1  ;;  %v5496_v17 = vrot.slane %v11874_v20, 3 }
 0x97d   :  { %v5134_v43 = vpop.f32.mrb[178].mxu1  ;;  %v5260_v7 = vpop.f32.mrb[82].mxu0 }
 0x97e   :  { %v11876_v5 = vmax.f32 %v5134_v43, %v5260_v7  ;;  %v5136_v32 = vpop.f32.mrb[179].mxu1  ;;  %v5262_v8 = vpop.f32.mrb[83].mxu0 }
 0x97f   :  { %v7976_v8 = vpack.c.bf16 %v6965_v44, %v6964_v28  ;;  %v5303_v28 = vld [vmem:[%s12325_s10 + $0x8] sm:$0xff] }
 0x980   :  { %v5313_v33 = vrot.slane %v11876_v5, 1  ;;  %v5497_v58 = vrot.slane %v11876_v5, 3 }
 0x981   :  { %v5139_v41 = vpop.f32.mrb[180].mxu1  ;;  %v5265_v9 = vpop.f32.mrb[84].mxu0 }
 0x982   :  { %v11880_v2 = vmax.f32 %v5139_v41, %v5265_v9  ;;  %v5141_v47 = vpop.f32.mrb[181].mxu1  ;;  %v5267_v38 = vpop.f32.mrb[85].mxu0  ;;  %v5326_v62 = vsel %vm143_vm0, %v5312_v24, %v5313_v33 }
 0x983   :  { %7155 = vmatprep.mubr.msk.f32.mxu1 %vm5339_vm7, %v5326_v62 }
 0x984   :  { %v5314_v49 = vrot.slane %v11880_v2, 1 }
 0x985   :  { %v5144_v29 = vpop.f32.mrb[182].mxu1  ;;  %v5270_v56 = vpop.f32.mrb[86].mxu0 }
 0x986   :  { %v11894_v18 = vmax.f32 %v5144_v29, %v5270_v56  ;;  %v5325_v40 = vsel %vm143_vm0, %v5313_v33, %v5314_v49  ;;  %v5146_v15 = vpop.f32.mrb[183].mxu1  ;;  %v5272_v4 = vpop.f32.mrb[87].mxu0 }
 0x987   :  { %7156 = vmatmul.mubr.msk.f32.vlgmr.msra.gmra.mrb[192].mxu1 %vm5339_vm7, %v5325_v40 }
 0x988   :  { %7959 = vmatpush3.bf16.msra.mxu1 %v7956_v59  ;;  %v5315_v31 = vrot.slane %v11894_v18, 1 }
 0x989   :  { %v5149_v53 = vpop.f32.mrb[184].mxu1  ;;  %v5275_v0 = vpop.f32.mrb[88].mxu0  ;;  %7961 = vmatprep.subr.bf16.mxu1 %v7960_v22 }
 0x98a   :  { %v11906_v37 = vmax.f32 %v5149_v53, %v5275_v0  ;;  %v5151_v10 = vpop.f32.mrb[185].mxu1  ;;  %v5277_v27 = vpop.f32.mrb[89].mxu0  ;;  %v5324_v35 = vsel %vm143_vm0, %v5314_v49, %v5315_v31  ;;  %v6966_v53 = vld [vmem:[%s12325_s10 + $0x150] sm:$0xff]  ;;  %v6967_v0 = vld [vmem:[%s12325_s10 + $0x158] sm:$0xff] }
 0x98b   :  { %7158 = vmatprep.mubr.msk.f32.mxu1 %vm5339_vm7, %v5324_v35  ;;  %v5510_v10 = vsel %vm677_vm2, %v5496_v17, %v5497_v58  ;;  %v5499_v27 = vrot.slane %v11894_v18, 3  ;;  %v7980_v35 = vpack.c.bf16 %v6967_v0, %v6966_v53  ;;  %v6936_v53 = vld [vmem:[%s12325_s10 + $0xa0] sm:$0xff]  ;;  %v6937_v0 = vld [vmem:[%s12325_s10 + $0xa8] sm:$0xff] }
 0x98c   :  { %7963 = vmatpush3.bf16.msra.mxu1 %v7960_v22  ;;  %v5316_v13 = vrot.slane %v11906_v37, 1  ;;  %v5500_v45 = vrot.slane %v11906_v37, 3 }
 0x98d   :  { %v5154_v25 = vpop.f32.mrb[186].mxu1  ;;  %v5280_v23 = vpop.f32.mrb[90].mxu0  ;;  %7965 = vmatprep.subr.bf16.mxu1 %v7964_v50 }
 0x98e   :  { %v11918_v6 = vmax.f32 %v5154_v25, %v5280_v23  ;;  %v5156_v34 = vpop.f32.mrb[187].mxu1  ;;  %v5282_v36 = vpop.f32.mrb[91].mxu0  ;;  %v5323_v14 = vsel %vm143_vm0, %v5315_v31, %v5316_v13  ;;  %v5498_v31 = vrot.slane %v11880_v2, 3  ;;  %v6969_v25 = vld [vmem:[%s12325_s10 + $0x168] sm:$0xff] }
 0x98f   :  { %7159 = vmatmul.mubr.msk.f32.gmra.mrb[194].mxu1 %vm5339_vm7, %v5323_v14  ;;  %v5507_v34 = vsel %vm677_vm2, %v5499_v27, %v5500_v45  ;;  %v6970_v36 = vld [vmem:[%s12325_s10 + $0x170] sm:$0xff]  ;;  %v6971_v14 = vld [vmem:[%s12325_s10 + $0x178] sm:$0xff] }
 0x990   :  { %7967 = vmatpush3.bf16.msra.mxu1 %v7964_v50  ;;  %v5317_v21 = vrot.slane %v11918_v6, 1  ;;  %v5501_v59 = vrot.slane %v11918_v6, 3  ;;  %v5657_v12 = vrot.slane %v11918_v6, 4  ;;  %v5474_v33 = vrot.slane %v11918_v6, 2 }
 0x991   :  { %v5159_v63 = vpop.f32.mrb[188].mxu1  ;;  %v5285_v46 = vpop.f32.mrb[92].mxu0  ;;  %7969 = vmatprep.subr.bf16.mxu1 %v7968_v16  ;;  %v5509_v51 = vsel %vm677_vm2, %v5497_v58, %v5498_v31  ;;  %v5508_v23 = vsel %vm677_vm2, %v5498_v31, %v5499_v27  ;;  %v7988_v60 = vpack.c.bf16 %v6971_v14, %v6970_v36  ;;  %v6940_v27 = vld [vmem:[%s12325_s10 + $0xc0] sm:$0xff]  ;;  %v5469_v36 = vrot.slane %v11874_v20, 2 }
 0x992   :  { %v11930_v61 = vmax.f32 %v5159_v63, %v5285_v46  ;;  %v5161_v42 = vpop.f32.mrb[189].mxu1  ;;  %v5287_v1 = vpop.f32.mrb[93].mxu0  ;;  %v5322_v55 = vsel %vm143_vm0, %v5316_v13, %v5317_v21  ;;  %v6968_v13 = vld [vmem:[%s12325_s10 + $0x160] sm:$0xff]  ;;  %v5506_v30 = vsel %vm677_vm2, %v5500_v45, %v5501_v59  ;;  %v6973_v63 = vld [vmem:[%s12325_s10 + $0x188] sm:$0xff]  ;;  %v5653_v46 = vrot.slane %v11876_v5, 4  ;;  %v6942_v45 = vld [vmem:[%s12325_s10 + $0xd0] sm:$0xff] }
 0x993   :  { %7161 = vmatprep.mubr.msk.f32.mxu1 %vm5339_vm7, %v5322_v55  ;;  %v5652_v42 = vrot.slane %v11874_v20, 4  ;;  %v5302_v55 = vld [vmem:[%s12325_s10] sm:$0xff] }
 0x994   :  { %v5318_v26 = vrot.slane %v11930_v61, 1  ;;  %7971 = vmatpush3.bf16.msra.mxu1 %v7968_v16  ;;  %v5502_v48 = vrot.slane %v11930_v61, 3  ;;  %v5658_v52 = vrot.slane %v11930_v61, 4  ;;  %v5475_v43 = vrot.slane %v11930_v61, 2 }
 0x995   :  { %v5164_v7 = vpop.f32.mrb[190].mxu1  ;;  %v5290_v32 = vpop.f32.mrb[94].mxu0  ;;  %7973 = vmatprep.subr.bf16.mxu1 %v7972_v57  ;;  %v7984_v16 = vpack.c.bf16 %v6969_v25, %v6968_v13  ;;  %v5666_v44 = vsel %vm1120_vm3, %v5652_v42, %v5653_v46  ;;  %v6943_v13 = vld [vmem:[%s12325_s10 + $0xd8] sm:$0xff] }
 0x996   :  { %v11948_v41 = vmax.f32 %v5164_v7, %v5290_v32  ;;  %v5321_v9 = vsel %vm143_vm0, %v5317_v21, %v5318_v26  ;;  %v5505_v47 = vsel %vm677_vm2, %v5501_v59, %v5502_v48  ;;  %v11958_v38 = vsel %vm1120_vm3, %v5657_v12, %v5658_v52  ;;  %v5166_v62 = vpop.f32.mrb[191].mxu1  ;;  %v5292_v54 = vpop.f32.mrb[95].mxu0  ;;  %v6972_v21 = vld [vmem:[%s12325_s10 + $0x180] sm:$0xff] }
 0x997   :  { %7162 = vmatmul.mubr.msk.f32.gmra.mrb[196].mxu1 %vm5339_vm7, %v5321_v9  ;;  %v11966_v49 = vsel %vm587_vm4, %v5474_v33, %v5475_v43  ;;  %v7996_v59 = vpack.c.bf16 %v5303_v28, %v5302_v55  ;;  %v5306_v9 = vld [vmem:[%s12325_s10 + $0x20] sm:$0xff]  ;;  %v8028_v25 = vpack.c.bf16 %v6943_v13, %v6942_v45  ;;  %v6166_v55 = vld [vmem:[%s12326_s12 + $0x8] sm:$0xff]  ;;  %v6261_v45 = vld [vmem:[%s12329_s14 + $0x10] sm:$0xff] }
 0x998   :  { %v5319_v29 = vrot.slane %v11948_v41, 1  ;;  %7975 = vmatpush3.bf16.msra.mxu1 %v7972_v57  ;;  %v5503_v56 = vrot.slane %v11948_v41, 3  ;;  %v5659_v22 = vrot.slane %v11948_v41, 4  ;;  %v5476_v40 = vrot.slane %v11948_v41, 2  ;;  %v6262_v13 = vld [vmem:[%s12329_s14 + $0x18] sm:$0xff] }
 0x999   :  { %7977 = vmatprep.subr.bf16.mxu1 %v7976_v8  ;;  %v7992_v57 = vpack.c.bf16 %v6973_v63, %v6972_v21 }
 0x99a   :  { %v5320_v15 = vsel %vm143_vm0, %v5318_v26, %v5319_v29  ;;  %v5327_v4 = vsel %vm143_vm0, %v5319_v29, %v5312_v24  ;;  %v5504_v11 = vsel %vm677_vm2, %v5502_v48, %v5503_v56  ;;  %v11993_v24 = vsel %vm1120_vm3, %v5658_v52, %v5659_v22  ;;  %v5304_v48 = vld [vmem:[%s12325_s10 + $0x10] sm:$0xff]  ;;  %v5305_v52 = vld [vmem:[%s12325_s10 + $0x18] sm:$0xff] }
 0x99b   :  { %7164 = vmatprep.mubr.msk.f32.mxu1 %vm5339_vm7, %v5320_v15  ;;  %v11999_v50 = vsel %vm587_vm4, %v5475_v43, %v5476_v40  ;;  %v5511_v1 = vsel %vm677_vm2, %v5503_v56, %v5496_v17  ;;  %v5654_v26 = vrot.slane %v11880_v2, 4  ;;  %v5655_v43 = vrot.slane %v11894_v18, 4  ;;  %v5308_v29 = vld [vmem:[%s12325_s10 + $0x30] sm:$0xff]  ;;  %v5309_v56 = vld [vmem:[%s12325_s10 + $0x38] sm:$0xff]  ;;  %v5310_v17 = vld [vmem:[%s12325_s10 + $0x40] sm:$0xff] }
 0x99c   :  { %7165 = vmatmul.mubr.msk.f32.gmra.mrb[198].mxu1 %vm5339_vm7, %v5327_v4  ;;  %v8000_v7 = vpack.c.bf16 %v5305_v52, %v5304_v48  ;;  %v8008_v4 = vpack.c.bf16 %v5309_v56, %v5308_v29  ;;  %v5667_v31 = vsel %vm1120_vm3, %v5659_v22, %v5652_v42  ;;  %v6938_v22 = vld [vmem:[%s12325_s10 + $0xb0] sm:$0xff]  ;;  %v6168_v48 = vld [vmem:[%s12326_s12 + $0x18] sm:$0xff] }
 0x99d   :  { %7187 = vmatprep.mubr.msk.f32.mxu1 %vm5339_vm7, %v5510_v10  ;;  %v5665_v32 = vsel %vm1120_vm3, %v5653_v46, %v5654_v26  ;;  %v5664_v62 = vsel %vm1120_vm3, %v5654_v26, %v5655_v43  ;;  %v6167_v26 = vld [vmem:[%s12326_s12 + $0x10] sm:$0xff]  ;;  %v6176_v56 = vld [vmem:[%s12326_s12 + $0x58] sm:$0xff] }
 0x99e   :  { %v8052_v52 = vpack.c.bf16 %v6168_v48, %v6167_v26  ;;  %v6175_v29 = vld [vmem:[%s12326_s12 + $0x50] sm:$0xff] }
 0x9a0   :  { %7188 = vmatmul.mubr.msk.f32.vlgmr.msra.gmra.mrb[192].mxu1 %vm5339_vm7, %v5509_v51 }
 0x9a1   :  { %7979 = vmatpush3.bf16.msra.mxu1 %v7976_v8  ;;  %7190 = vmatprep.mubr.msk.f32.mxu1 %vm5339_vm7, %v5508_v23  ;;  %v5656_v8 = vrot.slane %v11906_v37, 4  ;;  %v6944_v23 = vld [vmem:[%s12325_s10 + $0xe0] sm:$0xff] }
 0x9a2   :  { %7981 = vmatprep.subr.bf16.mxu1 %v7980_v35 }
 0x9a3   :  { %v5663_v58 = vsel %vm1120_vm3, %v5655_v43, %v5656_v8  ;;  %v5662_v15 = vsel %vm1120_vm3, %v5656_v8, %v5657_v12  ;;  %v6169_v43 = vld [vmem:[%s12326_s12 + $0x20] sm:$0xff]  ;;  %v6171_v8 = vld [vmem:[%s12326_s12 + $0x30] sm:$0xff] }
 0x9a4   :  { %7191 = vmatmul.mubr.msk.f32.gmra.mrb[194].mxu1 %vm5339_vm7, %v5507_v34  ;;  %v5470_v34 = vrot.slane %v11876_v5, 2 }
 0x9a5   :  { %7983 = vmatpush3.bf16.msra.mxu1 %v7980_v35  ;;  %7193 = vmatprep.mubr.msk.f32.mxu1 %vm5339_vm7, %v5506_v30  ;;  %v6941_v35 = vld [vmem:[%s12325_s10 + $0xc8] sm:$0xff] }
 0x9a6   :  { %7985 = vmatprep.subr.bf16.mxu1 %v7984_v16  ;;  %v8024_v51 = vpack.c.bf16 %v6941_v35, %v6940_v27  ;;  %v5483_v30 = vsel %vm587_vm4, %v5469_v36, %v5470_v34 }
 0x9a8   :  { %7194 = vmatmul.mubr.msk.f32.gmra.mrb[196].mxu1 %vm5339_vm7, %v5505_v47  ;;  %v5307_v47 = vld [vmem:[%s12325_s10 + $0x28] sm:$0xff] }
 0x9a9   :  { %7987 = vmatpush3.bf16.msra.mxu1 %v7984_v16  ;;  %7196 = vmatprep.mubr.msk.f32.mxu1 %vm5339_vm7, %v5504_v11  ;;  %v8004_v54 = vpack.c.bf16 %v5307_v47, %v5306_v9  ;;  %v5311_v11 = vld [vmem:[%s12325_s10 + $0x48] sm:$0xff]  ;;  %v6172_v9 = vld [vmem:[%s12326_s12 + $0x38] sm:$0xff] }
 0x9aa   :  { %7989 = vmatprep.subr.bf16.mxu1 %v7988_v60  ;;  %v8012_v12 = vpack.c.bf16 %v5311_v11, %v5310_v17  ;;  %v6945_v16 = vld [vmem:[%s12325_s10 + $0xe8] sm:$0xff]  ;;  %v8058_v47 = vpack.c.bf16 %v6172_v9, %v6171_v8 }
 0x9ab   :  { %v8032_v14 = vpack.c.bf16 %v6945_v16, %v6944_v23  ;;  %v6178_v17 = vld [vmem:[%s12326_s12 + $0x68] sm:$0xff]  ;;  %v6263_v23 = vld [vmem:[%s12329_s14 + $0x20] sm:$0xff] }
 0x9ac   :  { %7197 = vmatmul.mubr.msk.f32.gmra.mrb[198].mxu1 %vm5339_vm7, %v5511_v1  ;;  %v6165_v1 = vld [vmem:[%s12326_s12] sm:$0xff]  ;;  %v6264_v16 = vld [vmem:[%s12329_s14 + $0x28] sm:$0xff] }
 0x9ad   :  { %7991 = vmatpush3.bf16.msra.mxu1 %v7988_v60  ;;  %7219 = vmatprep.mubr.msk.f32.mxu1 %vm5339_vm7, %v5666_v44  ;;  %v5472_v60 = vrot.slane %v11894_v18, 2  ;;  %v6082_v44 = vld [vmem:[%s12327_s9] sm:$0xff] }
 0x9ae   :  { %7993 = vmatprep.subr.bf16.mxu1 %v7992_v57 }
 0x9b1   :  { %7995 = vmatpush3.bf16.msra.mxu1 %v7992_v57 }
 0x9b2   :  { %7997 = vmatprep.subr.bf16.mxu1 %v7996_v59 }
 0x9b4   :  { %7220 = vmatmul.mubr.msk.f32.vlgmr.msra.gmra.mrb[192].mxu1 %vm5339_vm7, %v5665_v32 }
 0x9b5   :  { %7999 = vmatpush3.bf16.msra.mxu1 %v7996_v59  ;;  %7222 = vmatprep.mubr.msk.f32.mxu1 %vm5339_vm7, %v5664_v62  ;;  %v8049_v59 = vpack.c.bf16 %v6166_v55, %v6165_v1  ;;  %v6173_v62 = vld [vmem:[%s12326_s12 + $0x40] sm:$0xff] }
 0x9b6   :  { %8001 = vmatprep.subr.bf16.mxu1 %v8000_v7 }
 0x9b8   :  { %7223 = vmatmul.mubr.msk.f32.gmra.mrb[194].mxu1 %vm5339_vm7, %v5663_v58 }
 0x9b9   :  { %8003 = vmatpush3.bf16.msra.mxu1 %v8000_v7  ;;  %7225 = vmatprep.mubr.msk.f32.mxu1 %vm5339_vm7, %v5662_v15  ;;  %v6170_v7 = vld [vmem:[%s12326_s12 + $0x28] sm:$0xff]  ;;  %v8064_v15 = vpack.c.bf16 %v6176_v56, %v6175_v29 }
 0x9ba   :  { %8005 = vmatprep.subr.bf16.mxu1 %v8004_v54  ;;  %v8055_v32 = vpack.c.bf16 %v6170_v7, %v6169_v43 }
 0x9bc   :  { %7226 = vmatmul.mubr.msk.f32.gmra.mrb[196].mxu1 %vm5339_vm7, %v11958_v38  ;;  %v8016_v38 = vpack.c.bf16 %v6937_v0, %v6936_v53  ;;  %v6998_v0 = vld [vmem:[%s12328_s11] ss:$0 sm:$0xff] }
 0x9bd   :  { %8007 = vmatpush3.bf16.msra.mxu1 %v8004_v54  ;;  %7228 = vmatprep.mubr.msk.f32.mxu1 %vm5339_vm7, %v11993_v24  ;;  %v6939_v24 = vld [vmem:[%s12325_s10 + $0xb8] sm:$0xff]  ;;  %v6174_v54 = vld [vmem:[%s12326_s12 + $0x48] sm:$0xff] }
 0x9be   :  { %8009 = vmatprep.subr.bf16.mxu1 %v8008_v4  ;;  %v8020_v10 = vpack.c.bf16 %v6939_v24, %v6938_v22  ;;  %v8061_v58 = vpack.c.bf16 %v6174_v54, %v6173_v62  ;;  %v6260_v22 = vld [vmem:[%s12329_s14 + $0x8] sm:$0xff] }
 0x9c0   :  { %7229 = vmatmul.mubr.msk.f32.gmra.mrb[198].mxu1 %vm5339_vm7, %v5667_v31  ;;  %v6180_v31 = vld [vmem:[%s12326_s12 + $0x78] sm:$0xff] }
 0x9c1   :  { %8011 = vmatpush3.bf16.msra.mxu1 %v8008_v4  ;;  %7251 = vmatprep.mubr.msk.f32.mxu1 %vm5339_vm7, %v11874_v20  ;;  %v5473_v20 = vrot.slane %v11906_v37, 2  ;;  %v6177_v4 = vld [vmem:[%s12326_s12 + $0x60] sm:$0xff] }
 0x9c2   :  { %8013 = vmatprep.subr.bf16.mxu1 %v8012_v12  ;;  %v8067_v11 = vpack.c.bf16 %v6178_v17, %v6177_v4 }
 0x9c3   :  { %v5480_v63 = vsel %vm587_vm4, %v5472_v60, %v5473_v20 }
 0x9c5   :  { %8015 = vmatpush3.bf16.msra.mxu1 %v8012_v12  ;;  %v6179_v12 = vld [vmem:[%s12326_s12 + $0x70] sm:$0xff] }
 0x9c6   :  { %8017 = vmatprep.subr.bf16.mxu1 %v8016_v38  ;;  %v8070_v53 = vpack.c.bf16 %v6180_v31, %v6179_v12 }
 0x9c8   :  { %7252 = vmatmul.mubr.msk.f32.vlgmr.msra.gmra.mrb[192].mxu1 %vm5339_vm7, %v11876_v5  ;;  %v5471_v5 = vrot.slane %v11880_v2, 2 }
 0x9c9   :  { %7254 = vmatprep.mubr.msk.f32.mxu1 %vm5339_vm7, %v11880_v2  ;;  %8019 = vmatpush3.bf16.msra.mxu1 %v8016_v38  ;;  %v5479_v2 = vsel %vm587_vm4, %v5473_v20, %v5474_v33  ;;  %v6259_v38 = vld [vmem:[%s12329_s14] sm:$0xff]  ;;  %v6270_v20 = vld [vmem:[%s12329_s14 + $0x58] sm:$0xff] }
 0x9ca   :  { %8021 = vmatprep.subr.bf16.mxu1 %v8020_v10  ;;  %v5481_v21 = vsel %vm587_vm4, %v5471_v5, %v5472_v60  ;;  %v8073_v35 = vpack.c.bf16 %v6260_v22, %v6259_v38 }
 0x9cc   :  { %7255 = vmatmul.mubr.msk.f32.gmra.mrb[194].mxu1 %vm5339_vm7, %v11894_v18  ;;  %v5484_v18 = vsel %vm587_vm4, %v5476_v40, %v5469_v36  ;;  %v6265_v36 = vld [vmem:[%s12329_s14 + $0x30] sm:$0xff] }
 0x9cd   :  { %7257 = vmatprep.mubr.msk.f32.mxu1 %vm5339_vm7, %v11906_v37  ;;  %8023 = vmatpush3.bf16.msra.mxu1 %v8020_v10 }
 0x9ce   :  { %8025 = vmatprep.subr.bf16.mxu1 %v8024_v51 }
 0x9d0   :  { %7258 = vmatmul.mubr.msk.f32.gmra.mrb[196].mxu1 %vm5339_vm7, %v11918_v6 }
 0x9d1   :  { %7260 = vmatprep.mubr.msk.f32.mxu1 %vm5339_vm7, %v11930_v61  ;;  %8027 = vmatpush3.bf16.msra.mxu1 %v8024_v51  ;;  %v5482_v61 = vsel %vm587_vm4, %v5470_v34, %v5471_v5  ;;  %v8079_v34 = vpack.c.bf16 %v6264_v16, %v6263_v23  ;;  %v6268_v5 = vld [vmem:[%s12329_s14 + $0x48] sm:$0xff] }
 0x9d2   :  { %8029 = vmatprep.subr.bf16.mxu1 %v8028_v25 }
 0x9d4   :  { %7261 = vmatmul.mubr.msk.f32.gmra.mrb[198].mxu1 %vm5339_vm7, %v11948_v41 }
 0x9d5   :  { %8031 = vmatpush3.bf16.msra.mxu1 %v8028_v25  ;;  %7283 = vmatprep.mubr.msk.f32.mxu1 %vm5339_vm7, %v5483_v30  ;;  %v8076_v25 = vpack.c.bf16 %v6262_v13, %v6261_v45  ;;  %v6267_v30 = vld [vmem:[%s12329_s14 + $0x40] sm:$0xff] }
 0x9d6   :  { %8033 = vmatprep.subr.bf16.mxu1 %v8032_v14  ;;  %v8085_v60 = vpack.c.bf16 %v6268_v5, %v6267_v30 }
 0x9d9   :  { %8035 = vmatpush3.bf16.msra.mxu1 %v8032_v14 }
 0x9dc   :  { %7284 = vmatmul.mubr.msk.f32.vlgmr.msra.gmra.mrb[192].mxu1 %vm5339_vm7, %v5482_v61  ;;  %v6269_v61 = vld [vmem:[%s12329_s14 + $0x50] sm:$0xff] }
 0x9dd   :  { %7286 = vmatprep.mubr.msk.f32.mxu1 %vm5339_vm7, %v5481_v21  ;;  %v8088_v21 = vpack.c.bf16 %v6270_v20, %v6269_v61 }
 0x9e0   :  { %7287 = vmatmul.mubr.msk.f32.gmra.mrb[194].mxu1 %vm5339_vm7, %v5480_v63  ;;  %v6271_v63 = vld [vmem:[%s12329_s14 + $0x60] sm:$0xff] }
 0x9e1   :  { %7289 = vmatprep.mubr.msk.f32.mxu1 %vm5339_vm7, %v5479_v2  ;;  %v6272_v2 = vld [vmem:[%s12329_s14 + $0x68] sm:$0xff] }
 0x9e4   :  { %7290 = vmatmul.mubr.msk.f32.gmra.mrb[196].mxu1 %vm5339_vm7, %v11966_v49 }
 0x9e5   :  { %7292 = vmatprep.mubr.msk.f32.mxu1 %vm5339_vm7, %v11999_v50 }
 0x9e8   :  { %7293 = vmatmul.mubr.msk.f32.gmra.mrb[198].mxu1 %vm5339_vm7, %v5484_v18  ;;  %v8091_v18 = vpack.c.bf16 %v6272_v2, %v6271_v63 }
 0xaaf   :  { %v7285_v37 = vpop.f32.mrb[192].mxu1 }
 0xab0   :  { %v6027_v6 = vpop.f32.mrb[193].mxu1 }
 0xab1   :  { %v8037_v33 = vpack.c.bf16 %v7285_v37, %v6027_v6  ;;  %v6273_v37 = vld [vmem:[%s12329_s14 + $0x70] sm:$0xff]  ;;  %v6274_v6 = vld [vmem:[%s12329_s14 + $0x78] sm:$0xff] }
 0xab3   :  { %v7288_v46 = vpop.f32.mrb[194].mxu1  ;;  %8038 = vmatpush3.bf16.msra.mxu0 %v8037_v33  ;;  %v8094_v33 = vpack.c.bf16 %v6274_v6, %v6273_v37 }
 0xab4   :  { %v6037_v49 = vpop.f32.mrb[195].mxu1  ;;  %8039 = vmatprep.subr.bf16.mxu0 %v8548_v19 }
 0xab5   :  { %v8040_v50 = vpack.c.bf16 %v7288_v46, %v6037_v49  ;;  %v7000_v46 = vld [vmem:[%s12330_s13] ss:$0 sm:$0xff] }
 0xab7   :  { %v7291_v57 = vpop.f32.mrb[196].mxu1  ;;  %8041 = vmatpush3.bf16.msra.mxu0 %v8040_v50 }
 0xab8   :  { %v6047_v41 = vpop.f32.mrb[197].mxu1  ;;  %8042 = vmatprep.subr.bf16.mxu0 %v8548_v19 }
 0xab9   :  { %v8043_v39 = vpack.c.bf16 %v7291_v57, %v6047_v41 }
 0xabb   :  { %v7294_v40 = vpop.f32.mrb[198].mxu1  ;;  %8044 = vmatpush3.bf16.msra.mxu0 %v8043_v39 }
 0xabc   :  { %v6057_v42 = vpop.f32.mrb[199].mxu1  ;;  %8045 = vmatprep.subr.bf16.mxu0 %v8548_v19 }
 0xabd   :  { %v8046_v28 = vpack.c.bf16 %v7294_v40, %v6057_v42 }
 0xabf   :  { %8047 = vmatpush3.bf16.msra.mxu0 %v8046_v28 }
 0xac0   :  { %8048 = vmatprep.subr.bf16.mxu0 %v8548_v19 }
 0xac2   :  { %7312 = vmatmul.mubr.msk.f32.vlgmr.msra.gmra.mrb[96].mxu0 %vm6090_vm9, %v6082_v44 }
 0xac3   :  { %8050 = vmatpush3.bf16.msra.mxu0 %v8049_v59  ;;  %7346 = vmatprep.mubr.msk.f32.mxu0 %vm8549_vm8, %v8547_v3 }
 0xac4   :  { %8051 = vmatprep.subr.bf16.mxu0 %v8548_v19 }
 0xac7   :  { %8053 = vmatpush3.bf16.msra.mxu0 %v8052_v52 }
 0xac8   :  { %8054 = vmatprep.subr.bf16.mxu0 %v8548_v19 }
 0xacb   :  { %8056 = vmatpush3.bf16.msra.mxu0 %v8055_v32 }
 0xacc   :  { %8057 = vmatprep.subr.bf16.mxu0 %v8548_v19 }
 0xacf   :  { %8059 = vmatpush3.bf16.msra.mxu0 %v8058_v47 }
 0xad0   :  { %8060 = vmatprep.subr.bf16.mxu0 %v8548_v19 }
 0xad3   :  { %8062 = vmatpush3.bf16.msra.mxu0 %v8061_v58 }
 0xad4   :  { %8063 = vmatprep.subr.bf16.mxu0 %v8548_v19 }
 0xad7   :  { %8065 = vmatpush3.bf16.msra.mxu0 %v8064_v15 }
 0xad8   :  { %8066 = vmatprep.subr.bf16.mxu0 %v8548_v19 }
 0xadb   :  { %8068 = vmatpush3.bf16.msra.mxu0 %v8067_v11 }
 0xadc   :  { %8069 = vmatprep.subr.bf16.mxu0 %v8548_v19 }
 0xadf   :  { %8071 = vmatpush3.bf16.msra.mxu0 %v8070_v53 }
 0xae0   :  { %8072 = vmatprep.subr.bf16.mxu0 %v8548_v19 }
 0xb95   :  { %v6160_v24 = vpop.f32.mrb[96].mxu0 }
 0xb96   :  { %v6161_v10 = vadd.f32 %v6998_v0, %v6160_v24  ;;  %v7313_v27 = vpop.f32.mrb[97].mxu0 }
 0xb98   :  { %v6164_v51 = vmax.f32 %v6161_v10, 0.0 }
 0xb9a   :  { %7347 = vmatmul.mubr.f32.vlgmr.msra.gmra.mrb[98].mxu0 %v6164_v51 }
 0xb9b   :  { %8074 = vmatpush3.bf16.msra.mxu0 %v8073_v35  ;;  %7381 = vmatprep.mubr.msk.f32.mxu0 %vm8549_vm8, %v8547_v3  ;;  %v6266_v3 = vld [vmem:[%s12329_s14 + $0x38] sm:$0xff] }
 0xb9c   :  { %8075 = vmatprep.subr.bf16.mxu0 %v8548_v19  ;;  %v8082_v14 = vpack.c.bf16 %v6266_v3, %v6265_v36 }
 0xb9f   :  { %8077 = vmatpush3.bf16.msra.mxu0 %v8076_v25 }
 0xba0   :  { %8078 = vmatprep.subr.bf16.mxu0 %v8548_v19 }
 0xba3   :  { %8080 = vmatpush3.bf16.msra.mxu0 %v8079_v34 }
 0xba4   :  { %8081 = vmatprep.subr.bf16.mxu0 %v8548_v19 }
 0xba7   :  { %8083 = vmatpush3.bf16.msra.mxu0 %v8082_v14 }
 0xba8   :  { %8084 = vmatprep.subr.bf16.mxu0 %v8548_v19 }
 0xbab   :  { %8086 = vmatpush3.bf16.msra.mxu0 %v8085_v60 }
 0xbac   :  { %8087 = vmatprep.subr.bf16.mxu0 %v8548_v19 }
 0xbaf   :  { %8089 = vmatpush3.bf16.msra.mxu0 %v8088_v21 }
 0xbb0   :  { %8090 = vmatprep.subr.bf16.mxu0 %v8548_v19 }
 0xbb3   :  { %8092 = vmatpush3.bf16.msra.mxu0 %v8091_v18 }
 0xbb4   :  { %8093 = vmatprep.subr.bf16.mxu0 %v8548_v19  ;;  %v7001_v19 = vld [vmem:[%s12331_s15] ss:$0 sm:$0xff] }
 0xbb7   :  { %8095 = vmatpush3.bf16.msra.mxu0 %v8094_v33 }
 0xc6d   :  { %v6254_v49 = vpop.f32.mrb[98].mxu0 }
 0xc6e   :  { %v6255_v50 = vadd.f32 %v7000_v46, %v6254_v49  ;;  %v7348_v57 = vpop.f32.mrb[99].mxu0 }
 0xc70   :  { %v6258_v41 = vmax.f32 %v6255_v50, 0.0 }
 0xc72   :  { %7382 = vmatmul.mubr.f32.vlgmr.msra.gmra.mrb[100].mxu0 %v6258_v41 }
 0xd45   :  { %v6348_v39 = vpop.f32.mrb[100].mxu0 }
 0xd46   :  { %v6349_v40 = vadd.f32 %v7001_v19, %v6348_v39  ;;  %v7383_v42 = vpop.f32.mrb[101].mxu0 }
 0xd48   :  { %6352 = vst [vmem:[%s12332_s16] sm:$0xff] %v6349_v40 }

</bundles_post_ra>
